<compile_context>
chip_gen: v6e
topology: v6e:2x2x1
jax: 0.10.0
libtpu: 0.0.40
codegen_flags: <defaults>
</compile_context>

<pallas_src>
import jax
import jax.numpy as jnp
from jax import lax
from jax.experimental import pallas as pl
from jax.experimental.pallas import tpu as pltpu

H = 16          # spatial height
W = 16          # spatial width
HB = 4          # rows per processing chunk (bounds accumulator to <= 16 vregs)
NCHUNK = H // HB
CMAX = 256      # max channel count in the network


# ---------------------------------------------------------------------------
# Fused Pallas kernel: conv1 + 3x (dw3x3 + pw1x1) + global-avg-pool + FC
# ---------------------------------------------------------------------------
def _dscnn_fused_kernel(
    x_ref,
    w1_ref, s1_ref, b1_ref,
    wd1_ref, sd1_ref, bd1_ref, wp1_ref, sp1_ref, bp1_ref,
    wd2_ref, sd2_ref, bd2_ref, wp2_ref, sp2_ref, bp2_ref,
    wd3_ref, sd3_ref, bd3_ref, wp3_ref, sp3_ref, bp3_ref,
    wf_ref, bf_ref,
    o_ref,
    pa_ref, pb_ref, f_ref,
):
    f32 = jnp.float32

    # ---- zero the 1-pixel halo of both padded activation buffers -----------
    # (interior writes below never touch the halo, so this is all the padding
    #  the 3x3 convs need; done every grid step so stale scratch is harmless)
    def zero_halo(ref):
        ref[pl.ds(0, 1), pl.ds(0, W + 2), pl.ds(0, CMAX)] = jnp.zeros((1, W + 2, CMAX), f32)
        ref[pl.ds(H + 1, 1), pl.ds(0, W + 2), pl.ds(0, CMAX)] = jnp.zeros((1, W + 2, CMAX), f32)
        ref[pl.ds(1, H), pl.ds(0, 1), pl.ds(0, CMAX)] = jnp.zeros((H, 1, CMAX), f32)
        ref[pl.ds(1, H), pl.ds(W + 1, 1), pl.ds(0, CMAX)] = jnp.zeros((H, 1, CMAX), f32)

    zero_halo(pa_ref)
    zero_halo(pb_ref)

    # ---- conv1 input: replicate the single input channel across 64 lanes ----
    x = x_ref[0]                                               # (H, W, 1)
    pa_ref[pl.ds(1, H), pl.ds(1, W), pl.ds(0, 64)] = jnp.broadcast_to(x, (H, W, 64))

    # ---- destination helpers -------------------------------------------------
    def store_pad(dst_ref, c):
        def store(h0, y):                                      # y: (HB, W, c)
            dst_ref[pl.ds(h0 + 1, HB), pl.ds(1, W), pl.ds(0, c)] = y
        return store

    def store_flat(c):
        def store(h0, y):                                      # y: (HB, W, c)
            f_ref[pl.ds(h0, HB), pl.ds(0, W), pl.ds(0, c)] = y
        return store

    # ---- 3x3 "depthwise" conv + BN(eval) + ReLU, chunked over rows (VPU) -----
    def dw3x3_bn_relu(src_ref, c, w_ref, s_ref, b_ref, store):
        taps = [w_ref[dy, dx, :] for dy in range(3) for dx in range(3)]
        sv = s_ref[0, :]
        bv = b_ref[0, :]

        def chunk(ci, carry):
            h0 = ci * HB
            acc = jnp.zeros((HB, W, c), f32)
            for dy in range(3):
                for dx in range(3):
                    xs = src_ref[pl.ds(h0 + dy, HB), pl.ds(dx, W), pl.ds(0, c)]
                    acc = acc + xs * taps[3 * dy + dx]
            store(h0, jnp.maximum(acc * sv + bv, 0.0))
            return carry

        lax.fori_loop(0, NCHUNK, chunk, 0)

    # ---- 1x1 conv (bf16 MXU, f32 acc) + BN(eval) + ReLU, chunked over rows ---
    def pw1x1_bn_relu(cin, cout, w_ref, s_ref, b_ref, store):
        sv = s_ref[0, :]
        bv = b_ref[0, :]

        def chunk(ci, carry):
            h0 = ci * HB
            a = f_ref[pl.ds(h0, HB), pl.ds(0, W), pl.ds(0, cin)]
            a = a.reshape(HB * W, cin).astype(jnp.bfloat16)
            acc = jnp.dot(a, w_ref[...], preferred_element_type=f32)   # (HB*W, cout)
            y = jnp.maximum(acc * sv + bv, 0.0)
            store(h0, y.reshape(HB, W, cout))
            return carry

        lax.fori_loop(0, NCHUNK, chunk, 0)

    # ---- layer stack ---------------------------------------------------------
    # conv1 (1 -> 64): depthwise-style 9-tap loop on the replicated input.
    dw3x3_bn_relu(pa_ref, 64, w1_ref, s1_ref, b1_ref, store_pad(pb_ref, 64))
    # block 1: dw 64, pw 64 -> 128
    dw3x3_bn_relu(pb_ref, 64, wd1_ref, sd1_ref, bd1_ref, store_flat(64))
    pw1x1_bn_relu(64, 128, wp1_ref, sp1_ref, bp1_ref, store_pad(pa_ref, 128))
    # block 2: dw 128, pw 128 -> 256
    dw3x3_bn_relu(pa_ref, 128, wd2_ref, sd2_ref, bd2_ref, store_flat(128))
    pw1x1_bn_relu(128, 256, wp2_ref, sp2_ref, bp2_ref, store_pad(pb_ref, 256))
    # block 3: dw 256
    dw3x3_bn_relu(pb_ref, 256, wd3_ref, sd3_ref, bd3_ref, store_flat(256))

    # pw3 (256 -> 256) + global-avg-pool + FC, fused per chunk:
    #   mean_rows(relu(...) @ Wf) == mean_rows(relu(...)) @ Wf
    sv = sp3_ref[0, :]
    bv = bp3_ref[0, :]
    ncp = o_ref.shape[-1]                                       # lane-padded classes

    def tail_chunk(ci, psum):
        h0 = ci * HB
        a = f_ref[pl.ds(h0, HB), pl.ds(0, W), pl.ds(0, 256)]
        a = a.reshape(HB * W, 256).astype(jnp.bfloat16)
        acc = jnp.dot(a, wp3_ref[...], preferred_element_type=f32)      # (HB*W, 256)
        y = jnp.maximum(acc * sv + bv, 0.0)
        z = jnp.dot(y, wf_ref[...], preferred_element_type=f32)         # (HB*W, ncp)
        return psum + jnp.sum(z, axis=0, keepdims=True)

    psum = lax.fori_loop(0, NCHUNK, tail_chunk, jnp.zeros((1, ncp), f32))
    o_ref[0] = psum * (1.0 / (H * W)) + bf_ref[...]


# ---------------------------------------------------------------------------
# Wrapper
# ---------------------------------------------------------------------------
def _full_spec(arr):
    idx = (0,) * arr.ndim
    return pl.BlockSpec(arr.shape, lambda i, _idx=idx: _idx)


def dscnn_forward(x_nchw, p, num_classes):
    """Fused Pallas forward.  Input: (N, 1, H, W) NCHW like PyTorch."""
    x = jnp.transpose(x_nchw, (0, 2, 3, 1)).astype(jnp.float32)     # (N, H, W, 1)
    n = x.shape[0]
    ncp = ((num_classes + 127) // 128) * 128                         # lane-dense FC out

    bf16 = jnp.bfloat16
    r = lambda a: a.reshape(1, -1)
    wf_pad = jnp.zeros((256, ncp), jnp.float32).at[:, :num_classes].set(p['wf'])
    bf_pad = jnp.zeros((1, ncp), jnp.float32).at[0, :num_classes].set(p['bf'])

    args = (
        p['w1'], r(p['s1']), r(p['b1']),
        p['wd1'], r(p['sd1']), r(p['bd1']),
        p['wp1'].astype(bf16), r(p['sp1']), r(p['bp1']),
        p['wd2'], r(p['sd2']), r(p['bd2']),
        p['wp2'].astype(bf16), r(p['sp2']), r(p['bp2']),
        p['wd3'], r(p['sd3']), r(p['bd3']),
        p['wp3'].astype(bf16), r(p['sp3']), r(p['bp3']),
        wf_pad, bf_pad,
    )

    flops_per_img = (
        2 * H * W * 9 * (64 + 64 + 128 + 256)                        # conv1 + dw taps
        + 2 * H * W * (64 * 128 + 128 * 256 + 256 * 256)             # pointwise matmuls
        + 2 * H * W * 256 * ncp                                      # FC (pre-pool)
    )
    bytes_accessed = (int(x.size) * 4
                      + sum(int(a.size) * a.dtype.itemsize for a in args)
                      + n * ncp * 4)

    out = pl.pallas_call(
        _dscnn_fused_kernel,
        out_shape=jax.ShapeDtypeStruct((n, 1, ncp), jnp.float32),
        grid_spec=pltpu.PrefetchScalarGridSpec(
            num_scalar_prefetch=0,
            grid=(n,),
            in_specs=[pl.BlockSpec((1, H, W, 1), lambda i: (i, 0, 0, 0))]
            + [_full_spec(a) for a in args],
            out_specs=pl.BlockSpec((1, 1, ncp), lambda i: (i, 0, 0)),
            scratch_shapes=[
                pltpu.VMEM((H + 2, W + 2, CMAX), jnp.float32),   # padded ping buffer
                pltpu.VMEM((H + 2, W + 2, CMAX), jnp.float32),   # padded pong buffer
                pltpu.VMEM((H, W, CMAX), jnp.float32),           # flat matmul buffer
            ],
        ),
        compiler_params=pltpu.CompilerParams(dimension_semantics=("parallel",)),
        cost_estimate=pl.CostEstimate(
            flops=int(n * flops_per_img),
            transcendentals=0,
            bytes_accessed=int(bytes_accessed)),
    )(x, *args)
    return out.reshape(n, ncp)[:, :num_classes]


# ---------------------------------------------------------------------------
# Parameters (deterministic synthetic init; BN folded to scale/shift)
# ---------------------------------------------------------------------------
def _fold_bn(conv_bias, gamma, beta, mean, var, eps=1e-5):
    scale = gamma / jnp.sqrt(var + eps)
    shift = beta + scale * (conv_bias - mean)
    return scale, shift


def init_params(key, num_classes):
    keys = iter(jax.random.split(key, 64))

    def norm(shape, std=0.05):
        return std * jax.random.normal(next(keys), shape, dtype=jnp.float32)

    def bn(c):
        gamma = 1.0 + 0.1 * jax.random.normal(next(keys), (c,), jnp.float32)
        beta = 0.1 * jax.random.normal(next(keys), (c,), jnp.float32)
        mean = 0.1 * jax.random.normal(next(keys), (c,), jnp.float32)
        var = jax.random.uniform(next(keys), (c,), jnp.float32, 0.5, 1.5)
        return gamma, beta, mean, var

    p = {}
    # conv1: 1 -> 64
    p['w1'] = norm((3, 3, 64))
    p['s1'], p['b1'] = _fold_bn(norm((64,)), *bn(64))
    # block 1: dw 64, pw 64 -> 128
    p['wd1'] = norm((3, 3, 64))
    p['sd1'], p['bd1'] = _fold_bn(norm((64,)), *bn(64))
    p['wp1'] = norm((64, 128))
    p['sp1'], p['bp1'] = _fold_bn(norm((128,)), *bn(128))
    # block 2: dw 128, pw 128 -> 256
    p['wd2'] = norm((3, 3, 128))
    p['sd2'], p['bd2'] = _fold_bn(norm((128,)), *bn(128))
    p['wp2'] = norm((128, 256))
    p['sp2'], p['bp2'] = _fold_bn(norm((256,)), *bn(256))
    # block 3: dw 256, pw 256 -> 256
    p['wd3'] = norm((3, 3, 256))
    p['sd3'], p['bd3'] = _fold_bn(norm((256,)), *bn(256))
    p['wp3'] = norm((256, 256))
    p['sp3'], p['bp3'] = _fold_bn(norm((256,)), *bn(256))
    # fc: 256 -> num_classes
    p['wf'] = norm((256, num_classes))
    p['bf'] = norm((num_classes,))
    return p


# ---------------------------------------------------------------------------
# Pure-JAX reference (lax.conv, f32 HIGHEST) for validation
# ---------------------------------------------------------------------------
def dscnn_reference(x_nchw, p):
    dn = ('NHWC', 'HWIO', 'NHWC')

    def conv(x, w, fgc=1):
        return lax.conv_general_dilated(
            x, w, (1, 1), 'SAME', dimension_numbers=dn,
            feature_group_count=fgc, precision=lax.Precision.HIGHEST)

    def bnrelu(x, s, b):
        return jnp.maximum(x * s + b, 0.0)

    x = jnp.transpose(x_nchw, (0, 2, 3, 1)).astype(jnp.float32)
    x = bnrelu(conv(x, p['w1'][:, :, None, :]), p['s1'], p['b1'])
    x = bnrelu(conv(x, p['wd1'][:, :, None, :], fgc=64), p['sd1'], p['bd1'])
    x = bnrelu(conv(x, p['wp1'][None, None]), p['sp1'], p['bp1'])
    x = bnrelu(conv(x, p['wd2'][:, :, None, :], fgc=128), p['sd2'], p['bd2'])
    x = bnrelu(conv(x, p['wp2'][None, None]), p['sp2'], p['bp2'])
    x = bnrelu(conv(x, p['wd3'][:, :, None, :], fgc=256), p['sd3'], p['bd3'])
    x = bnrelu(conv(x, p['wp3'][None, None]), p['sp3'], p['bp3'])
    pooled = jnp.mean(x, axis=(1, 2))
    return pooled @ p['wf'] + p['bf']


# ---------------------------------------------------------------------------
if __name__ == "__main__":
    # TODO(synk): BatchNorm training-mode (batch statistics) is not modeled;
    # eval-mode running-stats semantics (per-channel affine) are used instead.
    num_classes = 10
    key = jax.random.PRNGKey(0)
    kx, kp = jax.random.split(key)
    x = jax.random.normal(kx, (2, 1, 16, 16), dtype=jnp.float32)   # NCHW input

    params = init_params(kp, num_classes)

    fwd = jax.jit(lambda xx, pp: dscnn_forward(xx, pp, num_classes))
    out = jax.block_until_ready(fwd(x, params))
    assert out.shape == (2, num_classes)
    assert bool(jnp.all(jnp.isfinite(out)))

    ref = jax.block_until_ready(dscnn_reference(x, params))
    # Pointwise convs use bf16 MXU inputs (f32 accumulate), so the tolerance is
    # slightly looser than a pure-f32 comparison.
    rel_err = float(jnp.max(jnp.abs(out - ref)) / (jnp.max(jnp.abs(ref)) + 1e-6))
    assert rel_err < 2e-2, f"mismatch vs reference: rel_err={rel_err}"

    print("KERNEL_OK")
</pallas_src>

<mosaic_0001>
module attributes {stable_mosaic.version = 11 : i64} {
  func.func @_dscnn_fused_kernel(%arg0: i32, %arg1: memref<1x16x16x1xf32, #tpu.memory_space<vmem>>, %arg2: memref<3x3x64xf32, #tpu.memory_space<vmem>>, %arg3: memref<1x64xf32, #tpu.memory_space<vmem>>, %arg4: memref<1x64xf32, #tpu.memory_space<vmem>>, %arg5: memref<3x3x64xf32, #tpu.memory_space<vmem>>, %arg6: memref<1x64xf32, #tpu.memory_space<vmem>>, %arg7: memref<1x64xf32, #tpu.memory_space<vmem>>, %arg8: memref<64x128xbf16, #tpu.memory_space<vmem>>, %arg9: memref<1x128xf32, #tpu.memory_space<vmem>>, %arg10: memref<1x128xf32, #tpu.memory_space<vmem>>, %arg11: memref<3x3x128xf32, #tpu.memory_space<vmem>>, %arg12: memref<1x128xf32, #tpu.memory_space<vmem>>, %arg13: memref<1x128xf32, #tpu.memory_space<vmem>>, %arg14: memref<128x256xbf16, #tpu.memory_space<vmem>>, %arg15: memref<1x256xf32, #tpu.memory_space<vmem>>, %arg16: memref<1x256xf32, #tpu.memory_space<vmem>>, %arg17: memref<3x3x256xf32, #tpu.memory_space<vmem>>, %arg18: memref<1x256xf32, #tpu.memory_space<vmem>>, %arg19: memref<1x256xf32, #tpu.memory_space<vmem>>, %arg20: memref<256x256xbf16, #tpu.memory_space<vmem>>, %arg21: memref<1x256xf32, #tpu.memory_space<vmem>>, %arg22: memref<1x256xf32, #tpu.memory_space<vmem>>, %arg23: memref<256x128xf32, #tpu.memory_space<vmem>>, %arg24: memref<1x128xf32, #tpu.memory_space<vmem>>, %arg25: memref<1x1x128xf32, #tpu.memory_space<vmem>>, %arg26: memref<18x18x256xf32, #tpu.memory_space<vmem>>, %arg27: memref<18x18x256xf32, #tpu.memory_space<vmem>>, %arg28: memref<16x16x256xf32, #tpu.memory_space<vmem>>) attributes {dimension_semantics = [#tpu.dimension_semantics<parallel>], iteration_bounds = array<i64: 2>, scalar_prefetch = 0 : i64, scratch_operands = 3 : i64, tpu.core_type = #tpu.core_type<tc>, window_params = [{transform_indices = @transform_0, window_bounds = array<i64: 1, 16, 16, 1>}, {pipeline_mode = #tpu.pipeline_mode<synchronous>, transform_indices = @transform_1, window_bounds = array<i64: 3, 3, 64>}, {pipeline_mode = #tpu.pipeline_mode<synchronous>, transform_indices = @transform_2, window_bounds = array<i64: 1, 64>}, {pipeline_mode = #tpu.pipeline_mode<synchronous>, transform_indices = @transform_3, window_bounds = array<i64: 1, 64>}, {pipeline_mode = #tpu.pipeline_mode<synchronous>, transform_indices = @transform_4, window_bounds = array<i64: 3, 3, 64>}, {pipeline_mode = #tpu.pipeline_mode<synchronous>, transform_indices = @transform_5, window_bounds = array<i64: 1, 64>}, {pipeline_mode = #tpu.pipeline_mode<synchronous>, transform_indices = @transform_6, window_bounds = array<i64: 1, 64>}, {pipeline_mode = #tpu.pipeline_mode<synchronous>, transform_indices = @transform_7, window_bounds = array<i64: 64, 128>}, {pipeline_mode = #tpu.pipeline_mode<synchronous>, transform_indices = @transform_8, window_bounds = array<i64: 1, 128>}, {pipeline_mode = #tpu.pipeline_mode<synchronous>, transform_indices = @transform_9, window_bounds = array<i64: 1, 128>}, {pipeline_mode = #tpu.pipeline_mode<synchronous>, transform_indices = @transform_10, window_bounds = array<i64: 3, 3, 128>}, {pipeline_mode = #tpu.pipeline_mode<synchronous>, transform_indices = @transform_11, window_bounds = array<i64: 1, 128>}, {pipeline_mode = #tpu.pipeline_mode<synchronous>, transform_indices = @transform_12, window_bounds = array<i64: 1, 128>}, {pipeline_mode = #tpu.pipeline_mode<synchronous>, transform_indices = @transform_13, window_bounds = array<i64: 128, 256>}, {pipeline_mode = #tpu.pipeline_mode<synchronous>, transform_indices = @transform_14, window_bounds = array<i64: 1, 256>}, {pipeline_mode = #tpu.pipeline_mode<synchronous>, transform_indices = @transform_15, window_bounds = array<i64: 1, 256>}, {pipeline_mode = #tpu.pipeline_mode<synchronous>, transform_indices = @transform_16, window_bounds = array<i64: 3, 3, 256>}, {pipeline_mode = #tpu.pipeline_mode<synchronous>, transform_indices = @transform_17, window_bounds = array<i64: 1, 256>}, {pipeline_mode = #tpu.pipeline_mode<synchronous>, transform_indices = @transform_18, window_bounds = array<i64: 1, 256>}, {pipeline_mode = #tpu.pipeline_mode<synchronous>, transform_indices = @transform_19, window_bounds = array<i64: 256, 256>}, {pipeline_mode = #tpu.pipeline_mode<synchronous>, transform_indices = @transform_20, window_bounds = array<i64: 1, 256>}, {pipeline_mode = #tpu.pipeline_mode<synchronous>, transform_indices = @transform_21, window_bounds = array<i64: 1, 256>}, {pipeline_mode = #tpu.pipeline_mode<synchronous>, transform_indices = @transform_22, window_bounds = array<i64: 256, 128>}, {pipeline_mode = #tpu.pipeline_mode<synchronous>, transform_indices = @transform_23, window_bounds = array<i64: 1, 128>}, {transform_indices = @transform_24, window_bounds = array<i64: 1, 1, 128>}]} {
    %cst = arith.constant 0.000000e+00 : f32
    %0 = vector.broadcast %cst : f32 to vector<1x18x256xf32>
    %c0 = arith.constant 0 : index
    %c0_0 = arith.constant 0 : index
    %c0_1 = arith.constant 0 : index
    %1 = vector.load %arg26[%c0, %c0_0, %c0_1] : memref<18x18x256xf32, #tpu.memory_space<vmem>>, vector<1x18x256xf32>
    tpu.vector_store %arg26[%c0, %c0_0, %c0_1], %0 {strides = array<i32>} : memref<18x18x256xf32, #tpu.memory_space<vmem>>, vector<1x18x256xf32>,
    %cst_2 = arith.constant 0.000000e+00 : f32
    %2 = vector.broadcast %cst_2 : f32 to vector<1x18x256xf32>
    %c17 = arith.constant 17 : index
    %c0_3 = arith.constant 0 : index
    %c0_4 = arith.constant 0 : index
    %3 = vector.load %arg26[%c17, %c0_3, %c0_4] : memref<18x18x256xf32, #tpu.memory_space<vmem>>, vector<1x18x256xf32>
    tpu.vector_store %arg26[%c17, %c0_3, %c0_4], %2 {strides = array<i32>} : memref<18x18x256xf32, #tpu.memory_space<vmem>>, vector<1x18x256xf32>,
    %cst_5 = arith.constant 0.000000e+00 : f32
    %4 = vector.broadcast %cst_5 : f32 to vector<16x1x256xf32>
    %c1 = arith.constant 1 : index
    %c0_6 = arith.constant 0 : index
    %c0_7 = arith.constant 0 : index
    %5 = vector.load %arg26[%c1, %c0_6, %c0_7] : memref<18x18x256xf32, #tpu.memory_space<vmem>>, vector<16x1x256xf32>
    tpu.vector_store %arg26[%c1, %c0_6, %c0_7], %4 {strides = array<i32>} : memref<18x18x256xf32, #tpu.memory_space<vmem>>, vector<16x1x256xf32>,
    %cst_8 = arith.constant 0.000000e+00 : f32
    %6 = vector.broadcast %cst_8 : f32 to vector<16x1x256xf32>
    %c1_9 = arith.constant 1 : index
    %c17_10 = arith.constant 17 : index
    %c0_11 = arith.constant 0 : index
    %7 = vector.load %arg26[%c1_9, %c17_10, %c0_11] : memref<18x18x256xf32, #tpu.memory_space<vmem>>, vector<16x1x256xf32>
    tpu.vector_store %arg26[%c1_9, %c17_10, %c0_11], %6 {strides = array<i32>} : memref<18x18x256xf32, #tpu.memory_space<vmem>>, vector<16x1x256xf32>,
    %cst_12 = arith.constant 0.000000e+00 : f32
    %8 = vector.broadcast %cst_12 : f32 to vector<1x18x256xf32>
    %c0_13 = arith.constant 0 : index
    %c0_14 = arith.constant 0 : index
    %c0_15 = arith.constant 0 : index
    %9 = vector.load %arg27[%c0_13, %c0_14, %c0_15] : memref<18x18x256xf32, #tpu.memory_space<vmem>>, vector<1x18x256xf32>
    tpu.vector_store %arg27[%c0_13, %c0_14, %c0_15], %8 {strides = array<i32>} : memref<18x18x256xf32, #tpu.memory_space<vmem>>, vector<1x18x256xf32>,
    %cst_16 = arith.constant 0.000000e+00 : f32
    %10 = vector.broadcast %cst_16 : f32 to vector<1x18x256xf32>
    %c17_17 = arith.constant 17 : index
    %c0_18 = arith.constant 0 : index
    %c0_19 = arith.constant 0 : index
    %11 = vector.load %arg27[%c17_17, %c0_18, %c0_19] : memref<18x18x256xf32, #tpu.memory_space<vmem>>, vector<1x18x256xf32>
    tpu.vector_store %arg27[%c17_17, %c0_18, %c0_19], %10 {strides = array<i32>} : memref<18x18x256xf32, #tpu.memory_space<vmem>>, vector<1x18x256xf32>,
    %cst_20 = arith.constant 0.000000e+00 : f32
    %12 = vector.broadcast %cst_20 : f32 to vector<16x1x256xf32>
    %c1_21 = arith.constant 1 : index
    %c0_22 = arith.constant 0 : index
    %c0_23 = arith.constant 0 : index
    %13 = vector.load %arg27[%c1_21, %c0_22, %c0_23] : memref<18x18x256xf32, #tpu.memory_space<vmem>>, vector<16x1x256xf32>
    tpu.vector_store %arg27[%c1_21, %c0_22, %c0_23], %12 {strides = array<i32>} : memref<18x18x256xf32, #tpu.memory_space<vmem>>, vector<16x1x256xf32>,
    %cst_24 = arith.constant 0.000000e+00 : f32
    %14 = vector.broadcast %cst_24 : f32 to vector<16x1x256xf32>
    %c1_25 = arith.constant 1 : index
    %c17_26 = arith.constant 17 : index
    %c0_27 = arith.constant 0 : index
    %15 = vector.load %arg27[%c1_25, %c17_26, %c0_27] : memref<18x18x256xf32, #tpu.memory_space<vmem>>, vector<16x1x256xf32>
    tpu.vector_store %arg27[%c1_25, %c17_26, %c0_27], %14 {strides = array<i32>} : memref<18x18x256xf32, #tpu.memory_space<vmem>>, vector<16x1x256xf32>,
    %c0_28 = arith.constant 0 : index
    %c0_29 = arith.constant 0 : index
    %c0_30 = arith.constant 0 : index
    %c0_31 = arith.constant 0 : index
    %16 = vector.load %arg1[%c0_28, %c0_29, %c0_30, %c0_31] : memref<1x16x16x1xf32, #tpu.memory_space<vmem>>, vector<1x16x16x1xf32>
    %17 = vector.shape_cast %16 : vector<1x16x16x1xf32> to vector<16x16x1xf32>
    %18 = vector.shape_cast %17 : vector<16x16x1xf32> to vector<16x16x1xf32>
    %19 = vector.broadcast %18 : vector<16x16x1xf32> to vector<16x16x64xf32>
    %c1_32 = arith.constant 1 : index
    %c1_33 = arith.constant 1 : index
    %c0_34 = arith.constant 0 : index
    %20 = vector.load %arg26[%c1_32, %c1_33, %c0_34] : memref<18x18x256xf32, #tpu.memory_space<vmem>>, vector<16x16x64xf32>
    tpu.vector_store %arg26[%c1_32, %c1_33, %c0_34], %19 {strides = array<i32>} : memref<18x18x256xf32, #tpu.memory_space<vmem>>, vector<16x16x64xf32>,
    %c0_35 = arith.constant 0 : index
    %c0_36 = arith.constant 0 : index
    %c0_37 = arith.constant 0 : index
    %21 = vector.load %arg2[%c0_35, %c0_36, %c0_37] : memref<3x3x64xf32, #tpu.memory_space<vmem>>, vector<1x1x64xf32>
    %22 = vector.shape_cast %21 : vector<1x1x64xf32> to vector<64xf32>
    %c0_38 = arith.constant 0 : index
    %c1_39 = arith.constant 1 : index
    %c0_40 = arith.constant 0 : index
    %23 = vector.load %arg2[%c0_38, %c1_39, %c0_40] : memref<3x3x64xf32, #tpu.memory_space<vmem>>, vector<1x1x64xf32>
    %24 = vector.shape_cast %23 : vector<1x1x64xf32> to vector<64xf32>
    %c0_41 = arith.constant 0 : index
    %c2 = arith.constant 2 : index
    %c0_42 = arith.constant 0 : index
    %25 = vector.load %arg2[%c0_41, %c2, %c0_42] : memref<3x3x64xf32, #tpu.memory_space<vmem>>, vector<1x1x64xf32>
    %26 = vector.shape_cast %25 : vector<1x1x64xf32> to vector<64xf32>
    %c1_43 = arith.constant 1 : index
    %c0_44 = arith.constant 0 : index
    %c0_45 = arith.constant 0 : index
    %27 = vector.load %arg2[%c1_43, %c0_44, %c0_45] : memref<3x3x64xf32, #tpu.memory_space<vmem>>, vector<1x1x64xf32>
    %28 = vector.shape_cast %27 : vector<1x1x64xf32> to vector<64xf32>
    %c1_46 = arith.constant 1 : index
    %c1_47 = arith.constant 1 : index
    %c0_48 = arith.constant 0 : index
    %29 = vector.load %arg2[%c1_46, %c1_47, %c0_48] : memref<3x3x64xf32, #tpu.memory_space<vmem>>, vector<1x1x64xf32>
    %30 = vector.shape_cast %29 : vector<1x1x64xf32> to vector<64xf32>
    %c1_49 = arith.constant 1 : index
    %c2_50 = arith.constant 2 : index
    %c0_51 = arith.constant 0 : index
    %31 = vector.load %arg2[%c1_49, %c2_50, %c0_51] : memref<3x3x64xf32, #tpu.memory_space<vmem>>, vector<1x1x64xf32>
    %32 = vector.shape_cast %31 : vector<1x1x64xf32> to vector<64xf32>
    %c2_52 = arith.constant 2 : index
    %c0_53 = arith.constant 0 : index
    %c0_54 = arith.constant 0 : index
    %33 = vector.load %arg2[%c2_52, %c0_53, %c0_54] : memref<3x3x64xf32, #tpu.memory_space<vmem>>, vector<1x1x64xf32>
    %34 = vector.shape_cast %33 : vector<1x1x64xf32> to vector<64xf32>
    %c2_55 = arith.constant 2 : index
    %c1_56 = arith.constant 1 : index
    %c0_57 = arith.constant 0 : index
    %35 = vector.load %arg2[%c2_55, %c1_56, %c0_57] : memref<3x3x64xf32, #tpu.memory_space<vmem>>, vector<1x1x64xf32>
    %36 = vector.shape_cast %35 : vector<1x1x64xf32> to vector<64xf32>
    %c2_58 = arith.constant 2 : index
    %c2_59 = arith.constant 2 : index
    %c0_60 = arith.constant 0 : index
    %37 = vector.load %arg2[%c2_58, %c2_59, %c0_60] : memref<3x3x64xf32, #tpu.memory_space<vmem>>, vector<1x1x64xf32>
    %38 = vector.shape_cast %37 : vector<1x1x64xf32> to vector<64xf32>
    %c0_61 = arith.constant 0 : index
    %c0_62 = arith.constant 0 : index
    %39 = vector.load %arg3[%c0_61, %c0_62] : memref<1x64xf32, #tpu.memory_space<vmem>>, vector<1x64xf32>
    %40 = vector.shape_cast %39 : vector<1x64xf32> to vector<64xf32>
    %c0_63 = arith.constant 0 : index
    %c0_64 = arith.constant 0 : index
    %41 = vector.load %arg4[%c0_63, %c0_64] : memref<1x64xf32, #tpu.memory_space<vmem>>, vector<1x64xf32>
    %42 = vector.shape_cast %41 : vector<1x64xf32> to vector<64xf32>
    %c0_i32 = arith.constant 0 : i32
    %c4_i32 = arith.constant 4 : i32
    %43 = arith.addi %c0_i32, %c4_i32 : i32
    %c1_i32 = arith.constant 1 : i32
    scf.for %arg29 = %c0_i32 to %43 step %c1_i32  : i32 {
      %c4_i32_202 = arith.constant 4 : i32
      %137 = arith.muli %arg29, %c4_i32_202 : i32
      %cst_203 = arith.constant 0.000000e+00 : f32
      %138 = vector.broadcast %cst_203 : f32 to vector<4x16x64xf32>
      %c0_i32_204 = arith.constant 0 : i32
      %139 = arith.addi %137, %c0_i32_204 : i32
      %140 = arith.index_cast %139 : i32 to index
      %c0_205 = arith.constant 0 : index
      %c0_206 = arith.constant 0 : index
      %141 = vector.load %arg26[%140, %c0_205, %c0_206] : memref<18x18x256xf32, #tpu.memory_space<vmem>>, vector<4x16x64xf32>
      %142 = vector.shape_cast %22 : vector<64xf32> to vector<1x1x64xf32>
      %143 = vector.broadcast %142 : vector<1x1x64xf32> to vector<4x16x64xf32>
      %144 = arith.mulf %141, %143 : vector<4x16x64xf32>
      %145 = arith.addf %138, %144 : vector<4x16x64xf32>
      %c0_i32_207 = arith.constant 0 : i32
      %146 = arith.addi %137, %c0_i32_207 : i32
      %147 = arith.index_cast %146 : i32 to index
      %c1_208 = arith.constant 1 : index
      %c0_209 = arith.constant 0 : index
      %148 = vector.load %arg26[%147, %c1_208, %c0_209] : memref<18x18x256xf32, #tpu.memory_space<vmem>>, vector<4x16x64xf32>
      %149 = vector.shape_cast %24 : vector<64xf32> to vector<1x1x64xf32>
      %150 = vector.broadcast %149 : vector<1x1x64xf32> to vector<4x16x64xf32>
      %151 = arith.mulf %148, %150 : vector<4x16x64xf32>
      %152 = arith.addf %145, %151 : vector<4x16x64xf32>
      %c0_i32_210 = arith.constant 0 : i32
      %153 = arith.addi %137, %c0_i32_210 : i32
      %154 = arith.index_cast %153 : i32 to index
      %c2_211 = arith.constant 2 : index
      %c0_212 = arith.constant 0 : index
      %155 = vector.load %arg26[%154, %c2_211, %c0_212] : memref<18x18x256xf32, #tpu.memory_space<vmem>>, vector<4x16x64xf32>
      %156 = vector.shape_cast %26 : vector<64xf32> to vector<1x1x64xf32>
      %157 = vector.broadcast %156 : vector<1x1x64xf32> to vector<4x16x64xf32>
      %158 = arith.mulf %155, %157 : vector<4x16x64xf32>
      %159 = arith.addf %152, %158 : vector<4x16x64xf32>
      %c1_i32_213 = arith.constant 1 : i32
      %160 = arith.addi %137, %c1_i32_213 : i32
      %161 = arith.index_cast %160 : i32 to index
      %c0_214 = arith.constant 0 : index
      %c0_215 = arith.constant 0 : index
      %162 = vector.load %arg26[%161, %c0_214, %c0_215] : memref<18x18x256xf32, #tpu.memory_space<vmem>>, vector<4x16x64xf32>
      %163 = vector.shape_cast %28 : vector<64xf32> to vector<1x1x64xf32>
      %164 = vector.broadcast %163 : vector<1x1x64xf32> to vector<4x16x64xf32>
      %165 = arith.mulf %162, %164 : vector<4x16x64xf32>
      %166 = arith.addf %159, %165 : vector<4x16x64xf32>
      %c1_i32_216 = arith.constant 1 : i32
      %167 = arith.addi %137, %c1_i32_216 : i32
      %168 = arith.index_cast %167 : i32 to index
      %c1_217 = arith.constant 1 : index
      %c0_218 = arith.constant 0 : index
      %169 = vector.load %arg26[%168, %c1_217, %c0_218] : memref<18x18x256xf32, #tpu.memory_space<vmem>>, vector<4x16x64xf32>
      %170 = vector.shape_cast %30 : vector<64xf32> to vector<1x1x64xf32>
      %171 = vector.broadcast %170 : vector<1x1x64xf32> to vector<4x16x64xf32>
      %172 = arith.mulf %169, %171 : vector<4x16x64xf32>
      %173 = arith.addf %166, %172 : vector<4x16x64xf32>
      %c1_i32_219 = arith.constant 1 : i32
      %174 = arith.addi %137, %c1_i32_219 : i32
      %175 = arith.index_cast %174 : i32 to index
      %c2_220 = arith.constant 2 : index
      %c0_221 = arith.constant 0 : index
      %176 = vector.load %arg26[%175, %c2_220, %c0_221] : memref<18x18x256xf32, #tpu.memory_space<vmem>>, vector<4x16x64xf32>
      %177 = vector.shape_cast %32 : vector<64xf32> to vector<1x1x64xf32>
      %178 = vector.broadcast %177 : vector<1x1x64xf32> to vector<4x16x64xf32>
      %179 = arith.mulf %176, %178 : vector<4x16x64xf32>
      %180 = arith.addf %173, %179 : vector<4x16x64xf32>
      %c2_i32 = arith.constant 2 : i32
      %181 = arith.addi %137, %c2_i32 : i32
      %182 = arith.index_cast %181 : i32 to index
      %c0_222 = arith.constant 0 : index
      %c0_223 = arith.constant 0 : index
      %183 = vector.load %arg26[%182, %c0_222, %c0_223] : memref<18x18x256xf32, #tpu.memory_space<vmem>>, vector<4x16x64xf32>
      %184 = vector.shape_cast %34 : vector<64xf32> to vector<1x1x64xf32>
      %185 = vector.broadcast %184 : vector<1x1x64xf32> to vector<4x16x64xf32>
      %186 = arith.mulf %183, %185 : vector<4x16x64xf32>
      %187 = arith.addf %180, %186 : vector<4x16x64xf32>
      %c2_i32_224 = arith.constant 2 : i32
      %188 = arith.addi %137, %c2_i32_224 : i32
      %189 = arith.index_cast %188 : i32 to index
      %c1_225 = arith.constant 1 : index
      %c0_226 = arith.constant 0 : index
      %190 = vector.load %arg26[%189, %c1_225, %c0_226] : memref<18x18x256xf32, #tpu.memory_space<vmem>>, vector<4x16x64xf32>
      %191 = vector.shape_cast %36 : vector<64xf32> to vector<1x1x64xf32>
      %192 = vector.broadcast %191 : vector<1x1x64xf32> to vector<4x16x64xf32>
      %193 = arith.mulf %190, %192 : vector<4x16x64xf32>
      %194 = arith.addf %187, %193 : vector<4x16x64xf32>
      %c2_i32_227 = arith.constant 2 : i32
      %195 = arith.addi %137, %c2_i32_227 : i32
      %196 = arith.index_cast %195 : i32 to index
      %c2_228 = arith.constant 2 : index
      %c0_229 = arith.constant 0 : index
      %197 = vector.load %arg26[%196, %c2_228, %c0_229] : memref<18x18x256xf32, #tpu.memory_space<vmem>>, vector<4x16x64xf32>
      %198 = vector.shape_cast %38 : vector<64xf32> to vector<1x1x64xf32>
      %199 = vector.broadcast %198 : vector<1x1x64xf32> to vector<4x16x64xf32>
      %200 = arith.mulf %197, %199 : vector<4x16x64xf32>
      %201 = arith.addf %194, %200 : vector<4x16x64xf32>
      %202 = vector.shape_cast %40 : vector<64xf32> to vector<1x1x64xf32>
      %203 = vector.broadcast %202 : vector<1x1x64xf32> to vector<4x16x64xf32>
      %204 = arith.mulf %201, %203 : vector<4x16x64xf32>
      %205 = vector.shape_cast %42 : vector<64xf32> to vector<1x1x64xf32>
      %206 = vector.broadcast %205 : vector<1x1x64xf32> to vector<4x16x64xf32>
      %207 = arith.addf %204, %206 : vector<4x16x64xf32>
      %cst_230 = arith.constant 0.000000e+00 : f32
      %208 = vector.broadcast %cst_230 : f32 to vector<4x16x64xf32>
      %209 = arith.maximumf %207, %208 : vector<4x16x64xf32>
      %c1_i32_231 = arith.constant 1 : i32
      %210 = arith.addi %137, %c1_i32_231 : i32
      %211 = arith.index_cast %210 : i32 to index
      %c1_232 = arith.constant 1 : index
      %c0_233 = arith.constant 0 : index
      %212 = vector.load %arg27[%211, %c1_232, %c0_233] : memref<18x18x256xf32, #tpu.memory_space<vmem>>, vector<4x16x64xf32>
      tpu.vector_store %arg27[%211, %c1_232, %c0_233], %209 {strides = array<i32>} : memref<18x18x256xf32, #tpu.memory_space<vmem>>, vector<4x16x64xf32>,
    }
    %c4_i32_65 = arith.constant 4 : i32
    %c0_66 = arith.constant 0 : index
    %c0_67 = arith.constant 0 : index
    %c0_68 = arith.constant 0 : index
    %44 = vector.load %arg5[%c0_66, %c0_67, %c0_68] : memref<3x3x64xf32, #tpu.memory_space<vmem>>, vector<1x1x64xf32>
    %45 = vector.shape_cast %44 : vector<1x1x64xf32> to vector<64xf32>
    %c0_69 = arith.constant 0 : index
    %c1_70 = arith.constant 1 : index
    %c0_71 = arith.constant 0 : index
    %46 = vector.load %arg5[%c0_69, %c1_70, %c0_71] : memref<3x3x64xf32, #tpu.memory_space<vmem>>, vector<1x1x64xf32>
    %47 = vector.shape_cast %46 : vector<1x1x64xf32> to vector<64xf32>
    %c0_72 = arith.constant 0 : index
    %c2_73 = arith.constant 2 : index
    %c0_74 = arith.constant 0 : index
    %48 = vector.load %arg5[%c0_72, %c2_73, %c0_74] : memref<3x3x64xf32, #tpu.memory_space<vmem>>, vector<1x1x64xf32>
    %49 = vector.shape_cast %48 : vector<1x1x64xf32> to vector<64xf32>
    %c1_75 = arith.constant 1 : index
    %c0_76 = arith.constant 0 : index
    %c0_77 = arith.constant 0 : index
    %50 = vector.load %arg5[%c1_75, %c0_76, %c0_77] : memref<3x3x64xf32, #tpu.memory_space<vmem>>, vector<1x1x64xf32>
    %51 = vector.shape_cast %50 : vector<1x1x64xf32> to vector<64xf32>
    %c1_78 = arith.constant 1 : index
    %c1_79 = arith.constant 1 : index
    %c0_80 = arith.constant 0 : index
    %52 = vector.load %arg5[%c1_78, %c1_79, %c0_80] : memref<3x3x64xf32, #tpu.memory_space<vmem>>, vector<1x1x64xf32>
    %53 = vector.shape_cast %52 : vector<1x1x64xf32> to vector<64xf32>
    %c1_81 = arith.constant 1 : index
    %c2_82 = arith.constant 2 : index
    %c0_83 = arith.constant 0 : index
    %54 = vector.load %arg5[%c1_81, %c2_82, %c0_83] : memref<3x3x64xf32, #tpu.memory_space<vmem>>, vector<1x1x64xf32>
    %55 = vector.shape_cast %54 : vector<1x1x64xf32> to vector<64xf32>
    %c2_84 = arith.constant 2 : index
    %c0_85 = arith.constant 0 : index
    %c0_86 = arith.constant 0 : index
    %56 = vector.load %arg5[%c2_84, %c0_85, %c0_86] : memref<3x3x64xf32, #tpu.memory_space<vmem>>, vector<1x1x64xf32>
    %57 = vector.shape_cast %56 : vector<1x1x64xf32> to vector<64xf32>
    %c2_87 = arith.constant 2 : index
    %c1_88 = arith.constant 1 : index
    %c0_89 = arith.constant 0 : index
    %58 = vector.load %arg5[%c2_87, %c1_88, %c0_89] : memref<3x3x64xf32, #tpu.memory_space<vmem>>, vector<1x1x64xf32>
    %59 = vector.shape_cast %58 : vector<1x1x64xf32> to vector<64xf32>
    %c2_90 = arith.constant 2 : index
    %c2_91 = arith.constant 2 : index
    %c0_92 = arith.constant 0 : index
    %60 = vector.load %arg5[%c2_90, %c2_91, %c0_92] : memref<3x3x64xf32, #tpu.memory_space<vmem>>, vector<1x1x64xf32>
    %61 = vector.shape_cast %60 : vector<1x1x64xf32> to vector<64xf32>
    %c0_93 = arith.constant 0 : index
    %c0_94 = arith.constant 0 : index
    %62 = vector.load %arg6[%c0_93, %c0_94] : memref<1x64xf32, #tpu.memory_space<vmem>>, vector<1x64xf32>
    %63 = vector.shape_cast %62 : vector<1x64xf32> to vector<64xf32>
    %c0_95 = arith.constant 0 : index
    %c0_96 = arith.constant 0 : index
    %64 = vector.load %arg7[%c0_95, %c0_96] : memref<1x64xf32, #tpu.memory_space<vmem>>, vector<1x64xf32>
    %65 = vector.shape_cast %64 : vector<1x64xf32> to vector<64xf32>
    %c0_i32_97 = arith.constant 0 : i32
    %c4_i32_98 = arith.constant 4 : i32
    %66 = arith.addi %c0_i32_97, %c4_i32_98 : i32
    %c1_i32_99 = arith.constant 1 : i32
    scf.for %arg29 = %c0_i32_97 to %66 step %c1_i32_99  : i32 {
      %c4_i32_202 = arith.constant 4 : i32
      %137 = arith.muli %arg29, %c4_i32_202 : i32
      %cst_203 = arith.constant 0.000000e+00 : f32
      %138 = vector.broadcast %cst_203 : f32 to vector<4x16x64xf32>
      %c0_i32_204 = arith.constant 0 : i32
      %139 = arith.addi %137, %c0_i32_204 : i32
      %140 = arith.index_cast %139 : i32 to index
      %c0_205 = arith.constant 0 : index
      %c0_206 = arith.constant 0 : index
      %141 = vector.load %arg27[%140, %c0_205, %c0_206] : memref<18x18x256xf32, #tpu.memory_space<vmem>>, vector<4x16x64xf32>
      %142 = vector.shape_cast %45 : vector<64xf32> to vector<1x1x64xf32>
      %143 = vector.broadcast %142 : vector<1x1x64xf32> to vector<4x16x64xf32>
      %144 = arith.mulf %141, %143 : vector<4x16x64xf32>
      %145 = arith.addf %138, %144 : vector<4x16x64xf32>
      %c0_i32_207 = arith.constant 0 : i32
      %146 = arith.addi %137, %c0_i32_207 : i32
      %147 = arith.index_cast %146 : i32 to index
      %c1_208 = arith.constant 1 : index
      %c0_209 = arith.constant 0 : index
      %148 = vector.load %arg27[%147, %c1_208, %c0_209] : memref<18x18x256xf32, #tpu.memory_space<vmem>>, vector<4x16x64xf32>
      %149 = vector.shape_cast %47 : vector<64xf32> to vector<1x1x64xf32>
      %150 = vector.broadcast %149 : vector<1x1x64xf32> to vector<4x16x64xf32>
      %151 = arith.mulf %148, %150 : vector<4x16x64xf32>
      %152 = arith.addf %145, %151 : vector<4x16x64xf32>
      %c0_i32_210 = arith.constant 0 : i32
      %153 = arith.addi %137, %c0_i32_210 : i32
      %154 = arith.index_cast %153 : i32 to index
      %c2_211 = arith.constant 2 : index
      %c0_212 = arith.constant 0 : index
      %155 = vector.load %arg27[%154, %c2_211, %c0_212] : memref<18x18x256xf32, #tpu.memory_space<vmem>>, vector<4x16x64xf32>
      %156 = vector.shape_cast %49 : vector<64xf32> to vector<1x1x64xf32>
      %157 = vector.broadcast %156 : vector<1x1x64xf32> to vector<4x16x64xf32>
      %158 = arith.mulf %155, %157 : vector<4x16x64xf32>
      %159 = arith.addf %152, %158 : vector<4x16x64xf32>
      %c1_i32_213 = arith.constant 1 : i32
      %160 = arith.addi %137, %c1_i32_213 : i32
      %161 = arith.index_cast %160 : i32 to index
      %c0_214 = arith.constant 0 : index
      %c0_215 = arith.constant 0 : index
      %162 = vector.load %arg27[%161, %c0_214, %c0_215] : memref<18x18x256xf32, #tpu.memory_space<vmem>>, vector<4x16x64xf32>
      %163 = vector.shape_cast %51 : vector<64xf32> to vector<1x1x64xf32>
      %164 = vector.broadcast %163 : vector<1x1x64xf32> to vector<4x16x64xf32>
      %165 = arith.mulf %162, %164 : vector<4x16x64xf32>
      %166 = arith.addf %159, %165 : vector<4x16x64xf32>
      %c1_i32_216 = arith.constant 1 : i32
      %167 = arith.addi %137, %c1_i32_216 : i32
      %168 = arith.index_cast %167 : i32 to index
      %c1_217 = arith.constant 1 : index
      %c0_218 = arith.constant 0 : index
      %169 = vector.load %arg27[%168, %c1_217, %c0_218] : memref<18x18x256xf32, #tpu.memory_space<vmem>>, vector<4x16x64xf32>
      %170 = vector.shape_cast %53 : vector<64xf32> to vector<1x1x64xf32>
      %171 = vector.broadcast %170 : vector<1x1x64xf32> to vector<4x16x64xf32>
      %172 = arith.mulf %169, %171 : vector<4x16x64xf32>
      %173 = arith.addf %166, %172 : vector<4x16x64xf32>
      %c1_i32_219 = arith.constant 1 : i32
      %174 = arith.addi %137, %c1_i32_219 : i32
      %175 = arith.index_cast %174 : i32 to index
      %c2_220 = arith.constant 2 : index
      %c0_221 = arith.constant 0 : index
      %176 = vector.load %arg27[%175, %c2_220, %c0_221] : memref<18x18x256xf32, #tpu.memory_space<vmem>>, vector<4x16x64xf32>
      %177 = vector.shape_cast %55 : vector<64xf32> to vector<1x1x64xf32>
      %178 = vector.broadcast %177 : vector<1x1x64xf32> to vector<4x16x64xf32>
      %179 = arith.mulf %176, %178 : vector<4x16x64xf32>
      %180 = arith.addf %173, %179 : vector<4x16x64xf32>
      %c2_i32 = arith.constant 2 : i32
      %181 = arith.addi %137, %c2_i32 : i32
      %182 = arith.index_cast %181 : i32 to index
      %c0_222 = arith.constant 0 : index
      %c0_223 = arith.constant 0 : index
      %183 = vector.load %arg27[%182, %c0_222, %c0_223] : memref<18x18x256xf32, #tpu.memory_space<vmem>>, vector<4x16x64xf32>
      %184 = vector.shape_cast %57 : vector<64xf32> to vector<1x1x64xf32>
      %185 = vector.broadcast %184 : vector<1x1x64xf32> to vector<4x16x64xf32>
      %186 = arith.mulf %183, %185 : vector<4x16x64xf32>
      %187 = arith.addf %180, %186 : vector<4x16x64xf32>
      %c2_i32_224 = arith.constant 2 : i32
      %188 = arith.addi %137, %c2_i32_224 : i32
      %189 = arith.index_cast %188 : i32 to index
      %c1_225 = arith.constant 1 : index
      %c0_226 = arith.constant 0 : index
      %190 = vector.load %arg27[%189, %c1_225, %c0_226] : memref<18x18x256xf32, #tpu.memory_space<vmem>>, vector<4x16x64xf32>
      %191 = vector.shape_cast %59 : vector<64xf32> to vector<1x1x64xf32>
      %192 = vector.broadcast %191 : vector<1x1x64xf32> to vector<4x16x64xf32>
      %193 = arith.mulf %190, %192 : vector<4x16x64xf32>
      %194 = arith.addf %187, %193 : vector<4x16x64xf32>
      %c2_i32_227 = arith.constant 2 : i32
      %195 = arith.addi %137, %c2_i32_227 : i32
      %196 = arith.index_cast %195 : i32 to index
      %c2_228 = arith.constant 2 : index
      %c0_229 = arith.constant 0 : index
      %197 = vector.load %arg27[%196, %c2_228, %c0_229] : memref<18x18x256xf32, #tpu.memory_space<vmem>>, vector<4x16x64xf32>
      %198 = vector.shape_cast %61 : vector<64xf32> to vector<1x1x64xf32>
      %199 = vector.broadcast %198 : vector<1x1x64xf32> to vector<4x16x64xf32>
      %200 = arith.mulf %197, %199 : vector<4x16x64xf32>
      %201 = arith.addf %194, %200 : vector<4x16x64xf32>
      %202 = vector.shape_cast %63 : vector<64xf32> to vector<1x1x64xf32>
      %203 = vector.broadcast %202 : vector<1x1x64xf32> to vector<4x16x64xf32>
      %204 = arith.mulf %201, %203 : vector<4x16x64xf32>
      %205 = vector.shape_cast %65 : vector<64xf32> to vector<1x1x64xf32>
      %206 = vector.broadcast %205 : vector<1x1x64xf32> to vector<4x16x64xf32>
      %207 = arith.addf %204, %206 : vector<4x16x64xf32>
      %cst_230 = arith.constant 0.000000e+00 : f32
      %208 = vector.broadcast %cst_230 : f32 to vector<4x16x64xf32>
      %209 = arith.maximumf %207, %208 : vector<4x16x64xf32>
      %210 = arith.index_cast %137 : i32 to index
      %c0_231 = arith.constant 0 : index
      %c0_232 = arith.constant 0 : index
      %211 = vector.load %arg28[%210, %c0_231, %c0_232] : memref<16x16x256xf32, #tpu.memory_space<vmem>>, vector<4x16x64xf32>
      tpu.vector_store %arg28[%210, %c0_231, %c0_232], %209 {strides = array<i32>} : memref<16x16x256xf32, #tpu.memory_space<vmem>>, vector<4x16x64xf32>,
    }
    %c4_i32_100 = arith.constant 4 : i32
    %c0_101 = arith.constant 0 : index
    %c0_102 = arith.constant 0 : index
    %67 = vector.load %arg9[%c0_101, %c0_102] : memref<1x128xf32, #tpu.memory_space<vmem>>, vector<1x128xf32>
    %68 = vector.shape_cast %67 : vector<1x128xf32> to vector<128xf32>
    %c0_103 = arith.constant 0 : index
    %c0_104 = arith.constant 0 : index
    %69 = vector.load %arg10[%c0_103, %c0_104] : memref<1x128xf32, #tpu.memory_space<vmem>>, vector<1x128xf32>
    %70 = vector.shape_cast %69 : vector<1x128xf32> to vector<128xf32>
    %c0_i32_105 = arith.constant 0 : i32
    %c4_i32_106 = arith.constant 4 : i32
    %71 = arith.addi %c0_i32_105, %c4_i32_106 : i32
    %c1_i32_107 = arith.constant 1 : i32
    scf.for %arg29 = %c0_i32_105 to %71 step %c1_i32_107  : i32 {
      %c4_i32_202 = arith.constant 4 : i32
      %137 = arith.muli %arg29, %c4_i32_202 : i32
      %138 = arith.index_cast %137 : i32 to index
      %c0_203 = arith.constant 0 : index
      %c0_204 = arith.constant 0 : index
      %139 = vector.load %arg28[%138, %c0_203, %c0_204] : memref<16x16x256xf32, #tpu.memory_space<vmem>>, vector<4x16x64xf32>
      %140 = vector.shape_cast %139 : vector<4x16x64xf32> to vector<64x64xf32>
      %141 = arith.truncf %140 : vector<64x64xf32> to vector<64x64xbf16>
      %c0_205 = arith.constant 0 : index
      %c0_206 = arith.constant 0 : index
      %142 = vector.load %arg8[%c0_205, %c0_206] : memref<64x128xbf16, #tpu.memory_space<vmem>>, vector<64x128xbf16>
      %cst_207 = arith.constant dense<0.000000e+00> : vector<64x128xf32>
      %143 = tpu.matmul %141, %142, %cst_207 {dimension_numbers = #tpu.dot_dimension_numbers<[1], [0], [0], [1], [0, 0, 1, 1], [], []>} : vector<64x64xbf16>, vector<64x128xbf16>, vector<64x128xf32> -> vector<64x128xf32>
      %144 = vector.shape_cast %68 : vector<128xf32> to vector<1x128xf32>
      %145 = vector.broadcast %144 : vector<1x128xf32> to vector<64x128xf32>
      %146 = arith.mulf %143, %145 : vector<64x128xf32>
      %147 = vector.shape_cast %70 : vector<128xf32> to vector<1x128xf32>
      %148 = vector.broadcast %147 : vector<1x128xf32> to vector<64x128xf32>
      %149 = arith.addf %146, %148 : vector<64x128xf32>
      %cst_208 = arith.constant 0.000000e+00 : f32
      %150 = vector.broadcast %cst_208 : f32 to vector<64x128xf32>
      %151 = arith.maximumf %149, %150 : vector<64x128xf32>
      %152 = vector.shape_cast %151 : vector<64x128xf32> to vector<4x16x128xf32>
      %c1_i32_209 = arith.constant 1 : i32
      %153 = arith.addi %137, %c1_i32_209 : i32
      %154 = arith.index_cast %153 : i32 to index
      %c1_210 = arith.constant 1 : index
      %c0_211 = arith.constant 0 : index
      %155 = vector.load %arg26[%154, %c1_210, %c0_211] : memref<18x18x256xf32, #tpu.memory_space<vmem>>, vector<4x16x128xf32>
      tpu.vector_store %arg26[%154, %c1_210, %c0_211], %152 {strides = array<i32>} : memref<18x18x256xf32, #tpu.memory_space<vmem>>, vector<4x16x128xf32>,
    }
    %c4_i32_108 = arith.constant 4 : i32
    %c0_109 = arith.constant 0 : index
    %c0_110 = arith.constant 0 : index
    %c0_111 = arith.constant 0 : index
    %72 = vector.load %arg11[%c0_109, %c0_110, %c0_111] : memref<3x3x128xf32, #tpu.memory_space<vmem>>, vector<1x1x128xf32>
    %73 = vector.shape_cast %72 : vector<1x1x128xf32> to vector<128xf32>
    %c0_112 = arith.constant 0 : index
    %c1_113 = arith.constant 1 : index
    %c0_114 = arith.constant 0 : index
    %74 = vector.load %arg11[%c0_112, %c1_113, %c0_114] : memref<3x3x128xf32, #tpu.memory_space<vmem>>, vector<1x1x128xf32>
    %75 = vector.shape_cast %74 : vector<1x1x128xf32> to vector<128xf32>
    %c0_115 = arith.constant 0 : index
    %c2_116 = arith.constant 2 : index
    %c0_117 = arith.constant 0 : index
    %76 = vector.load %arg11[%c0_115, %c2_116, %c0_117] : memref<3x3x128xf32, #tpu.memory_space<vmem>>, vector<1x1x128xf32>
    %77 = vector.shape_cast %76 : vector<1x1x128xf32> to vector<128xf32>
    %c1_118 = arith.constant 1 : index
    %c0_119 = arith.constant 0 : index
    %c0_120 = arith.constant 0 : index
    %78 = vector.load %arg11[%c1_118, %c0_119, %c0_120] : memref<3x3x128xf32, #tpu.memory_space<vmem>>, vector<1x1x128xf32>
    %79 = vector.shape_cast %78 : vector<1x1x128xf32> to vector<128xf32>
    %c1_121 = arith.constant 1 : index
    %c1_122 = arith.constant 1 : index
    %c0_123 = arith.constant 0 : index
    %80 = vector.load %arg11[%c1_121, %c1_122, %c0_123] : memref<3x3x128xf32, #tpu.memory_space<vmem>>, vector<1x1x128xf32>
    %81 = vector.shape_cast %80 : vector<1x1x128xf32> to vector<128xf32>
    %c1_124 = arith.constant 1 : index
    %c2_125 = arith.constant 2 : index
    %c0_126 = arith.constant 0 : index
    %82 = vector.load %arg11[%c1_124, %c2_125, %c0_126] : memref<3x3x128xf32, #tpu.memory_space<vmem>>, vector<1x1x128xf32>
    %83 = vector.shape_cast %82 : vector<1x1x128xf32> to vector<128xf32>
    %c2_127 = arith.constant 2 : index
    %c0_128 = arith.constant 0 : index
    %c0_129 = arith.constant 0 : index
    %84 = vector.load %arg11[%c2_127, %c0_128, %c0_129] : memref<3x3x128xf32, #tpu.memory_space<vmem>>, vector<1x1x128xf32>
    %85 = vector.shape_cast %84 : vector<1x1x128xf32> to vector<128xf32>
    %c2_130 = arith.constant 2 : index
    %c1_131 = arith.constant 1 : index
    %c0_132 = arith.constant 0 : index
    %86 = vector.load %arg11[%c2_130, %c1_131, %c0_132] : memref<3x3x128xf32, #tpu.memory_space<vmem>>, vector<1x1x128xf32>
    %87 = vector.shape_cast %86 : vector<1x1x128xf32> to vector<128xf32>
    %c2_133 = arith.constant 2 : index
    %c2_134 = arith.constant 2 : index
    %c0_135 = arith.constant 0 : index
    %88 = vector.load %arg11[%c2_133, %c2_134, %c0_135] : memref<3x3x128xf32, #tpu.memory_space<vmem>>, vector<1x1x128xf32>
    %89 = vector.shape_cast %88 : vector<1x1x128xf32> to vector<128xf32>
    %c0_136 = arith.constant 0 : index
    %c0_137 = arith.constant 0 : index
    %90 = vector.load %arg12[%c0_136, %c0_137] : memref<1x128xf32, #tpu.memory_space<vmem>>, vector<1x128xf32>
    %91 = vector.shape_cast %90 : vector<1x128xf32> to vector<128xf32>
    %c0_138 = arith.constant 0 : index
    %c0_139 = arith.constant 0 : index
    %92 = vector.load %arg13[%c0_138, %c0_139] : memref<1x128xf32, #tpu.memory_space<vmem>>, vector<1x128xf32>
    %93 = vector.shape_cast %92 : vector<1x128xf32> to vector<128xf32>
    %c0_i32_140 = arith.constant 0 : i32
    %c4_i32_141 = arith.constant 4 : i32
    %94 = arith.addi %c0_i32_140, %c4_i32_141 : i32
    %c1_i32_142 = arith.constant 1 : i32
    scf.for %arg29 = %c0_i32_140 to %94 step %c1_i32_142  : i32 {
      %c4_i32_202 = arith.constant 4 : i32
      %137 = arith.muli %arg29, %c4_i32_202 : i32
      %cst_203 = arith.constant 0.000000e+00 : f32
      %138 = vector.broadcast %cst_203 : f32 to vector<4x16x128xf32>
      %c0_i32_204 = arith.constant 0 : i32
      %139 = arith.addi %137, %c0_i32_204 : i32
      %140 = arith.index_cast %139 : i32 to index
      %c0_205 = arith.constant 0 : index
      %c0_206 = arith.constant 0 : index
      %141 = vector.load %arg26[%140, %c0_205, %c0_206] : memref<18x18x256xf32, #tpu.memory_space<vmem>>, vector<4x16x128xf32>
      %142 = vector.shape_cast %73 : vector<128xf32> to vector<1x1x128xf32>
      %143 = vector.broadcast %142 : vector<1x1x128xf32> to vector<4x16x128xf32>
      %144 = arith.mulf %141, %143 : vector<4x16x128xf32>
      %145 = arith.addf %138, %144 : vector<4x16x128xf32>
      %c0_i32_207 = arith.constant 0 : i32
      %146 = arith.addi %137, %c0_i32_207 : i32
      %147 = arith.index_cast %146 : i32 to index
      %c1_208 = arith.constant 1 : index
      %c0_209 = arith.constant 0 : index
      %148 = vector.load %arg26[%147, %c1_208, %c0_209] : memref<18x18x256xf32, #tpu.memory_space<vmem>>, vector<4x16x128xf32>
      %149 = vector.shape_cast %75 : vector<128xf32> to vector<1x1x128xf32>
      %150 = vector.broadcast %149 : vector<1x1x128xf32> to vector<4x16x128xf32>
      %151 = arith.mulf %148, %150 : vector<4x16x128xf32>
      %152 = arith.addf %145, %151 : vector<4x16x128xf32>
      %c0_i32_210 = arith.constant 0 : i32
      %153 = arith.addi %137, %c0_i32_210 : i32
      %154 = arith.index_cast %153 : i32 to index
      %c2_211 = arith.constant 2 : index
      %c0_212 = arith.constant 0 : index
      %155 = vector.load %arg26[%154, %c2_211, %c0_212] : memref<18x18x256xf32, #tpu.memory_space<vmem>>, vector<4x16x128xf32>
      %156 = vector.shape_cast %77 : vector<128xf32> to vector<1x1x128xf32>
      %157 = vector.broadcast %156 : vector<1x1x128xf32> to vector<4x16x128xf32>
      %158 = arith.mulf %155, %157 : vector<4x16x128xf32>
      %159 = arith.addf %152, %158 : vector<4x16x128xf32>
      %c1_i32_213 = arith.constant 1 : i32
      %160 = arith.addi %137, %c1_i32_213 : i32
      %161 = arith.index_cast %160 : i32 to index
      %c0_214 = arith.constant 0 : index
      %c0_215 = arith.constant 0 : index
      %162 = vector.load %arg26[%161, %c0_214, %c0_215] : memref<18x18x256xf32, #tpu.memory_space<vmem>>, vector<4x16x128xf32>
      %163 = vector.shape_cast %79 : vector<128xf32> to vector<1x1x128xf32>
      %164 = vector.broadcast %163 : vector<1x1x128xf32> to vector<4x16x128xf32>
      %165 = arith.mulf %162, %164 : vector<4x16x128xf32>
      %166 = arith.addf %159, %165 : vector<4x16x128xf32>
      %c1_i32_216 = arith.constant 1 : i32
      %167 = arith.addi %137, %c1_i32_216 : i32
      %168 = arith.index_cast %167 : i32 to index
      %c1_217 = arith.constant 1 : index
      %c0_218 = arith.constant 0 : index
      %169 = vector.load %arg26[%168, %c1_217, %c0_218] : memref<18x18x256xf32, #tpu.memory_space<vmem>>, vector<4x16x128xf32>
      %170 = vector.shape_cast %81 : vector<128xf32> to vector<1x1x128xf32>
      %171 = vector.broadcast %170 : vector<1x1x128xf32> to vector<4x16x128xf32>
      %172 = arith.mulf %169, %171 : vector<4x16x128xf32>
      %173 = arith.addf %166, %172 : vector<4x16x128xf32>
      %c1_i32_219 = arith.constant 1 : i32
      %174 = arith.addi %137, %c1_i32_219 : i32
      %175 = arith.index_cast %174 : i32 to index
      %c2_220 = arith.constant 2 : index
      %c0_221 = arith.constant 0 : index
      %176 = vector.load %arg26[%175, %c2_220, %c0_221] : memref<18x18x256xf32, #tpu.memory_space<vmem>>, vector<4x16x128xf32>
      %177 = vector.shape_cast %83 : vector<128xf32> to vector<1x1x128xf32>
      %178 = vector.broadcast %177 : vector<1x1x128xf32> to vector<4x16x128xf32>
      %179 = arith.mulf %176, %178 : vector<4x16x128xf32>
      %180 = arith.addf %173, %179 : vector<4x16x128xf32>
      %c2_i32 = arith.constant 2 : i32
      %181 = arith.addi %137, %c2_i32 : i32
      %182 = arith.index_cast %181 : i32 to index
      %c0_222 = arith.constant 0 : index
      %c0_223 = arith.constant 0 : index
      %183 = vector.load %arg26[%182, %c0_222, %c0_223] : memref<18x18x256xf32, #tpu.memory_space<vmem>>, vector<4x16x128xf32>
      %184 = vector.shape_cast %85 : vector<128xf32> to vector<1x1x128xf32>
      %185 = vector.broadcast %184 : vector<1x1x128xf32> to vector<4x16x128xf32>
      %186 = arith.mulf %183, %185 : vector<4x16x128xf32>
      %187 = arith.addf %180, %186 : vector<4x16x128xf32>
      %c2_i32_224 = arith.constant 2 : i32
      %188 = arith.addi %137, %c2_i32_224 : i32
      %189 = arith.index_cast %188 : i32 to index
      %c1_225 = arith.constant 1 : index
      %c0_226 = arith.constant 0 : index
      %190 = vector.load %arg26[%189, %c1_225, %c0_226] : memref<18x18x256xf32, #tpu.memory_space<vmem>>, vector<4x16x128xf32>
      %191 = vector.shape_cast %87 : vector<128xf32> to vector<1x1x128xf32>
      %192 = vector.broadcast %191 : vector<1x1x128xf32> to vector<4x16x128xf32>
      %193 = arith.mulf %190, %192 : vector<4x16x128xf32>
      %194 = arith.addf %187, %193 : vector<4x16x128xf32>
      %c2_i32_227 = arith.constant 2 : i32
      %195 = arith.addi %137, %c2_i32_227 : i32
      %196 = arith.index_cast %195 : i32 to index
      %c2_228 = arith.constant 2 : index
      %c0_229 = arith.constant 0 : index
      %197 = vector.load %arg26[%196, %c2_228, %c0_229] : memref<18x18x256xf32, #tpu.memory_space<vmem>>, vector<4x16x128xf32>
      %198 = vector.shape_cast %89 : vector<128xf32> to vector<1x1x128xf32>
      %199 = vector.broadcast %198 : vector<1x1x128xf32> to vector<4x16x128xf32>
      %200 = arith.mulf %197, %199 : vector<4x16x128xf32>
      %201 = arith.addf %194, %200 : vector<4x16x128xf32>
      %202 = vector.shape_cast %91 : vector<128xf32> to vector<1x1x128xf32>
      %203 = vector.broadcast %202 : vector<1x1x128xf32> to vector<4x16x128xf32>
      %204 = arith.mulf %201, %203 : vector<4x16x128xf32>
      %205 = vector.shape_cast %93 : vector<128xf32> to vector<1x1x128xf32>
      %206 = vector.broadcast %205 : vector<1x1x128xf32> to vector<4x16x128xf32>
      %207 = arith.addf %204, %206 : vector<4x16x128xf32>
      %cst_230 = arith.constant 0.000000e+00 : f32
      %208 = vector.broadcast %cst_230 : f32 to vector<4x16x128xf32>
      %209 = arith.maximumf %207, %208 : vector<4x16x128xf32>
      %210 = arith.index_cast %137 : i32 to index
      %c0_231 = arith.constant 0 : index
      %c0_232 = arith.constant 0 : index
      %211 = vector.load %arg28[%210, %c0_231, %c0_232] : memref<16x16x256xf32, #tpu.memory_space<vmem>>, vector<4x16x128xf32>
      tpu.vector_store %arg28[%210, %c0_231, %c0_232], %209 {strides = array<i32>} : memref<16x16x256xf32, #tpu.memory_space<vmem>>, vector<4x16x128xf32>,
    }
    %c4_i32_143 = arith.constant 4 : i32
    %c0_144 = arith.constant 0 : index
    %c0_145 = arith.constant 0 : index
    %95 = vector.load %arg15[%c0_144, %c0_145] : memref<1x256xf32, #tpu.memory_space<vmem>>, vector<1x256xf32>
    %96 = vector.shape_cast %95 : vector<1x256xf32> to vector<256xf32>
    %c0_146 = arith.constant 0 : index
    %c0_147 = arith.constant 0 : index
    %97 = vector.load %arg16[%c0_146, %c0_147] : memref<1x256xf32, #tpu.memory_space<vmem>>, vector<1x256xf32>
    %98 = vector.shape_cast %97 : vector<1x256xf32> to vector<256xf32>
    %c0_i32_148 = arith.constant 0 : i32
    %c4_i32_149 = arith.constant 4 : i32
    %99 = arith.addi %c0_i32_148, %c4_i32_149 : i32
    %c1_i32_150 = arith.constant 1 : i32
    scf.for %arg29 = %c0_i32_148 to %99 step %c1_i32_150  : i32 {
      %c4_i32_202 = arith.constant 4 : i32
      %137 = arith.muli %arg29, %c4_i32_202 : i32
      %138 = arith.index_cast %137 : i32 to index
      %c0_203 = arith.constant 0 : index
      %c0_204 = arith.constant 0 : index
      %139 = vector.load %arg28[%138, %c0_203, %c0_204] : memref<16x16x256xf32, #tpu.memory_space<vmem>>, vector<4x16x128xf32>
      %140 = vector.shape_cast %139 : vector<4x16x128xf32> to vector<64x128xf32>
      %141 = arith.truncf %140 : vector<64x128xf32> to vector<64x128xbf16>
      %c0_205 = arith.constant 0 : index
      %c0_206 = arith.constant 0 : index
      %142 = vector.load %arg14[%c0_205, %c0_206] : memref<128x256xbf16, #tpu.memory_space<vmem>>, vector<128x256xbf16>
      %cst_207 = arith.constant dense<0.000000e+00> : vector<64x256xf32>
      %143 = tpu.matmul %141, %142, %cst_207 {dimension_numbers = #tpu.dot_dimension_numbers<[1], [0], [0], [1], [0, 0, 1, 1], [], []>} : vector<64x128xbf16>, vector<128x256xbf16>, vector<64x256xf32> -> vector<64x256xf32>
      %144 = vector.shape_cast %96 : vector<256xf32> to vector<1x256xf32>
      %145 = vector.broadcast %144 : vector<1x256xf32> to vector<64x256xf32>
      %146 = arith.mulf %143, %145 : vector<64x256xf32>
      %147 = vector.shape_cast %98 : vector<256xf32> to vector<1x256xf32>
      %148 = vector.broadcast %147 : vector<1x256xf32> to vector<64x256xf32>
      %149 = arith.addf %146, %148 : vector<64x256xf32>
      %cst_208 = arith.constant 0.000000e+00 : f32
      %150 = vector.broadcast %cst_208 : f32 to vector<64x256xf32>
      %151 = arith.maximumf %149, %150 : vector<64x256xf32>
      %152 = vector.shape_cast %151 : vector<64x256xf32> to vector<4x16x256xf32>
      %c1_i32_209 = arith.constant 1 : i32
      %153 = arith.addi %137, %c1_i32_209 : i32
      %154 = arith.index_cast %153 : i32 to index
      %c1_210 = arith.constant 1 : index
      %c0_211 = arith.constant 0 : index
      %155 = vector.load %arg27[%154, %c1_210, %c0_211] : memref<18x18x256xf32, #tpu.memory_space<vmem>>, vector<4x16x256xf32>
      tpu.vector_store %arg27[%154, %c1_210, %c0_211], %152 {strides = array<i32>} : memref<18x18x256xf32, #tpu.memory_space<vmem>>, vector<4x16x256xf32>,
    }
    %c4_i32_151 = arith.constant 4 : i32
    %c0_152 = arith.constant 0 : index
    %c0_153 = arith.constant 0 : index
    %c0_154 = arith.constant 0 : index
    %100 = vector.load %arg17[%c0_152, %c0_153, %c0_154] : memref<3x3x256xf32, #tpu.memory_space<vmem>>, vector<1x1x256xf32>
    %101 = vector.shape_cast %100 : vector<1x1x256xf32> to vector<256xf32>
    %c0_155 = arith.constant 0 : index
    %c1_156 = arith.constant 1 : index
    %c0_157 = arith.constant 0 : index
    %102 = vector.load %arg17[%c0_155, %c1_156, %c0_157] : memref<3x3x256xf32, #tpu.memory_space<vmem>>, vector<1x1x256xf32>
    %103 = vector.shape_cast %102 : vector<1x1x256xf32> to vector<256xf32>
    %c0_158 = arith.constant 0 : index
    %c2_159 = arith.constant 2 : index
    %c0_160 = arith.constant 0 : index
    %104 = vector.load %arg17[%c0_158, %c2_159, %c0_160] : memref<3x3x256xf32, #tpu.memory_space<vmem>>, vector<1x1x256xf32>
    %105 = vector.shape_cast %104 : vector<1x1x256xf32> to vector<256xf32>
    %c1_161 = arith.constant 1 : index
    %c0_162 = arith.constant 0 : index
    %c0_163 = arith.constant 0 : index
    %106 = vector.load %arg17[%c1_161, %c0_162, %c0_163] : memref<3x3x256xf32, #tpu.memory_space<vmem>>, vector<1x1x256xf32>
    %107 = vector.shape_cast %106 : vector<1x1x256xf32> to vector<256xf32>
    %c1_164 = arith.constant 1 : index
    %c1_165 = arith.constant 1 : index
    %c0_166 = arith.constant 0 : index
    %108 = vector.load %arg17[%c1_164, %c1_165, %c0_166] : memref<3x3x256xf32, #tpu.memory_space<vmem>>, vector<1x1x256xf32>
    %109 = vector.shape_cast %108 : vector<1x1x256xf32> to vector<256xf32>
    %c1_167 = arith.constant 1 : index
    %c2_168 = arith.constant 2 : index
    %c0_169 = arith.constant 0 : index
    %110 = vector.load %arg17[%c1_167, %c2_168, %c0_169] : memref<3x3x256xf32, #tpu.memory_space<vmem>>, vector<1x1x256xf32>
    %111 = vector.shape_cast %110 : vector<1x1x256xf32> to vector<256xf32>
    %c2_170 = arith.constant 2 : index
    %c0_171 = arith.constant 0 : index
    %c0_172 = arith.constant 0 : index
    %112 = vector.load %arg17[%c2_170, %c0_171, %c0_172] : memref<3x3x256xf32, #tpu.memory_space<vmem>>, vector<1x1x256xf32>
    %113 = vector.shape_cast %112 : vector<1x1x256xf32> to vector<256xf32>
    %c2_173 = arith.constant 2 : index
    %c1_174 = arith.constant 1 : index
    %c0_175 = arith.constant 0 : index
    %114 = vector.load %arg17[%c2_173, %c1_174, %c0_175] : memref<3x3x256xf32, #tpu.memory_space<vmem>>, vector<1x1x256xf32>
    %115 = vector.shape_cast %114 : vector<1x1x256xf32> to vector<256xf32>
    %c2_176 = arith.constant 2 : index
    %c2_177 = arith.constant 2 : index
    %c0_178 = arith.constant 0 : index
    %116 = vector.load %arg17[%c2_176, %c2_177, %c0_178] : memref<3x3x256xf32, #tpu.memory_space<vmem>>, vector<1x1x256xf32>
    %117 = vector.shape_cast %116 : vector<1x1x256xf32> to vector<256xf32>
    %c0_179 = arith.constant 0 : index
    %c0_180 = arith.constant 0 : index
    %118 = vector.load %arg18[%c0_179, %c0_180] : memref<1x256xf32, #tpu.memory_space<vmem>>, vector<1x256xf32>
    %119 = vector.shape_cast %118 : vector<1x256xf32> to vector<256xf32>
    %c0_181 = arith.constant 0 : index
    %c0_182 = arith.constant 0 : index
    %120 = vector.load %arg19[%c0_181, %c0_182] : memref<1x256xf32, #tpu.memory_space<vmem>>, vector<1x256xf32>
    %121 = vector.shape_cast %120 : vector<1x256xf32> to vector<256xf32>
    %c0_i32_183 = arith.constant 0 : i32
    %c4_i32_184 = arith.constant 4 : i32
    %122 = arith.addi %c0_i32_183, %c4_i32_184 : i32
    %c1_i32_185 = arith.constant 1 : i32
    scf.for %arg29 = %c0_i32_183 to %122 step %c1_i32_185  : i32 {
      %c4_i32_202 = arith.constant 4 : i32
      %137 = arith.muli %arg29, %c4_i32_202 : i32
      %cst_203 = arith.constant 0.000000e+00 : f32
      %138 = vector.broadcast %cst_203 : f32 to vector<4x16x256xf32>
      %c0_i32_204 = arith.constant 0 : i32
      %139 = arith.addi %137, %c0_i32_204 : i32
      %140 = arith.index_cast %139 : i32 to index
      %c0_205 = arith.constant 0 : index
      %c0_206 = arith.constant 0 : index
      %141 = vector.load %arg27[%140, %c0_205, %c0_206] : memref<18x18x256xf32, #tpu.memory_space<vmem>>, vector<4x16x256xf32>
      %142 = vector.shape_cast %101 : vector<256xf32> to vector<1x1x256xf32>
      %143 = vector.broadcast %142 : vector<1x1x256xf32> to vector<4x16x256xf32>
      %144 = arith.mulf %141, %143 : vector<4x16x256xf32>
      %145 = arith.addf %138, %144 : vector<4x16x256xf32>
      %c0_i32_207 = arith.constant 0 : i32
      %146 = arith.addi %137, %c0_i32_207 : i32
      %147 = arith.index_cast %146 : i32 to index
      %c1_208 = arith.constant 1 : index
      %c0_209 = arith.constant 0 : index
      %148 = vector.load %arg27[%147, %c1_208, %c0_209] : memref<18x18x256xf32, #tpu.memory_space<vmem>>, vector<4x16x256xf32>
      %149 = vector.shape_cast %103 : vector<256xf32> to vector<1x1x256xf32>
      %150 = vector.broadcast %149 : vector<1x1x256xf32> to vector<4x16x256xf32>
      %151 = arith.mulf %148, %150 : vector<4x16x256xf32>
      %152 = arith.addf %145, %151 : vector<4x16x256xf32>
      %c0_i32_210 = arith.constant 0 : i32
      %153 = arith.addi %137, %c0_i32_210 : i32
      %154 = arith.index_cast %153 : i32 to index
      %c2_211 = arith.constant 2 : index
      %c0_212 = arith.constant 0 : index
      %155 = vector.load %arg27[%154, %c2_211, %c0_212] : memref<18x18x256xf32, #tpu.memory_space<vmem>>, vector<4x16x256xf32>
      %156 = vector.shape_cast %105 : vector<256xf32> to vector<1x1x256xf32>
      %157 = vector.broadcast %156 : vector<1x1x256xf32> to vector<4x16x256xf32>
      %158 = arith.mulf %155, %157 : vector<4x16x256xf32>
      %159 = arith.addf %152, %158 : vector<4x16x256xf32>
      %c1_i32_213 = arith.constant 1 : i32
      %160 = arith.addi %137, %c1_i32_213 : i32
      %161 = arith.index_cast %160 : i32 to index
      %c0_214 = arith.constant 0 : index
      %c0_215 = arith.constant 0 : index
      %162 = vector.load %arg27[%161, %c0_214, %c0_215] : memref<18x18x256xf32, #tpu.memory_space<vmem>>, vector<4x16x256xf32>
      %163 = vector.shape_cast %107 : vector<256xf32> to vector<1x1x256xf32>
      %164 = vector.broadcast %163 : vector<1x1x256xf32> to vector<4x16x256xf32>
      %165 = arith.mulf %162, %164 : vector<4x16x256xf32>
      %166 = arith.addf %159, %165 : vector<4x16x256xf32>
      %c1_i32_216 = arith.constant 1 : i32
      %167 = arith.addi %137, %c1_i32_216 : i32
      %168 = arith.index_cast %167 : i32 to index
      %c1_217 = arith.constant 1 : index
      %c0_218 = arith.constant 0 : index
      %169 = vector.load %arg27[%168, %c1_217, %c0_218] : memref<18x18x256xf32, #tpu.memory_space<vmem>>, vector<4x16x256xf32>
      %170 = vector.shape_cast %109 : vector<256xf32> to vector<1x1x256xf32>
      %171 = vector.broadcast %170 : vector<1x1x256xf32> to vector<4x16x256xf32>
      %172 = arith.mulf %169, %171 : vector<4x16x256xf32>
      %173 = arith.addf %166, %172 : vector<4x16x256xf32>
      %c1_i32_219 = arith.constant 1 : i32
      %174 = arith.addi %137, %c1_i32_219 : i32
      %175 = arith.index_cast %174 : i32 to index
      %c2_220 = arith.constant 2 : index
      %c0_221 = arith.constant 0 : index
      %176 = vector.load %arg27[%175, %c2_220, %c0_221] : memref<18x18x256xf32, #tpu.memory_space<vmem>>, vector<4x16x256xf32>
      %177 = vector.shape_cast %111 : vector<256xf32> to vector<1x1x256xf32>
      %178 = vector.broadcast %177 : vector<1x1x256xf32> to vector<4x16x256xf32>
      %179 = arith.mulf %176, %178 : vector<4x16x256xf32>
      %180 = arith.addf %173, %179 : vector<4x16x256xf32>
      %c2_i32 = arith.constant 2 : i32
      %181 = arith.addi %137, %c2_i32 : i32
      %182 = arith.index_cast %181 : i32 to index
      %c0_222 = arith.constant 0 : index
      %c0_223 = arith.constant 0 : index
      %183 = vector.load %arg27[%182, %c0_222, %c0_223] : memref<18x18x256xf32, #tpu.memory_space<vmem>>, vector<4x16x256xf32>
      %184 = vector.shape_cast %113 : vector<256xf32> to vector<1x1x256xf32>
      %185 = vector.broadcast %184 : vector<1x1x256xf32> to vector<4x16x256xf32>
      %186 = arith.mulf %183, %185 : vector<4x16x256xf32>
      %187 = arith.addf %180, %186 : vector<4x16x256xf32>
      %c2_i32_224 = arith.constant 2 : i32
      %188 = arith.addi %137, %c2_i32_224 : i32
      %189 = arith.index_cast %188 : i32 to index
      %c1_225 = arith.constant 1 : index
      %c0_226 = arith.constant 0 : index
      %190 = vector.load %arg27[%189, %c1_225, %c0_226] : memref<18x18x256xf32, #tpu.memory_space<vmem>>, vector<4x16x256xf32>
      %191 = vector.shape_cast %115 : vector<256xf32> to vector<1x1x256xf32>
      %192 = vector.broadcast %191 : vector<1x1x256xf32> to vector<4x16x256xf32>
      %193 = arith.mulf %190, %192 : vector<4x16x256xf32>
      %194 = arith.addf %187, %193 : vector<4x16x256xf32>
      %c2_i32_227 = arith.constant 2 : i32
      %195 = arith.addi %137, %c2_i32_227 : i32
      %196 = arith.index_cast %195 : i32 to index
      %c2_228 = arith.constant 2 : index
      %c0_229 = arith.constant 0 : index
      %197 = vector.load %arg27[%196, %c2_228, %c0_229] : memref<18x18x256xf32, #tpu.memory_space<vmem>>, vector<4x16x256xf32>
      %198 = vector.shape_cast %117 : vector<256xf32> to vector<1x1x256xf32>
      %199 = vector.broadcast %198 : vector<1x1x256xf32> to vector<4x16x256xf32>
      %200 = arith.mulf %197, %199 : vector<4x16x256xf32>
      %201 = arith.addf %194, %200 : vector<4x16x256xf32>
      %202 = vector.shape_cast %119 : vector<256xf32> to vector<1x1x256xf32>
      %203 = vector.broadcast %202 : vector<1x1x256xf32> to vector<4x16x256xf32>
      %204 = arith.mulf %201, %203 : vector<4x16x256xf32>
      %205 = vector.shape_cast %121 : vector<256xf32> to vector<1x1x256xf32>
      %206 = vector.broadcast %205 : vector<1x1x256xf32> to vector<4x16x256xf32>
      %207 = arith.addf %204, %206 : vector<4x16x256xf32>
      %cst_230 = arith.constant 0.000000e+00 : f32
      %208 = vector.broadcast %cst_230 : f32 to vector<4x16x256xf32>
      %209 = arith.maximumf %207, %208 : vector<4x16x256xf32>
      %210 = arith.index_cast %137 : i32 to index
      %c0_231 = arith.constant 0 : index
      %c0_232 = arith.constant 0 : index
      %211 = vector.load %arg28[%210, %c0_231, %c0_232] : memref<16x16x256xf32, #tpu.memory_space<vmem>>, vector<4x16x256xf32>
      tpu.vector_store %arg28[%210, %c0_231, %c0_232], %209 {strides = array<i32>} : memref<16x16x256xf32, #tpu.memory_space<vmem>>, vector<4x16x256xf32>,
    }
    %c4_i32_186 = arith.constant 4 : i32
    %c0_187 = arith.constant 0 : index
    %c0_188 = arith.constant 0 : index
    %123 = vector.load %arg21[%c0_187, %c0_188] : memref<1x256xf32, #tpu.memory_space<vmem>>, vector<1x256xf32>
    %124 = vector.shape_cast %123 : vector<1x256xf32> to vector<256xf32>
    %c0_189 = arith.constant 0 : index
    %c0_190 = arith.constant 0 : index
    %125 = vector.load %arg22[%c0_189, %c0_190] : memref<1x256xf32, #tpu.memory_space<vmem>>, vector<1x256xf32>
    %126 = vector.shape_cast %125 : vector<1x256xf32> to vector<256xf32>
    %cst_191 = arith.constant 0.000000e+00 : f32
    %127 = vector.broadcast %cst_191 : f32 to vector<1x128xf32>
    %c0_i32_192 = arith.constant 0 : i32
    %c4_i32_193 = arith.constant 4 : i32
    %128 = arith.addi %c0_i32_192, %c4_i32_193 : i32
    %c1_i32_194 = arith.constant 1 : i32
    %129 = scf.for %arg29 = %c0_i32_192 to %128 step %c1_i32_194 iter_args(%arg30 = %127) -> (vector<1x128xf32>)  : i32 {
      %c4_i32_202 = arith.constant 4 : i32
      %137 = arith.muli %arg29, %c4_i32_202 : i32
      %138 = arith.index_cast %137 : i32 to index
      %c0_203 = arith.constant 0 : index
      %c0_204 = arith.constant 0 : index
      %139 = vector.load %arg28[%138, %c0_203, %c0_204] : memref<16x16x256xf32, #tpu.memory_space<vmem>>, vector<4x16x256xf32>
      %140 = vector.shape_cast %139 : vector<4x16x256xf32> to vector<64x256xf32>
      %141 = arith.truncf %140 : vector<64x256xf32> to vector<64x256xbf16>
      %c0_205 = arith.constant 0 : index
      %c0_206 = arith.constant 0 : index
      %142 = vector.load %arg20[%c0_205, %c0_206] : memref<256x256xbf16, #tpu.memory_space<vmem>>, vector<256x256xbf16>
      %cst_207 = arith.constant dense<0.000000e+00> : vector<64x256xf32>
      %143 = tpu.matmul %141, %142, %cst_207 {dimension_numbers = #tpu.dot_dimension_numbers<[1], [0], [0], [1], [0, 0, 1, 1], [], []>} : vector<64x256xbf16>, vector<256x256xbf16>, vector<64x256xf32> -> vector<64x256xf32>
      %144 = vector.shape_cast %124 : vector<256xf32> to vector<1x256xf32>
      %145 = vector.broadcast %144 : vector<1x256xf32> to vector<64x256xf32>
      %146 = arith.mulf %143, %145 : vector<64x256xf32>
      %147 = vector.shape_cast %126 : vector<256xf32> to vector<1x256xf32>
      %148 = vector.broadcast %147 : vector<1x256xf32> to vector<64x256xf32>
      %149 = arith.addf %146, %148 : vector<64x256xf32>
      %cst_208 = arith.constant 0.000000e+00 : f32
      %150 = vector.broadcast %cst_208 : f32 to vector<64x256xf32>
      %151 = arith.maximumf %149, %150 : vector<64x256xf32>
      %c0_209 = arith.constant 0 : index
      %c0_210 = arith.constant 0 : index
      %152 = vector.load %arg23[%c0_209, %c0_210] : memref<256x128xf32, #tpu.memory_space<vmem>>, vector<256x128xf32>
      %cst_211 = arith.constant dense<0.000000e+00> : vector<64x128xf32>
      %153 = tpu.matmul %151, %152, %cst_211 {dimension_numbers = #tpu.dot_dimension_numbers<[1], [0], [0], [1], [0, 0, 1, 1], [], []>} : vector<64x256xf32>, vector<256x128xf32>, vector<64x128xf32> -> vector<64x128xf32>
      %cst_212 = arith.constant dense<0.000000e+00> : vector<128xf32>
      %154 = vector.multi_reduction <add>, %153, %cst_212 [0] : vector<64x128xf32> to vector<128xf32>
      %155 = vector.shape_cast %154 : vector<128xf32> to vector<1x128xf32>
      %156 = arith.addf %arg30, %155 : vector<1x128xf32>
      scf.yield %156 : vector<1x128xf32>
    }
    %c4_i32_195 = arith.constant 4 : i32
    %cst_196 = arith.constant 3.906250e-03 : f32
    %130 = vector.broadcast %cst_196 : f32 to vector<1x128xf32>
    %131 = arith.mulf %129, %130 : vector<1x128xf32>
    %c0_197 = arith.constant 0 : index
    %c0_198 = arith.constant 0 : index
    %132 = vector.load %arg24[%c0_197, %c0_198] : memref<1x128xf32, #tpu.memory_space<vmem>>, vector<1x128xf32>
    %133 = arith.addf %131, %132 : vector<1x128xf32>
    %c0_199 = arith.constant 0 : index
    %c0_200 = arith.constant 0 : index
    %c0_201 = arith.constant 0 : index
    %134 = vector.load %arg25[%c0_199, %c0_200, %c0_201] : memref<1x1x128xf32, #tpu.memory_space<vmem>>, vector<1x1x128xf32>
    %135 = vector.shape_cast %134 : vector<1x1x128xf32> to vector<1x128xf32>
    %136 = vector.shape_cast %133 : vector<1x128xf32> to vector<1x1x128xf32>
    tpu.vector_store %arg25[%c0_199, %c0_200, %c0_201], %136 {strides = array<i32>} : memref<1x1x128xf32, #tpu.memory_space<vmem>>, vector<1x1x128xf32>,
    return
  }
  func.func @transform_0(%arg0: i32) -> (i32, i32, i32, i32) {
    %c0_i32 = arith.constant 0 : i32
    %c0_i32_0 = arith.constant 0 : i32
    %c0_i32_1 = arith.constant 0 : i32
    %c0_i32_2 = arith.constant 0 : i32
    return %arg0, %c0_i32, %c0_i32_0, %c0_i32_1 : i32, i32, i32, i32
  }
  func.func @transform_1(%arg0: i32) -> (i32, i32, i32) {
    %c0_i32 = arith.constant 0 : i32
    %c0_i32_0 = arith.constant 0 : i32
    %c0_i32_1 = arith.constant 0 : i32
    %c0_i32_2 = arith.constant 0 : i32
    return %c0_i32, %c0_i32_0, %c0_i32_1 : i32, i32, i32
  }
  func.func @transform_2(%arg0: i32) -> (i32, i32) {
    %c0_i32 = arith.constant 0 : i32
    %c0_i32_0 = arith.constant 0 : i32
    %c0_i32_1 = arith.constant 0 : i32
    return %c0_i32, %c0_i32_0 : i32, i32
  }
  func.func @transform_3(%arg0: i32) -> (i32, i32) {
    %c0_i32 = arith.constant 0 : i32
    %c0_i32_0 = arith.constant 0 : i32
    %c0_i32_1 = arith.constant 0 : i32
    return %c0_i32, %c0_i32_0 : i32, i32
  }
  func.func @transform_4(%arg0: i32) -> (i32, i32, i32) {
    %c0_i32 = arith.constant 0 : i32
    %c0_i32_0 = arith.constant 0 : i32
    %c0_i32_1 = arith.constant 0 : i32
    %c0_i32_2 = arith.constant 0 : i32
    return %c0_i32, %c0_i32_0, %c0_i32_1 : i32, i32, i32
  }
  func.func @transform_5(%arg0: i32) -> (i32, i32) {
    %c0_i32 = arith.constant 0 : i32
    %c0_i32_0 = arith.constant 0 : i32
    %c0_i32_1 = arith.constant 0 : i32
    return %c0_i32, %c0_i32_0 : i32, i32
  }
  func.func @transform_6(%arg0: i32) -> (i32, i32) {
    %c0_i32 = arith.constant 0 : i32
    %c0_i32_0 = arith.constant 0 : i32
    %c0_i32_1 = arith.constant 0 : i32
    return %c0_i32, %c0_i32_0 : i32, i32
  }
  func.func @transform_7(%arg0: i32) -> (i32, i32) {
    %c0_i32 = arith.constant 0 : i32
    %c0_i32_0 = arith.constant 0 : i32
    %c0_i32_1 = arith.constant 0 : i32
    return %c0_i32, %c0_i32_0 : i32, i32
  }
  func.func @transform_8(%arg0: i32) -> (i32, i32) {
    %c0_i32 = arith.constant 0 : i32
    %c0_i32_0 = arith.constant 0 : i32
    %c0_i32_1 = arith.constant 0 : i32
    return %c0_i32, %c0_i32_0 : i32, i32
  }
  func.func @transform_9(%arg0: i32) -> (i32, i32) {
    %c0_i32 = arith.constant 0 : i32
    %c0_i32_0 = arith.constant 0 : i32
    %c0_i32_1 = arith.constant 0 : i32
    return %c0_i32, %c0_i32_0 : i32, i32
  }
  func.func @transform_10(%arg0: i32) -> (i32, i32, i32) {
    %c0_i32 = arith.constant 0 : i32
    %c0_i32_0 = arith.constant 0 : i32
    %c0_i32_1 = arith.constant 0 : i32
    %c0_i32_2 = arith.constant 0 : i32
    return %c0_i32, %c0_i32_0, %c0_i32_1 : i32, i32, i32
  }
  func.func @transform_11(%arg0: i32) -> (i32, i32) {
    %c0_i32 = arith.constant 0 : i32
    %c0_i32_0 = arith.constant 0 : i32
    %c0_i32_1 = arith.constant 0 : i32
    return %c0_i32, %c0_i32_0 : i32, i32
  }
  func.func @transform_12(%arg0: i32) -> (i32, i32) {
    %c0_i32 = arith.constant 0 : i32
    %c0_i32_0 = arith.constant 0 : i32
    %c0_i32_1 = arith.constant 0 : i32
    return %c0_i32, %c0_i32_0 : i32, i32
  }
  func.func @transform_13(%arg0: i32) -> (i32, i32) {
    %c0_i32 = arith.constant 0 : i32
    %c0_i32_0 = arith.constant 0 : i32
    %c0_i32_1 = arith.constant 0 : i32
    return %c0_i32, %c0_i32_0 : i32, i32
  }
  func.func @transform_14(%arg0: i32) -> (i32, i32) {
    %c0_i32 = arith.constant 0 : i32
    %c0_i32_0 = arith.constant 0 : i32
    %c0_i32_1 = arith.constant 0 : i32
    return %c0_i32, %c0_i32_0 : i32, i32
  }
  func.func @transform_15(%arg0: i32) -> (i32, i32) {
    %c0_i32 = arith.constant 0 : i32
    %c0_i32_0 = arith.constant 0 : i32
    %c0_i32_1 = arith.constant 0 : i32
    return %c0_i32, %c0_i32_0 : i32, i32
  }
  func.func @transform_16(%arg0: i32) -> (i32, i32, i32) {
    %c0_i32 = arith.constant 0 : i32
    %c0_i32_0 = arith.constant 0 : i32
    %c0_i32_1 = arith.constant 0 : i32
    %c0_i32_2 = arith.constant 0 : i32
    return %c0_i32, %c0_i32_0, %c0_i32_1 : i32, i32, i32
  }
  func.func @transform_17(%arg0: i32) -> (i32, i32) {
    %c0_i32 = arith.constant 0 : i32
    %c0_i32_0 = arith.constant 0 : i32
    %c0_i32_1 = arith.constant 0 : i32
    return %c0_i32, %c0_i32_0 : i32, i32
  }
  func.func @transform_18(%arg0: i32) -> (i32, i32) {
    %c0_i32 = arith.constant 0 : i32
    %c0_i32_0 = arith.constant 0 : i32
    %c0_i32_1 = arith.constant 0 : i32
    return %c0_i32, %c0_i32_0 : i32, i32
  }
  func.func @transform_19(%arg0: i32) -> (i32, i32) {
    %c0_i32 = arith.constant 0 : i32
    %c0_i32_0 = arith.constant 0 : i32
    %c0_i32_1 = arith.constant 0 : i32
    return %c0_i32, %c0_i32_0 : i32, i32
  }
  func.func @transform_20(%arg0: i32) -> (i32, i32) {
    %c0_i32 = arith.constant 0 : i32
    %c0_i32_0 = arith.constant 0 : i32
    %c0_i32_1 = arith.constant 0 : i32
    return %c0_i32, %c0_i32_0 : i32, i32
  }
  func.func @transform_21(%arg0: i32) -> (i32, i32) {
    %c0_i32 = arith.constant 0 : i32
    %c0_i32_0 = arith.constant 0 : i32
    %c0_i32_1 = arith.constant 0 : i32
    return %c0_i32, %c0_i32_0 : i32, i32
  }
  func.func @transform_22(%arg0: i32) -> (i32, i32) {
    %c0_i32 = arith.constant 0 : i32
    %c0_i32_0 = arith.constant 0 : i32
    %c0_i32_1 = arith.constant 0 : i32
    return %c0_i32, %c0_i32_0 : i32, i32
  }
  func.func @transform_23(%arg0: i32) -> (i32, i32) {
    %c0_i32 = arith.constant 0 : i32
    %c0_i32_0 = arith.constant 0 : i32
    %c0_i32_1 = arith.constant 0 : i32
    return %c0_i32, %c0_i32_0 : i32, i32
  }
  func.func @transform_24(%arg0: i32) -> (i32, i32, i32) {
    %c0_i32 = arith.constant 0 : i32
    %c0_i32_0 = arith.constant 0 : i32
    %c0_i32_1 = arith.constant 0 : i32
    return %arg0, %c0_i32, %c0_i32_0 : i32, i32, i32
  }
}

</mosaic_0001>

<bundles_post_ra>
// kernel: _lambda_.1
= control target key start
LH: loop header
LB: loop body
LE: loop exit
PB: predicated region body
PF: predicated region fallthrough
CT: control target
= control target key end

     0   :  { %s9995_s0 = inlined_call_operand.vmem [shape: f32[2,16,16,1], index: 0, kind: input, shape index: {}]   ;;  %s9996_s1 = inlined_call_operand.vmem [shape: f32[3,3,64], index: 1, kind: input, shape index: {}]   ;;  %s9997_s2 = inlined_call_operand.vmem [shape: f32[1,64], index: 2, kind: input, shape index: {}]   ;;  %s9998_s3 = inlined_call_operand.vmem [shape: f32[1,64], index: 3, kind: input, shape index: {}]   ;;  %s9999_s4 = inlined_call_operand.vmem [shape: f32[3,3,64], index: 4, kind: input, shape index: {}]   ;;  %s10000_s5 = inlined_call_operand.vmem [shape: f32[1,64], index: 5, kind: input, shape index: {}]   ;;  %s10001_s6 = inlined_call_operand.vmem [shape: f32[1,64], index: 6, kind: input, shape index: {}]   ;;  %s10002_s7 = inlined_call_operand.vmem [shape: bf16[64,128], index: 7, kind: input, shape index: {}]   ;;  %s10003_s8 = inlined_call_operand.vmem [shape: f32[1,128], index: 8, kind: input, shape index: {}]   ;;  %s10004_s9 = inlined_call_operand.vmem [shape: f32[1,128], index: 9, kind: input, shape index: {}]   ;;  %s10005_s10 = inlined_call_operand.vmem [shape: f32[3,3,128], index: 10, kind: input, shape index: {}]   ;;  %s10006_s11 = inlined_call_operand.vmem [shape: f32[1,128], index: 11, kind: input, shape index: {}]   ;;  %s10007_s12 = inlined_call_operand.vmem [shape: f32[1,128], index: 12, kind: input, shape index: {}]   ;;  %s10008_s13 = inlined_call_operand.vmem [shape: bf16[128,256], index: 13, kind: input, shape index: {}]   ;;  %s10009_s14 = inlined_call_operand.vmem [shape: f32[1,256], index: 14, kind: input, shape index: {}]   ;;  %s10010_s15 = inlined_call_operand.vmem [shape: f32[1,256], index: 15, kind: input, shape index: {}]   ;;  %s10011_s16 = inlined_call_operand.vmem [shape: f32[3,3,256], index: 16, kind: input, shape index: {}]   ;;  %s10012_s17 = inlined_call_operand.vmem [shape: f32[1,256], index: 17, kind: input, shape index: {}]   ;;  %s10013_s18 = inlined_call_operand.vmem [shape: f32[1,256], index: 18, kind: input, shape index: {}]   ;;  %s10014_s19 = inlined_call_operand.vmem [shape: bf16[256,256], index: 19, kind: input, shape index: {}]   ;;  %s10015_s20 = inlined_call_operand.vmem [shape: f32[1,256], index: 20, kind: input, shape index: {}]   ;;  %s10016_s21 = inlined_call_operand.vmem [shape: f32[1,256], index: 21, kind: input, shape index: {}]   ;;  %s10017_s22 = inlined_call_operand.vmem [shape: f32[256,128], index: 22, kind: input, shape index: {}]   ;;  %s10018_s23 = inlined_call_operand.vmem [shape: f32[1,128], index: 23, kind: input, shape index: {}]   ;;  %s10019_s24 = inlined_call_operand.hbm [shape: f32[2,1,128], index: 24, kind: output, shape index: {}]  }
   0x1   :  { %10114 = sst [smem:[#allocation36_spill]] %s9995_s0 }
   0x2   :  { %10115 = sst [smem:[#allocation37_spill]] %s9996_s1 }
   0x3   :  { %10116 = sst [smem:[#allocation38_spill]] %s9997_s2 }
   0x4   :  { %10117 = sst [smem:[#allocation39_spill]] %s9998_s3 }
   0x5   :  { %10118 = sst [smem:[#allocation40_spill]] %s9999_s4 }
   0x6   :  { %10119 = sst [smem:[#allocation41_spill]] %s10000_s5 }
   0x7   :  { %10120 = sst [smem:[#allocation42_spill]] %s10001_s6 }
   0x8   :  { %10121 = sst [smem:[#allocation43_spill]] %s10002_s7 }
   0x9   :  { %10122 = sst [smem:[#allocation44_spill]] %s10003_s8 }
   0xa   :  { %10123 = sst [smem:[#allocation45_spill]] %s10019_s24 }
   0xb   :  { %29 = vsyncpa [#allocation6], 0 }
   0xc   :  { %31 = vsyncpa [#allocation6 + $0x1], 0  ;;  %s6634_s5 = smov 0   ;;  %s6636_s26 = smov 0  }
   0xd   :  { %s6638_s27 = smov 0   ;;  %s6640_s28 = smov 0  }
   0xe LB: > { %10124 = sst [smem:[#allocation8_spill]] %s6459_s5  ;;  %s6655_s6 = sadd.s32 4294967295, %s6471_s28   ;;  %s6471_s28 = sphi %s6640_s28, %s10251_s28   ;;  %s6467_s27 = sphi %s6638_s27, %s10253_s27   ;;  %s6463_s26 = sphi %s6636_s26, %s10255_s26   ;;  %s6459_s5 = sphi %s6634_s5, %s10254_s5  }
   0xf   : > { %10125 = sst [smem:[#allocation9_spill]] %s6467_s27  ;;  %s5611_s2 = sadd.s32 4294967294, %s6471_s28  }
  0x10   : > { %10126 = sst [smem:[#allocation10_spill]] %s6471_s28  ;;  %s6659_s29 = sadd.s32 1, %s6471_s28  }
  0x11   : > { %10127 = sst [smem:[#allocation11_spill]] %s6659_s29  ;;  %s553_s0 = sadd.s32 1, %s6467_s27 }
  0x12   : > { %s550_s7 = ssub.s32 %s6471_s28, %s6659_s29  ;;  %p563_p0 = scmp.ne.s32.totalorder %s6467_s27, %s6463_s26 }
  0x13   : > { %p551_p1 = scmp.eq.s32.totalorder %s550_s7, 0  ;;  %p564_p2 = scmp.eq.s32.totalorder %s6655_s6, 1 }
  0x14   : > { %p569_p3 = scmp.ne.s32.totalorder %s6463_s26, %s6459_s5  ;;  %p570_p4 = scmp.eq.s32.totalorder %s5611_s2, 1 }
  0x15   : > { %s6670_s30 = scalar_select %p551_p1, %s6467_s27, %s553_s0  }
  0x16   : > { %p6672_p5 = por %p564_p2, %p563_p0  ;;  %p6676_p6 = por %p570_p4, %p569_p3 }
  0x17   : > { %10128 = sst [smem:[#allocation12_spill]] %s6670_s30  ;;  %p5614_p7 = scmp.ge.s32.totalorder %s6471_s28, 1 }
  0x18   : > { %s10130_s25 = scalar_select %p6676_p6, 1, 0 }
  0x19   : > { %p665_p8 = scmp.lt.s32.totalorder %s6471_s28, 3 }
  0x1a   : > { %10131 = sst [smem:[#allocation13_spill]] %s10130_s25 }
  0x1b   : > { %p666_p9 = pnand %p5614_p7, %p665_p8 }
  0x1d   : > { %669 = sbr.rel (%p666_p9) target bundleno = 1732 (0x6c4), region = 116 }
  0x22   : > { %p730_p10 = scmp.lt.s32.totalorder %s6655_s6, 1  ;;  %v6505_v0 = vmov 0   ;;  %s10132_s0 = sld [smem:[#allocation36_spill]]  ;;  %v750_v31 = vlaneseq  ;;  %v6506_v35 = vmov 0.0   ;;  %vm1215_vm1 = vcmask 523265  }
  0x23   : > { %6302 = vset.pattern.permute.xlu1 %v6505_v0  ;;  %6301 = vset.pattern.permute.xlu0 %v6505_v0  ;;  %736 = vst [vmem:[#allocation2] sm:$0xff] %v6506_v35  ;;  %737 = vst [vmem:[#allocation2 + $0x8] sm:$0xff] %v6506_v35  ;;  %s10135_s2 = sld [smem:[#allocation37_spill]]  ;;  %vm1118_vm2 = vcmask 1040384   ;;  %vm1219_vm3 = vcmask 516096   ;;  %vm1217_vm4 = vcmask 523264  }
  0x24   : > { %s731_s8 = scalar_select %p730_p10, %s6655_s6, 1  ;;  %vm6727_vm0 = vcmp.lt.s32.totalorder %v750_v31, 256  ;;  %738 = vst [vmem:[#allocation2 + $0x10] sm:$0xff] %v6506_v35  ;;  %739 = vst [vmem:[#allocation2 + $0x18] sm:$0xff] %v6506_v35 }
  0x25   : > { %740 = vst [vmem:[#allocation2 + $0x20] sm:$0x3] %v6506_v35  ;;  %741 = vst [vmem:[#allocation2 + $0x28] sm:$0x3] %v6506_v35  ;;  %s10137_s5 = sld [smem:[#allocation39_spill]]  ;;  %s10138_s28 = sand.u32 1, %s6463_s26  }
  0x26   : > { %s6074_s4 = sshll.u32 %s731_s8, 8  ;;  %743 = vst [vmem:[#allocation2 + $0x330] sm:$0xff] %v6506_v35  ;;  %744 = vst [vmem:[#allocation2 + $0x338] sm:$0xff] %v6506_v35  ;;  %s7070_s25 = scalar_lea.vmem [#allocation5], %s10138_s28 }
  0x27   : > { %745 = vst [vmem:[#allocation2 + $0x340] sm:$0xff] %v6506_v35  ;;  %746 = vst [vmem:[#allocation2 + $0x348] sm:$0xff] %v6506_v35  ;;  %s7072_s30 = smov 0  }
  0x28   : > { %s6687_s7 = scalar_lea.vmem %s10132_s0, %s6074_s4  ;;  %747 = vst [vmem:[#allocation2 + $0x350] sm:$0x3] %v6506_v35  ;;  %748 = vst [vmem:[#allocation2 + $0x358] sm:$0x3] %v6506_v35  ;;  %s10136_s0 = sld [smem:[#allocation38_spill]] }
  0x29   : > { %v960_v1 = vld [vmem:[%s6687_s7 + $0x10] sm:$0xff]  ;;  %v958_v2 = vld [vmem:[%s6687_s7] sm:$0xff]  ;;  %v961_v3 = vld [vmem:[%s6687_s7 + $0x18] sm:$0xff]  ;;  %754 = vst.msk [vmem:[#allocation2 + $0x30] ss:$8 sm:$0x3] %vm6727_vm0, %v6506_v35 }
  0x2a   : > { %1000 = vperm.xlu1 %6302, %v960_v1   ;;  %992 = vperm.xlu0 %6301, %v958_v2   ;;  %v959_v4 = vld [vmem:[%s6687_s7 + $0x8] sm:$0xff]  ;;  %v962_v6 = vld [vmem:[%s6687_s7 + $0x20] sm:$0xff]  ;;  %v965_v7 = vld [vmem:[%s6687_s7 + $0x38] sm:$0xff]  ;;  %757 = vst.msk [vmem:[#allocation2 + $0x60] ss:$8 sm:$0x3] %vm6727_vm0, %v6506_v35 }
  0x2b   : > { %v963_v5 = vld [vmem:[%s6687_s7 + $0x28] sm:$0xff]  ;;  %v964_v8 = vld [vmem:[%s6687_s7 + $0x30] sm:$0xff]  ;;  %v966_v10 = vld [vmem:[%s6687_s7 + $0x40] sm:$0xff]  ;;  %760 = vst.msk [vmem:[#allocation2 + $0x90] ss:$8 sm:$0x3] %vm6727_vm0, %v6506_v35 }
  0x2c   : > { %v967_v9 = vld [vmem:[%s6687_s7 + $0x48] sm:$0xff]  ;;  %v969_v11 = vld [vmem:[%s6687_s7 + $0x58] sm:$0xff]  ;;  %v968_v12 = vld [vmem:[%s6687_s7 + $0x50] sm:$0xff]  ;;  %763 = vst.msk [vmem:[#allocation2 + $0xc0] ss:$8 sm:$0x3] %vm6727_vm0, %v6506_v35 }
  0x2d   : > { %v971_v13 = vld [vmem:[%s6687_s7 + $0x68] sm:$0xff]  ;;  %v970_v14 = vld [vmem:[%s6687_s7 + $0x60] sm:$0xff]  ;;  %v973_v15 = vld [vmem:[%s6687_s7 + $0x78] sm:$0xff]  ;;  %766 = vst.msk [vmem:[#allocation2 + $0xf0] ss:$8 sm:$0x3] %vm6727_vm0, %v6506_v35 }
  0x2e   : > { %1004 = vperm.xlu1 %6302, %v961_v3   ;;  %996 = vperm.xlu0 %6301, %v959_v4   ;;  %v972_v16 = vld [vmem:[%s6687_s7 + $0x70] sm:$0xff]  ;;  %v975_v17 = vld [vmem:[%s6687_s7 + $0x88] sm:$0xff]  ;;  %v974_v18 = vld [vmem:[%s6687_s7 + $0x80] sm:$0xff]  ;;  %769 = vst.msk [vmem:[#allocation2 + $0x120] ss:$8 sm:$0x3] %vm6727_vm0, %v6506_v35 }
  0x2f   : > { %v977_v19 = vld [vmem:[%s6687_s7 + $0x98] sm:$0xff]  ;;  %v976_v20 = vld [vmem:[%s6687_s7 + $0x90] sm:$0xff]  ;;  %v979_v21 = vld [vmem:[%s6687_s7 + $0xa8] sm:$0xff]  ;;  %772 = vst.msk [vmem:[#allocation2 + $0x150] ss:$8 sm:$0x3] %vm6727_vm0, %v6506_v35 }
  0x30   : > { %v978_v22 = vld [vmem:[%s6687_s7 + $0xa0] sm:$0xff]  ;;  %v981_v23 = vld [vmem:[%s6687_s7 + $0xb8] sm:$0xff]  ;;  %v980_v24 = vld [vmem:[%s6687_s7 + $0xb0] sm:$0xff]  ;;  %775 = vst.msk [vmem:[#allocation2 + $0x180] ss:$8 sm:$0x3] %vm6727_vm0, %v6506_v35 }
  0x31   : > { %v983_v25 = vld [vmem:[%s6687_s7 + $0xc8] sm:$0xff]  ;;  %v982_v26 = vld [vmem:[%s6687_s7 + $0xc0] sm:$0xff]  ;;  %v985_v27 = vld [vmem:[%s6687_s7 + $0xd8] sm:$0xff]  ;;  %778 = vst.msk [vmem:[#allocation2 + $0x1b0] ss:$8 sm:$0x3] %vm6727_vm0, %v6506_v35 }
  0x32   : > { %1012 = vperm.xlu1 %6302, %v963_v5   ;;  %1008 = vperm.xlu0 %6301, %v962_v6   ;;  %v984_v28 = vld [vmem:[%s6687_s7 + $0xd0] sm:$0xff]  ;;  %v987_v29 = vld [vmem:[%s6687_s7 + $0xe8] sm:$0xff]  ;;  %v986_v30 = vld [vmem:[%s6687_s7 + $0xe0] sm:$0xff]  ;;  %781 = vst.msk [vmem:[#allocation2 + $0x1e0] ss:$8 sm:$0x3] %vm6727_vm0, %v6506_v35 }
  0x33   : > { %v6720_v32 = vld [vmem:[%s6687_s7 + $0xf8] sm:$0xff]  ;;  %v6723_v33 = vld [vmem:[%s6687_s7 + $0xf0] sm:$0xff]  ;;  %784 = vst.msk [vmem:[#allocation2 + $0x210] ss:$8 sm:$0x3] %vm6727_vm0, %v6506_v35  ;;  %849 = vst [vmem:[#allocation3] sm:$0xff] %v6506_v35 }
  0x34   : > { %787 = vst.msk [vmem:[#allocation2 + $0x240] ss:$8 sm:$0x3] %vm6727_vm0, %v6506_v35  ;;  %790 = vst.msk [vmem:[#allocation2 + $0x270] ss:$8 sm:$0x3] %vm6727_vm0, %v6506_v35 }
  0x35   : > { %793 = vst.msk [vmem:[#allocation2 + $0x2a0] ss:$8 sm:$0x3] %vm6727_vm0, %v6506_v35  ;;  %796 = vst.msk [vmem:[#allocation2 + $0x2d0] ss:$8 sm:$0x3] %vm6727_vm0, %v6506_v35 }
  0x36   : > { %1020 = vperm.xlu1 %6302, %v965_v7   ;;  %1016 = vperm.xlu0 %6301, %v964_v8   ;;  %799 = vst.msk [vmem:[#allocation2 + $0x300] ss:$8 sm:$0x3] %vm6727_vm0, %v6506_v35  ;;  %802 = vst.msk [vmem:[#allocation2 + $0x51] ss:$8 sm:$0x3] %vm6727_vm0, %v6506_v35 }
  0x37   : > { %805 = vst.msk [vmem:[#allocation2 + $0x81] ss:$8 sm:$0x3] %vm6727_vm0, %v6506_v35  ;;  %808 = vst.msk [vmem:[#allocation2 + $0xb1] ss:$8 sm:$0x3] %vm6727_vm0, %v6506_v35 }
  0x38   : > { %811 = vst.msk [vmem:[#allocation2 + $0xe1] ss:$8 sm:$0x3] %vm6727_vm0, %v6506_v35  ;;  %814 = vst.msk [vmem:[#allocation2 + $0x111] ss:$8 sm:$0x3] %vm6727_vm0, %v6506_v35 }
  0x39   : > { %817 = vst.msk [vmem:[#allocation2 + $0x141] ss:$8 sm:$0x3] %vm6727_vm0, %v6506_v35  ;;  %820 = vst.msk [vmem:[#allocation2 + $0x171] ss:$8 sm:$0x3] %vm6727_vm0, %v6506_v35 }
  0x3a   : > { %1028 = vperm.xlu1 %6302, %v967_v9   ;;  %1024 = vperm.xlu0 %6301, %v966_v10   ;;  %823 = vst.msk [vmem:[#allocation2 + $0x1a1] ss:$8 sm:$0x3] %vm6727_vm0, %v6506_v35  ;;  %826 = vst.msk [vmem:[#allocation2 + $0x1d1] ss:$8 sm:$0x3] %vm6727_vm0, %v6506_v35 }
  0x3b   : > { %829 = vst.msk [vmem:[#allocation2 + $0x201] ss:$8 sm:$0x3] %vm6727_vm0, %v6506_v35  ;;  %832 = vst.msk [vmem:[#allocation2 + $0x231] ss:$8 sm:$0x3] %vm6727_vm0, %v6506_v35 }
  0x3c   : > { %835 = vst.msk [vmem:[#allocation2 + $0x261] ss:$8 sm:$0x3] %vm6727_vm0, %v6506_v35  ;;  %838 = vst.msk [vmem:[#allocation2 + $0x291] ss:$8 sm:$0x3] %vm6727_vm0, %v6506_v35 }
  0x3d   : > { %841 = vst.msk [vmem:[#allocation2 + $0x2c1] ss:$8 sm:$0x3] %vm6727_vm0, %v6506_v35  ;;  %844 = vst.msk [vmem:[#allocation2 + $0x2f1] ss:$8 sm:$0x3] %vm6727_vm0, %v6506_v35 }
  0x3e   : > { %1036 = vperm.xlu1 %6302, %v969_v11   ;;  %1032 = vperm.xlu0 %6301, %v968_v12   ;;  %847 = vst.msk [vmem:[#allocation2 + $0x321] ss:$8 sm:$0x3] %vm6727_vm0, %v6506_v35  ;;  %850 = vst [vmem:[#allocation3 + $0x8] sm:$0xff] %v6506_v35  ;;  %v6950_v36 = vld [vmem:[%s10135_s2] ss:$0 sm:$0xff] }
  0x3f   : > { %851 = vst [vmem:[#allocation3 + $0x10] sm:$0xff] %v6506_v35  ;;  %852 = vst [vmem:[#allocation3 + $0x18] sm:$0xff] %v6506_v35  ;;  %v6955_v37 = vld [vmem:[%s10135_s2 + $0x1] ss:$0 sm:$0xff]  ;;  %v6962_v38 = vld [vmem:[%s10135_s2 + $0x2] ss:$0 sm:$0xff] }
  0x40   : > { %853 = vst [vmem:[#allocation3 + $0x20] sm:$0x3] %v6506_v35  ;;  %854 = vst [vmem:[#allocation3 + $0x28] sm:$0x3] %v6506_v35  ;;  %v6967_v39 = vld [vmem:[%s10135_s2 + $0x4] ss:$0 sm:$0xff] }
  0x41   : > { %856 = vst [vmem:[#allocation3 + $0x330] sm:$0xff] %v6506_v35  ;;  %857 = vst [vmem:[#allocation3 + $0x338] sm:$0xff] %v6506_v35  ;;  %v6972_v40 = vld [vmem:[%s10135_s2 + $0x5] ss:$0 sm:$0xff]  ;;  %v6977_v41 = vld [vmem:[%s10135_s2 + $0x6] ss:$0 sm:$0xff] }
  0x42   : > { %1044 = vperm.xlu1 %6302, %v971_v13   ;;  %1040 = vperm.xlu0 %6301, %v970_v14   ;;  %858 = vst [vmem:[#allocation3 + $0x340] sm:$0xff] %v6506_v35  ;;  %859 = vst [vmem:[#allocation3 + $0x348] sm:$0xff] %v6506_v35  ;;  %v6982_v42 = vld [vmem:[%s10135_s2 + $0x8] ss:$0 sm:$0xff]  ;;  %v6987_v43 = vld [vmem:[%s10135_s2 + $0x9] ss:$0 sm:$0xff] }
  0x43   : > { %860 = vst [vmem:[#allocation3 + $0x350] sm:$0x3] %v6506_v35  ;;  %861 = vst [vmem:[#allocation3 + $0x358] sm:$0x3] %v6506_v35  ;;  %v6992_v44 = vld [vmem:[%s10135_s2 + $0xa] ss:$0 sm:$0xff] }
  0x44   : > { %863 = vst.msk [vmem:[#allocation3 + $0x30] ss:$8 sm:$0x3] %vm6727_vm0, %v6506_v35  ;;  %866 = vst.msk [vmem:[#allocation3 + $0x60] ss:$8 sm:$0x3] %vm6727_vm0, %v6506_v35 }
  0x45   : > { %869 = vst.msk [vmem:[#allocation3 + $0x90] ss:$8 sm:$0x3] %vm6727_vm0, %v6506_v35  ;;  %872 = vst.msk [vmem:[#allocation3 + $0xc0] ss:$8 sm:$0x3] %vm6727_vm0, %v6506_v35 }
  0x46   : > { %1052 = vperm.xlu1 %6302, %v973_v15   ;;  %1048 = vperm.xlu0 %6301, %v972_v16   ;;  %875 = vst.msk [vmem:[#allocation3 + $0xf0] ss:$8 sm:$0x3] %vm6727_vm0, %v6506_v35  ;;  %878 = vst.msk [vmem:[#allocation3 + $0x120] ss:$8 sm:$0x3] %vm6727_vm0, %v6506_v35 }
  0x47   : > { %881 = vst.msk [vmem:[#allocation3 + $0x150] ss:$8 sm:$0x3] %vm6727_vm0, %v6506_v35  ;;  %884 = vst.msk [vmem:[#allocation3 + $0x180] ss:$8 sm:$0x3] %vm6727_vm0, %v6506_v35 }
  0x48   : > { %887 = vst.msk [vmem:[#allocation3 + $0x1b0] ss:$8 sm:$0x3] %vm6727_vm0, %v6506_v35  ;;  %890 = vst.msk [vmem:[#allocation3 + $0x1e0] ss:$8 sm:$0x3] %vm6727_vm0, %v6506_v35 }
  0x49   : > { %893 = vst.msk [vmem:[#allocation3 + $0x210] ss:$8 sm:$0x3] %vm6727_vm0, %v6506_v35  ;;  %896 = vst.msk [vmem:[#allocation3 + $0x240] ss:$8 sm:$0x3] %vm6727_vm0, %v6506_v35 }
  0x4a   : > { %1060 = vperm.xlu1 %6302, %v975_v17   ;;  %1056 = vperm.xlu0 %6301, %v974_v18   ;;  %899 = vst.msk [vmem:[#allocation3 + $0x270] ss:$8 sm:$0x3] %vm6727_vm0, %v6506_v35  ;;  %902 = vst.msk [vmem:[#allocation3 + $0x2a0] ss:$8 sm:$0x3] %vm6727_vm0, %v6506_v35 }
  0x4b   : > { %905 = vst.msk [vmem:[#allocation3 + $0x2d0] ss:$8 sm:$0x3] %vm6727_vm0, %v6506_v35  ;;  %908 = vst.msk [vmem:[#allocation3 + $0x300] ss:$8 sm:$0x3] %vm6727_vm0, %v6506_v35 }
  0x4c   : > { %911 = vst.msk [vmem:[#allocation3 + $0x51] ss:$8 sm:$0x3] %vm6727_vm0, %v6506_v35  ;;  %914 = vst.msk [vmem:[#allocation3 + $0x81] ss:$8 sm:$0x3] %vm6727_vm0, %v6506_v35 }
  0x4d   : > { %917 = vst.msk [vmem:[#allocation3 + $0xb1] ss:$8 sm:$0x3] %vm6727_vm0, %v6506_v35  ;;  %920 = vst.msk [vmem:[#allocation3 + $0xe1] ss:$8 sm:$0x3] %vm6727_vm0, %v6506_v35 }
  0x4e   : > { %1068 = vperm.xlu1 %6302, %v977_v19   ;;  %1064 = vperm.xlu0 %6301, %v976_v20   ;;  %923 = vst.msk [vmem:[#allocation3 + $0x111] ss:$8 sm:$0x3] %vm6727_vm0, %v6506_v35  ;;  %926 = vst.msk [vmem:[#allocation3 + $0x141] ss:$8 sm:$0x3] %vm6727_vm0, %v6506_v35 }
  0x4f   : > { %929 = vst.msk [vmem:[#allocation3 + $0x171] ss:$8 sm:$0x3] %vm6727_vm0, %v6506_v35  ;;  %932 = vst.msk [vmem:[#allocation3 + $0x1a1] ss:$8 sm:$0x3] %vm6727_vm0, %v6506_v35 }
  0x50   : > { %935 = vst.msk [vmem:[#allocation3 + $0x1d1] ss:$8 sm:$0x3] %vm6727_vm0, %v6506_v35  ;;  %938 = vst.msk [vmem:[#allocation3 + $0x201] ss:$8 sm:$0x3] %vm6727_vm0, %v6506_v35 }
  0x51   : > { %941 = vst.msk [vmem:[#allocation3 + $0x231] ss:$8 sm:$0x3] %vm6727_vm0, %v6506_v35  ;;  %944 = vst.msk [vmem:[#allocation3 + $0x261] ss:$8 sm:$0x3] %vm6727_vm0, %v6506_v35 }
  0x52   : > { %1076 = vperm.xlu1 %6302, %v979_v21   ;;  %1072 = vperm.xlu0 %6301, %v978_v22   ;;  %947 = vst.msk [vmem:[#allocation3 + $0x291] ss:$8 sm:$0x3] %vm6727_vm0, %v6506_v35  ;;  %950 = vst.msk [vmem:[#allocation3 + $0x2c1] ss:$8 sm:$0x3] %vm6727_vm0, %v6506_v35 }
  0x53   : > { %953 = vst.msk [vmem:[#allocation3 + $0x2f1] ss:$8 sm:$0x3] %vm6727_vm0, %v6506_v35  ;;  %956 = vst.msk [vmem:[#allocation3 + $0x321] ss:$8 sm:$0x3] %vm6727_vm0, %v6506_v35 }
  0x54   : > { %v6997_v45 = vld [vmem:[%s10136_s0] ss:$0 sm:$0xff] }
  0x55   : > { %v7002_v46 = vld [vmem:[%s10137_s5] ss:$0 sm:$0xff] }
  0x56   : > { %1084 = vperm.xlu1 %6302, %v981_v23   ;;  %1080 = vperm.xlu0 %6301, %v980_v24  }
  0x5a   : > { %1092 = vperm.xlu1 %6302, %v983_v25   ;;  %1088 = vperm.xlu0 %6301, %v982_v26  }
  0x5e   : > { %1100 = vperm.xlu1 %6302, %v985_v27   ;;  %1096 = vperm.xlu0 %6301, %v984_v28  }
  0x62   : > { %1108 = vperm.xlu1 %6302, %v987_v29   ;;  %1104 = vperm.xlu0 %6301, %v986_v30  }
  0x66   : > { %1116 = vperm.xlu1 %6302, %v6720_v32   ;;  %1112 = vperm.xlu0 %6301, %v6723_v33  }
  0xa5   : > { %v1001_v47 = vpop.permute.xlu1 %1000  ;;  %v993_v48 = vpop.permute.xlu0 %992 }
  0xa6   : > { %v1122_v49 = vrot.slane %v1001_v47, 7  ;;  %v1119_v50 = vrot.slane %v993_v48, 7 }
  0xa8   : > { %1221 = vst.msk [vmem:[#allocation2 + $0x60] sm:$0xfe] %vm1215_vm1, %v1122_v49  ;;  %1216 = vst.msk [vmem:[#allocation2 + $0x30] sm:$0xfe] %vm1215_vm1, %v1119_v50 }
  0xa9   : > { %v1005_v51 = vpop.permute.xlu1 %1004  ;;  %v997_v52 = vpop.permute.xlu0 %996 }
  0xaa   : > { %v1123_v53 = vrot.slane %v1005_v51, 7  ;;  %v1120_v54 = vrot.slane %v997_v52, 7 }
  0xac   : > { %v1124_v55 = vsel %vm1118_vm2, %v1122_v49, %v1123_v53  ;;  %1223 = vst.msk [vmem:[#allocation2 + $0x80] sm:$0x1] %vm1219_vm3, %v1123_v53  ;;  %v1121_v56 = vsel %vm1118_vm2, %v1119_v50, %v1120_v54  ;;  %1220 = vst.msk [vmem:[#allocation2 + $0x50] sm:$0x1] %vm1219_vm3, %v1120_v54 }
  0xad   : > { %1222 = vst.msk [vmem:[#allocation2 + $0x70] sm:$0xff] %vm1217_vm4, %v1124_v55  ;;  %1218 = vst.msk [vmem:[#allocation2 + $0x40] sm:$0xff] %vm1217_vm4, %v1121_v56  ;;  %v1013_v57 = vpop.permute.xlu1 %1012  ;;  %v1009_v58 = vpop.permute.xlu0 %1008 }
  0xae   : > { %v1126_v59 = vrot.slane %v1013_v57, 7  ;;  %v1125_v60 = vrot.slane %v1009_v58, 7 }
  0xb0   : > { %1226 = vst.msk [vmem:[#allocation2 + $0xb0] sm:$0x1] %vm1219_vm3, %v1126_v59  ;;  %v1127_v61 = vsel %vm1118_vm2, %v1125_v60, %v1126_v59 }
  0xb1   : > { %1224 = vst.msk [vmem:[#allocation2 + $0x90] sm:$0xfe] %vm1215_vm1, %v1125_v60  ;;  %v1021_v62 = vpop.permute.xlu1 %1020  ;;  %v1017_v63 = vpop.permute.xlu0 %1016 }
  0xb2   : > { %1225 = vst.msk [vmem:[#allocation2 + $0xa0] sm:$0xff] %vm1217_vm4, %v1127_v61  ;;  %v1129_v0 = vrot.slane %v1021_v62, 7  ;;  %v1128_v1 = vrot.slane %v1017_v63, 7 }
  0xb4   : > { %1229 = vst.msk [vmem:[#allocation2 + $0xe0] sm:$0x1] %vm1219_vm3, %v1129_v0  ;;  %v1130_v2 = vsel %vm1118_vm2, %v1128_v1, %v1129_v0 }
  0xb5   : > { %1227 = vst.msk [vmem:[#allocation2 + $0xc0] sm:$0xfe] %vm1215_vm1, %v1128_v1  ;;  %v1029_v3 = vpop.permute.xlu1 %1028  ;;  %v1025_v4 = vpop.permute.xlu0 %1024 }
  0xb6   : > { %1228 = vst.msk [vmem:[#allocation2 + $0xd0] sm:$0xff] %vm1217_vm4, %v1130_v2  ;;  %v1132_v5 = vrot.slane %v1029_v3, 7  ;;  %v1131_v6 = vrot.slane %v1025_v4, 7 }
  0xb8   : > { %1232 = vst.msk [vmem:[#allocation2 + $0x110] sm:$0x1] %vm1219_vm3, %v1132_v5  ;;  %v1133_v7 = vsel %vm1118_vm2, %v1131_v6, %v1132_v5 }
  0xb9   : > { %1230 = vst.msk [vmem:[#allocation2 + $0xf0] sm:$0xfe] %vm1215_vm1, %v1131_v6  ;;  %v1037_v8 = vpop.permute.xlu1 %1036  ;;  %v1033_v9 = vpop.permute.xlu0 %1032 }
  0xba   : > { %1231 = vst.msk [vmem:[#allocation2 + $0x100] sm:$0xff] %vm1217_vm4, %v1133_v7  ;;  %v1135_v10 = vrot.slane %v1037_v8, 7  ;;  %v1134_v11 = vrot.slane %v1033_v9, 7 }
  0xbc   : > { %1235 = vst.msk [vmem:[#allocation2 + $0x140] sm:$0x1] %vm1219_vm3, %v1135_v10  ;;  %v1136_v12 = vsel %vm1118_vm2, %v1134_v11, %v1135_v10 }
  0xbd   : > { %1233 = vst.msk [vmem:[#allocation2 + $0x120] sm:$0xfe] %vm1215_vm1, %v1134_v11  ;;  %v1045_v13 = vpop.permute.xlu1 %1044  ;;  %v1041_v14 = vpop.permute.xlu0 %1040 }
  0xbe   : > { %1234 = vst.msk [vmem:[#allocation2 + $0x130] sm:$0xff] %vm1217_vm4, %v1136_v12  ;;  %v1138_v15 = vrot.slane %v1045_v13, 7  ;;  %v1137_v16 = vrot.slane %v1041_v14, 7 }
  0xc0   : > { %1238 = vst.msk [vmem:[#allocation2 + $0x170] sm:$0x1] %vm1219_vm3, %v1138_v15  ;;  %v1139_v17 = vsel %vm1118_vm2, %v1137_v16, %v1138_v15 }
  0xc1   : > { %1236 = vst.msk [vmem:[#allocation2 + $0x150] sm:$0xfe] %vm1215_vm1, %v1137_v16  ;;  %v1053_v18 = vpop.permute.xlu1 %1052  ;;  %v1049_v19 = vpop.permute.xlu0 %1048 }
  0xc2   : > { %1237 = vst.msk [vmem:[#allocation2 + $0x160] sm:$0xff] %vm1217_vm4, %v1139_v17  ;;  %v1141_v20 = vrot.slane %v1053_v18, 7  ;;  %v1140_v21 = vrot.slane %v1049_v19, 7 }
  0xc4   : > { %1241 = vst.msk [vmem:[#allocation2 + $0x1a0] sm:$0x1] %vm1219_vm3, %v1141_v20  ;;  %v1142_v22 = vsel %vm1118_vm2, %v1140_v21, %v1141_v20 }
  0xc5   : > { %1239 = vst.msk [vmem:[#allocation2 + $0x180] sm:$0xfe] %vm1215_vm1, %v1140_v21  ;;  %v1061_v23 = vpop.permute.xlu1 %1060  ;;  %v1057_v24 = vpop.permute.xlu0 %1056 }
  0xc6   : > { %1240 = vst.msk [vmem:[#allocation2 + $0x190] sm:$0xff] %vm1217_vm4, %v1142_v22  ;;  %v1144_v25 = vrot.slane %v1061_v23, 7  ;;  %v1143_v26 = vrot.slane %v1057_v24, 7 }
  0xc8   : > { %1244 = vst.msk [vmem:[#allocation2 + $0x1d0] sm:$0x1] %vm1219_vm3, %v1144_v25  ;;  %v1145_v27 = vsel %vm1118_vm2, %v1143_v26, %v1144_v25 }
  0xc9   : > { %1242 = vst.msk [vmem:[#allocation2 + $0x1b0] sm:$0xfe] %vm1215_vm1, %v1143_v26  ;;  %v1069_v28 = vpop.permute.xlu1 %1068  ;;  %v1065_v29 = vpop.permute.xlu0 %1064 }
  0xca   : > { %1243 = vst.msk [vmem:[#allocation2 + $0x1c0] sm:$0xff] %vm1217_vm4, %v1145_v27  ;;  %v1147_v30 = vrot.slane %v1069_v28, 7  ;;  %v1146_v32 = vrot.slane %v1065_v29, 7 }
  0xcc   : > { %1247 = vst.msk [vmem:[#allocation2 + $0x200] sm:$0x1] %vm1219_vm3, %v1147_v30  ;;  %v1148_v33 = vsel %vm1118_vm2, %v1146_v32, %v1147_v30 }
  0xcd   : > { %1245 = vst.msk [vmem:[#allocation2 + $0x1e0] sm:$0xfe] %vm1215_vm1, %v1146_v32  ;;  %v1077_v34 = vpop.permute.xlu1 %1076  ;;  %v1073_v35 = vpop.permute.xlu0 %1072 }
  0xce   : > { %1246 = vst.msk [vmem:[#allocation2 + $0x1f0] sm:$0xff] %vm1217_vm4, %v1148_v33  ;;  %v1150_v47 = vrot.slane %v1077_v34, 7  ;;  %v1149_v48 = vrot.slane %v1073_v35, 7 }
  0xd0   : > { %1250 = vst.msk [vmem:[#allocation2 + $0x230] sm:$0x1] %vm1219_vm3, %v1150_v47  ;;  %v1151_v49 = vsel %vm1118_vm2, %v1149_v48, %v1150_v47 }
  0xd1   : > { %1248 = vst.msk [vmem:[#allocation2 + $0x210] sm:$0xfe] %vm1215_vm1, %v1149_v48  ;;  %v1085_v50 = vpop.permute.xlu1 %1084  ;;  %v1081_v51 = vpop.permute.xlu0 %1080 }
  0xd2   : > { %1249 = vst.msk [vmem:[#allocation2 + $0x220] sm:$0xff] %vm1217_vm4, %v1151_v49  ;;  %v1153_v52 = vrot.slane %v1085_v50, 7  ;;  %v1152_v53 = vrot.slane %v1081_v51, 7 }
  0xd4   : > { %1253 = vst.msk [vmem:[#allocation2 + $0x260] sm:$0x1] %vm1219_vm3, %v1153_v52  ;;  %v1154_v54 = vsel %vm1118_vm2, %v1152_v53, %v1153_v52 }
  0xd5   : > { %1251 = vst.msk [vmem:[#allocation2 + $0x240] sm:$0xfe] %vm1215_vm1, %v1152_v53  ;;  %v1093_v55 = vpop.permute.xlu1 %1092  ;;  %v1089_v56 = vpop.permute.xlu0 %1088 }
  0xd6   : > { %1252 = vst.msk [vmem:[#allocation2 + $0x250] sm:$0xff] %vm1217_vm4, %v1154_v54  ;;  %v1156_v57 = vrot.slane %v1093_v55, 7  ;;  %v1155_v58 = vrot.slane %v1089_v56, 7 }
  0xd8   : > { %1256 = vst.msk [vmem:[#allocation2 + $0x290] sm:$0x1] %vm1219_vm3, %v1156_v57  ;;  %v1157_v59 = vsel %vm1118_vm2, %v1155_v58, %v1156_v57 }
  0xd9   : > { %1254 = vst.msk [vmem:[#allocation2 + $0x270] sm:$0xfe] %vm1215_vm1, %v1155_v58  ;;  %v1101_v60 = vpop.permute.xlu1 %1100  ;;  %v1097_v61 = vpop.permute.xlu0 %1096 }
  0xda   : > { %1255 = vst.msk [vmem:[#allocation2 + $0x280] sm:$0xff] %vm1217_vm4, %v1157_v59  ;;  %v1159_v62 = vrot.slane %v1101_v60, 7  ;;  %v1158_v63 = vrot.slane %v1097_v61, 7 }
  0xdc   : > { %1259 = vst.msk [vmem:[#allocation2 + $0x2c0] sm:$0x1] %vm1219_vm3, %v1159_v62  ;;  %v1160_v0 = vsel %vm1118_vm2, %v1158_v63, %v1159_v62 }
  0xdd   : > { %1257 = vst.msk [vmem:[#allocation2 + $0x2a0] sm:$0xfe] %vm1215_vm1, %v1158_v63  ;;  %v1109_v1 = vpop.permute.xlu1 %1108  ;;  %v1105_v2 = vpop.permute.xlu0 %1104 }
  0xde   : > { %1258 = vst.msk [vmem:[#allocation2 + $0x2b0] sm:$0xff] %vm1217_vm4, %v1160_v0  ;;  %v1162_v3 = vrot.slane %v1109_v1, 7  ;;  %v1161_v4 = vrot.slane %v1105_v2, 7 }
  0xe0   : > { %1262 = vst.msk [vmem:[#allocation2 + $0x2f0] sm:$0x1] %vm1219_vm3, %v1162_v3  ;;  %v1163_v5 = vsel %vm1118_vm2, %v1161_v4, %v1162_v3 }
  0xe1   : > { %1260 = vst.msk [vmem:[#allocation2 + $0x2d0] sm:$0xfe] %vm1215_vm1, %v1161_v4  ;;  %v1117_v6 = vpop.permute.xlu1 %1116  ;;  %v1113_v7 = vpop.permute.xlu0 %1112 }
  0xe2   : > { %1261 = vst.msk [vmem:[#allocation2 + $0x2e0] sm:$0xff] %vm1217_vm4, %v1163_v5  ;;  %v1165_v8 = vrot.slane %v1117_v6, 7  ;;  %v1164_v9 = vrot.slane %v1113_v7, 7 }
  0xe4   : > { %1265 = vst.msk [vmem:[#allocation2 + $0x320] sm:$0x1] %vm1219_vm3, %v1165_v8  ;;  %v1166_v10 = vsel %vm1118_vm2, %v1164_v9, %v1165_v8 }
  0xe5   : > { %1263 = vst.msk [vmem:[#allocation2 + $0x300] sm:$0xfe] %vm1215_vm1, %v1164_v9 }
  0xe6   : > { %1264 = vst.msk [vmem:[#allocation2 + $0x310] sm:$0xff] %vm1217_vm4, %v1166_v10 }
  0xe7 LB: >> { %s6075_s8 = smul.u32 192, %s6475_s30  ;;  %vm1353_vm5 = vcmask 1046528   ;;  %vm1426_vm6 = vcmask 1045504   ;;  %s1284_s30 = sadd.s32 1, %s6475_s30   ;;  %s6475_s30 = sphi %s7072_s30, %s1284_s30  }
  0xe8   : >> { %p1281_p11 = scmp.ge.s32.totalorder %s1284_s30, 4  }
  0xe9   : >> { %s7080_s27 = scalar_lea.vmem [#allocation2], %s6075_s8  ;;  %s7245_s29 = scalar_lea.vmem [#allocation3], %s6075_s8 }
  0xea   : > { %s10139_s0 = sld [smem:[#allocation40_spill]] (%p1281_p11)  ;;  %s7543_s5 = smov (%p1281_p11), 0  }
  0xeb   : > { %s10140_s4 = sld [smem:[#allocation41_spill]] (%p1281_p11) }
  0xec   : > { %s10141_s7 = sld [smem:[#allocation42_spill]] (%p1281_p11) }
  0xed   : >> { %v1289_v11 = vld [vmem:[%s7080_s27] sm:$0xff]  ;;  %v1290_v12 = vld [vmem:[%s7080_s27 + $0x10] sm:$0xff] }
  0xee   : >> { %v1317_v13 = vld [vmem:[%s7080_s27] sm:$0xfe]  ;;  %v7087_v15 = vmul.f32 %v6955_v37, %v1290_v12  ;;  %v7091_v17 = vmul.f32 %v6962_v38, %v1290_v12  ;;  %v1301_v19 = vmul.f32 %v6950_v36, %v1289_v11  ;;  %v5640_v21 = vld [vmem:[%s7080_s27 + $0x30] sm:$0xfe]  ;;  %v1318_v58 = vld [vmem:[%s7080_s27 + $0x20] sm:$0x1] }
  0xef   : >> { %v1329_v14 = vmul.f32 %v6955_v37, %v1317_v13  ;;  %v1390_v16 = vld [vmem:[%s7080_s27] sm:$0xfc]  ;;  %v5649_v23 = vld [vmem:[%s7080_s27 + $0x30] sm:$0xfc]  ;;  %v1507_v28 = vmul.f32 %v6972_v40, %v5640_v21  ;;  %v1391_v59 = vld [vmem:[%s7080_s27 + $0x20] sm:$0x3]  ;;  %v1331_v8 = vmul.f32 %v6955_v37, %v1318_v58 }
  0xf0   : >> { %v7094_v18 = vld [vmem:[%s7080_s27 + $0x40] sm:$0xff]  ;;  %v1402_v20 = vmul.f32 %v6962_v38, %v1390_v16  ;;  %v1355_v26 = vrot.slane %v7087_v15, 1  ;;  %v1428_v27 = vrot.slane %v7091_v17, 2  ;;  %v5631_v32 = vld [vmem:[%s7080_s27 + $0x30] sm:$0xff]  ;;  %v1579_v34 = vmul.f32 %v6977_v41, %v5649_v23 }
  0xf1   : >> { %v7101_v22 = vmul.f32 %v6972_v40, %v7094_v18  ;;  %v7106_v24 = vmul.f32 %v6977_v41, %v7094_v18  ;;  %v1354_v25 = vrot.slane %v1329_v14, 1  ;;  %v5669_v29 = vld [vmem:[%s7080_s27 + $0x60] sm:$0xfe]  ;;  %v1479_v49 = vmul.f32 %v6967_v39, %v5631_v32  ;;  %v7120_v51 = vld [vmem:[%s7080_s27 + $0x70] sm:$0xff]  ;;  %v5670_v10 = vld [vmem:[%s7080_s27 + $0x80] sm:$0x1] }
  0xf2   : >> { %v1427_v30 = vrot.slane %v1402_v20, 2  ;;  %v5678_v47 = vld [vmem:[%s7080_s27 + $0x60] sm:$0xfc]  ;;  %v1531_v50 = vrot.slane %v1507_v28, 1  ;;  %v1683_v52 = vmul.f32 %v6987_v43, %v5669_v29  ;;  %v1603_v55 = vrot.slane %v1579_v34, 2 }
  0xf3   : >> { %v1532_v33 = vrot.slane %v7101_v22, 1  ;;  %v1604_v35 = vrot.slane %v7106_v24, 2  ;;  %v1356_v48 = vsel %vm1353_vm5, %v1354_v25, %v1355_v26  ;;  %v7125_v56 = vld [vmem:[%s7080_s27 + $0x60] sm:$0xff]  ;;  %v1684_v57 = vmul.f32 %v6987_v43, %v7120_v51  ;;  %v5641_v0 = vld [vmem:[%s7080_s27 + $0x50] sm:$0x1] }
  0xf4   : >> { %v1382_v53 = vadd.f32 %v1356_v48, %v1301_v19  ;;  %v1429_v54 = vsel %vm1426_vm6, %v1427_v30, %v1428_v27  ;;  %v1655_v60 = vmul.f32 %v6982_v42, %v7125_v56  ;;  %v1707_v61 = vrot.slane %v1683_v52, 1  ;;  %v5650_v5 = vld [vmem:[%s7080_s27 + $0x50] sm:$0x3]  ;;  %v5679_v16 = vld [vmem:[%s7080_s27 + $0x80] sm:$0x3] }
  0xf5   : >> { %v1755_v62 = vmul.f32 %v6992_v44, %v5678_v47  ;;  %v7136_v63 = vmul.f32 %v6992_v44, %v7120_v51  ;;  %v1533_v2 = vsel %vm1353_vm5, %v1531_v50, %v1532_v33  ;;  %v1605_v3 = vsel %vm1426_vm6, %v1603_v55, %v1604_v35  ;;  %v1392_v52 = vld [vmem:[%s7080_s27 + $0x30] sm:$0xfc] }
  0xf6   : >> { %v1455_v1 = vadd.f32 %v1429_v54, %v1382_v53  ;;  %v1708_v4 = vrot.slane %v1684_v57, 1  ;;  %v1404_v9 = vmul.f32 %v6962_v38, %v1391_v59  ;;  %v1302_v14 = vmul.f32 %v6950_v36, %v1290_v12  ;;  %v1319_v12 = vld [vmem:[%s7080_s27 + $0x30] sm:$0xfe] }
  0xf7   : >> { %v1779_v6 = vrot.slane %v1755_v62, 2  ;;  %v1780_v7 = vrot.slane %v7136_v63, 2  ;;  %v1509_v15 = vmul.f32 %v6972_v40, %v5641_v0  ;;  %v1357_v17 = vrot.slane %v1331_v8, 1 }
  0xf8   : >> { %v1487_v11 = vadd.f32 %v1479_v49, %v1455_v1  ;;  %v1709_v13 = vsel %vm1353_vm5, %v1707_v61, %v1708_v4  ;;  %v1430_v19 = vrot.slane %v1404_v9, 2  ;;  %v1480_v20 = vmul.f32 %v6967_v39, %v7094_v18  ;;  %v5642_v61 = vld [vmem:[%s7080_s27 + $0x60] sm:$0xfe] }
  0xf9   : >> { %v1581_v21 = vmul.f32 %v6977_v41, %v5650_v5  ;;  %v1781_v23 = vsel %vm1426_vm6, %v1779_v6, %v1780_v7  ;;  %v1534_v24 = vrot.slane %v1509_v15, 1  ;;  %v1685_v25 = vmul.f32 %v6987_v43, %v5670_v10  ;;  %v5651_v1 = vld [vmem:[%s7080_s27 + $0x60] sm:$0xfc] }
  0xfa   : >> { %v1559_v22 = vadd.f32 %v1533_v2, %v1487_v11  ;;  %v1358_v28 = vsel %vm1353_vm5, %v1355_v26, %v1357_v17  ;;  %v1431_v29 = vsel %vm1426_vm6, %v1428_v27, %v1430_v19  ;;  %v1757_v34 = vmul.f32 %v6992_v44, %v5679_v16 }
  0xfb   : >> { %v1606_v30 = vrot.slane %v1581_v21, 2  ;;  %v1383_v48 = vadd.f32 %v1358_v28, %v1302_v14  ;;  %v1656_v49 = vmul.f32 %v6982_v42, %v7120_v51  ;;  %v1710_v50 = vrot.slane %v1685_v25, 1  ;;  %v5671_v14 = vld [vmem:[%s7080_s27 + $0x90] sm:$0xfe] }
  0xfc   : >> { %v1631_v47 = vadd.f32 %v1605_v3, %v1559_v22  ;;  %v1535_v53 = vsel %vm1353_vm5, %v1532_v33, %v1534_v24  ;;  %v1782_v55 = vrot.slane %v1757_v34, 2  ;;  %v1332_v26 = vmul.f32 %v6955_v37, %v1319_v12  ;;  %v5680_v24 = vld [vmem:[%s7080_s27 + $0x90] sm:$0xfc] }
  0xfd   : >> { %v1607_v54 = vsel %vm1426_vm6, %v1604_v35, %v1606_v30  ;;  %v1456_v57 = vadd.f32 %v1431_v29, %v1383_v48  ;;  %v1303_v58 = vmul.f32 %v5631_v32, %v6950_v36  ;;  %v7170_v59 = vmul.f32 %v7094_v18, %v6955_v37  ;;  %v7211_v29 = vld [vmem:[%s7080_s27 + $0xa0] sm:$0xff] }
  0xfe   : >> { %v1663_v27 = vadd.f32 %v1655_v60, %v1631_v47  ;;  %v1711_v62 = vsel %vm1353_vm5, %v1708_v4, %v1710_v50  ;;  %v1359_v0 = vrot.slane %v1332_v26, 1  ;;  %v1405_v33 = vmul.f32 %v6962_v38, %v1392_v52 }
  0xff   : >> { %v7177_v35 = vmul.f32 %v7094_v18, %v6962_v38  ;;  %v1488_v2 = vadd.f32 %v1480_v20, %v1456_v57  ;;  %v1360_v32 = vrot.slane %v7170_v59, 1  ;;  %v1481_v3 = vmul.f32 %v7125_v56, %v6967_v39 }
 0x100   : >> { %v1735_v60 = vadd.f32 %v1709_v13, %v1663_v27  ;;  %v1432_v5 = vrot.slane %v1405_v33, 2  ;;  %v1510_v4 = vmul.f32 %v6972_v40, %v5642_v61  ;;  %v7187_v8 = vmul.f32 %v7120_v51, %v6972_v40  ;;  %v7226_v27 = vld [vmem:[%s7080_s27 + $0x90] sm:$0xff] }
 0x101   : >> { %v1433_v6 = vrot.slane %v7177_v35, 2  ;;  %v1560_v10 = vadd.f32 %v1535_v53, %v1488_v2  ;;  %v1361_v11 = vsel %vm1353_vm5, %v1359_v0, %v1360_v32  ;;  %v1582_v13 = vmul.f32 %v6977_v41, %v5651_v1  ;;  %v5652_v2 = vld [vmem:[%s7080_s27 + $0x80] sm:$0x3] }
 0x102   : >> { %v1807_v9 = vadd.f32 %v1781_v23, %v1735_v60  ;;  %v1384_v15 = vadd.f32 %v1361_v11, %v1303_v58  ;;  %v1536_v17 = vrot.slane %v1510_v4, 1  ;;  %v1537_v19 = vrot.slane %v7187_v8, 1  ;;  %v1393_v58 = vld [vmem:[%s7080_s27 + $0x50] sm:$0x3]  ;;  %v5643_v60 = vld [vmem:[%s7080_s27 + $0x80] sm:$0x1] }
 0x103   : >> { %v1434_v16 = vsel %vm1426_vm6, %v1432_v5, %v1433_v6  ;;  %v1632_v21 = vadd.f32 %v1607_v54, %v1560_v10  ;;  %v7201_v22 = vmul.f32 %v7120_v51, %v6977_v41  ;;  %v1608_v23 = vrot.slane %v1582_v13, 2  ;;  %v1320_v54 = vld [vmem:[%s7080_s27 + $0x50] sm:$0x1] }
 0x104   : >> { %v1821_v20 = vmul.f32 %v6997_v45, %v1807_v9  ;;  %v1783_v25 = vsel %vm1426_vm6, %v1780_v7, %v1782_v55  ;;  %v1457_v12 = vadd.f32 %v1434_v16, %v1384_v15  ;;  %v1538_v28 = vsel %vm1353_vm5, %v1536_v17, %v1537_v19  ;;  %v5672_v9 = vld [vmem:[%s7080_s27 + $0xb0] sm:$0x1] }
 0x105   : >> { %v1686_v30 = vmul.f32 %v6987_v43, %v5671_v14  ;;  %v1664_v47 = vadd.f32 %v1656_v49, %v1632_v21  ;;  %v1609_v48 = vrot.slane %v7201_v22, 2  ;;  %v1687_v63 = vmul.f32 %v6987_v43, %v7211_v29 }
 0x106   : >> { %v1835_v34 = vadd.f32 %v7002_v46, %v1821_v20  ;;  %v1489_v7 = vadd.f32 %v1481_v3, %v1457_v12  ;;  %v1758_v52 = vmul.f32 %v6992_v44, %v5680_v24  ;;  %v7221_v53 = vmul.f32 %v6992_v44, %v7211_v29  ;;  %v5681_v24 = vld [vmem:[%s7080_s27 + $0xb0] sm:$0x3] }
 0x107   : >> { %v1712_v50 = vrot.slane %v1686_v30, 1  ;;  %v1736_v26 = vadd.f32 %v1711_v62, %v1664_v47  ;;  %v1610_v49 = vsel %vm1426_vm6, %v1608_v23, %v1609_v48  ;;  %v1713_v57 = vrot.slane %v1687_v63, 1 }
 0x108   : >> { %v1843_v55 = vmax.f32 %v1835_v34, 0.0  ;;  %v1561_v61 = vadd.f32 %v1538_v28, %v1489_v7  ;;  %v1657_v0 = vmul.f32 %v6982_v42, %v7226_v27  ;;  %v1784_v33 = vrot.slane %v1758_v52, 2 }
 0x109   : >> { %v1785_v1 = vrot.slane %v7221_v53, 2  ;;  %v1808_v5 = vadd.f32 %v1783_v25, %v1736_v26  ;;  %v1304_v62 = vmul.f32 %v7094_v18, %v6950_v36  ;;  %v1334_v4 = vmul.f32 %v6955_v37, %v1320_v54 }
 0x10a   : >> { %v1859_v3 = vrot.slane %v1843_v55, 7  ;;  %v1633_v10 = vadd.f32 %v1610_v49, %v1561_v61  ;;  %v1714_v11 = vsel %vm1353_vm5, %v1712_v50, %v1713_v57  ;;  %v1407_v14 = vmul.f32 %v6962_v38, %v1393_v58  ;;  %v1321_v50 = vld [vmem:[%s7080_s27 + $0x60] sm:$0xfe] }
 0x10b   : >> { %v1786_v13 = vsel %vm1426_vm6, %v1784_v33, %v1785_v1  ;;  %v1822_v18 = vmul.f32 %v6997_v45, %v1808_v5  ;;  %v1362_v15 = vrot.slane %v1334_v4, 1  ;;  %v1512_v16 = vmul.f32 %v6972_v40, %v5643_v60  ;;  %v1394_v55 = vld [vmem:[%s7080_s27 + $0x60] sm:$0xfc] }
 0x10c   : >> { %5691 = vst.msk [vmem:[%s7245_s29 + $0x30] sm:$0xfe] %vm1215_vm1, %v1859_v3  ;;  %v1584_v17 = vmul.f32 %v6977_v41, %v5652_v2  ;;  %v1665_v20 = vadd.f32 %v1657_v0, %v1633_v10  ;;  %v1435_v21 = vrot.slane %v1407_v14, 2  ;;  %v1482_v22 = vmul.f32 %v7120_v51, %v6967_v39 }
 0x10d   : >> { %v1688_v23 = vmul.f32 %v6987_v43, %v5672_v9  ;;  %v1836_v25 = vadd.f32 %v7002_v46, %v1822_v18  ;;  %v1363_v12 = vsel %vm1353_vm5, %v1360_v32, %v1362_v15  ;;  %v1539_v28 = vrot.slane %v1512_v16, 1 }
 0x10e   : >> { %v1611_v30 = vrot.slane %v1584_v17, 2  ;;  %v1737_v34 = vadd.f32 %v1714_v11, %v1665_v20  ;;  %v1385_v47 = vadd.f32 %v1363_v12, %v1304_v62  ;;  %v1436_v63 = vsel %vm1426_vm6, %v1433_v6, %v1435_v21 }
 0x10f   : >> { %v1715_v7 = vrot.slane %v1688_v23, 1  ;;  %v1844_v52 = vmax.f32 %v1836_v25, 0.0  ;;  %v1540_v54 = vsel %vm1353_vm5, %v1537_v19, %v1539_v28  ;;  %v1658_v59 = vmul.f32 %v6982_v42, %v7211_v29  ;;  %v5682_v28 = vld [vmem:[%s7080_s27 + $0xc0] sm:$0xfc] }
 0x110   : >> { %v1760_v32 = vmul.f32 %v6992_v44, %v5681_v24  ;;  %v1809_v26 = vadd.f32 %v1786_v13, %v1737_v34  ;;  %v1458_v49 = vadd.f32 %v1436_v63, %v1385_v47  ;;  %v1612_v35 = vsel %vm1426_vm6, %v1609_v48, %v1611_v30  ;;  %v5653_v13 = vld [vmem:[%s7080_s27 + $0x90] sm:$0xfc] }
 0x111   : >> { %v1716_v6 = vsel %vm1353_vm5, %v1713_v57, %v1715_v7  ;;  %v1860_v58 = vrot.slane %v1844_v52, 7  ;;  %v1305_v8 = vmul.f32 %v7125_v56, %v6950_v36  ;;  %v1335_v19 = vmul.f32 %v6955_v37, %v1321_v50  ;;  %v5644_v57 = vld [vmem:[%s7080_s27 + $0x90] sm:$0xfe] }
 0x112   : >> { %v7278_v61 = vmul.f32 %v7120_v51, %v6955_v37  ;;  %v1823_v0 = vmul.f32 %v6997_v45, %v1809_v26  ;;  %v1490_v33 = vadd.f32 %v1482_v22, %v1458_v49  ;;  %v1408_v60 = vmul.f32 %v6962_v38, %v1394_v55  ;;  %v5673_v22 = vld [vmem:[%s7080_s27 + $0xc0] sm:$0xfe]  ;;  %v1322_v49 = vld [vmem:[%s7080_s27 + $0x80] sm:$0x1] }
 0x113   : >> { %v7284_v48 = vmul.f32 %v7120_v51, %v6962_v38  ;;  %v1861_v2 = vsel %vm1118_vm2, %v1859_v3, %v1860_v58  ;;  %5693 = vst.msk [vmem:[%s7245_s29 + $0x50] sm:$0x1] %vm1219_vm3, %v1860_v58  ;;  %v1787_v56 = vrot.slane %v1760_v32, 2  ;;  %v1364_v5 = vrot.slane %v1335_v19, 1  ;;  %v7329_v26 = vld [vmem:[%s7080_s27 + $0xc0] sm:$0xff] }
 0x114   : >> { %v1365_v62 = vrot.slane %v7278_v61, 1  ;;  %5692 = vst.msk [vmem:[%s7245_s29 + $0x40] sm:$0xff] %vm1217_vm4, %v1861_v2  ;;  %v1837_v4 = vadd.f32 %v7002_v46, %v1823_v0  ;;  %v1562_v9 = vadd.f32 %v1540_v54, %v1490_v33  ;;  %v1437_v10 = vrot.slane %v1408_v60, 2  ;;  %v7322_v54 = vld [vmem:[%s7080_s27 + $0xd0] sm:$0xff] }
 0x115   : >> { %v1438_v11 = vrot.slane %v7284_v48, 2  ;;  %v1483_v14 = vmul.f32 %v7226_v27, %v6967_v39  ;;  %v1513_v18 = vmul.f32 %v6972_v40, %v5644_v57  ;;  %v7304_v15 = vmul.f32 %v7211_v29, %v6972_v40  ;;  %v5645_v0 = vld [vmem:[%s7080_s27 + $0xb0] sm:$0x1] }
 0x116   : >> { %v1366_v3 = vsel %vm1353_vm5, %v1364_v5, %v1365_v62  ;;  %v1845_v16 = vmax.f32 %v1837_v4, 0.0  ;;  %v1634_v17 = vadd.f32 %v1612_v35, %v1562_v9  ;;  %v1585_v25 = vmul.f32 %v6977_v41, %v5653_v13  ;;  %v1395_v35 = vld [vmem:[%s7080_s27 + $0x80] sm:$0x3] }
 0x117   : >> { %v1386_v20 = vadd.f32 %v1366_v3, %v1305_v8  ;;  %v1439_v21 = vsel %vm1426_vm6, %v1437_v10, %v1438_v11  ;;  %v1541_v23 = vrot.slane %v1513_v18, 1  ;;  %v1542_v24 = vrot.slane %v7304_v15, 1  ;;  %v5674_v15 = vld [vmem:[%s7080_s27 + $0xe0] sm:$0x1] }
 0x118   : >> { %v1586_v12 = vmul.f32 %v7211_v29, %v6977_v41  ;;  %v7315_v30 = vrot.slane %v1845_v16, 7  ;;  %v1666_v34 = vadd.f32 %v1658_v59, %v1634_v17  ;;  %v1788_v47 = vsel %vm1426_vm6, %v1785_v1, %v1787_v56  ;;  %v5654_v56 = vld [vmem:[%s7080_s27 + $0xb0] sm:$0x3] }
 0x119   : >> { %v1459_v63 = vadd.f32 %v1439_v21, %v1386_v20  ;;  %v1543_v7 = vsel %vm1353_vm5, %v1541_v23, %v1542_v24  ;;  %v1613_v50 = vrot.slane %v1585_v25, 2  ;;  %v1689_v32 = vmul.f32 %v6987_v43, %v5673_v22 }
 0x11a   : >> { %v1614_v52 = vrot.slane %v1586_v12, 2  ;;  %5694 = vst.msk [vmem:[%s7245_s29 + $0x60] sm:$0xfe] %vm1215_vm1, %v7315_v30  ;;  %v1738_v55 = vadd.f32 %v1716_v6, %v1666_v34  ;;  %v1690_v53 = vmul.f32 %v6987_v43, %v7322_v54  ;;  %v1761_v1 = vmul.f32 %v6992_v44, %v5682_v28  ;;  %v5683_v12 = vld [vmem:[%s7080_s27 + $0xe0] sm:$0x3] }
 0x11b   : >> { %v1491_v59 = vadd.f32 %v1483_v14, %v1459_v63  ;;  %v1659_v8 = vmul.f32 %v6982_v42, %v7329_v26  ;;  %v1717_v19 = vrot.slane %v1689_v32, 1  ;;  %v7341_v6 = vmul.f32 %v6992_v44, %v7322_v54 }
 0x11c   : >> { %v1615_v58 = vsel %vm1426_vm6, %v1613_v50, %v1614_v52  ;;  %v1810_v33 = vadd.f32 %v1788_v47, %v1738_v55  ;;  %v1718_v57 = vrot.slane %v1690_v53, 1  ;;  %v1789_v2 = vrot.slane %v1761_v1, 2  ;;  %v1396_v53 = vld [vmem:[%s7080_s27 + $0x90] sm:$0xfc] }
 0x11d   : >> { %v1563_v60 = vadd.f32 %v1543_v7, %v1491_v59  ;;  %v1790_v5 = vrot.slane %v7341_v6, 2  ;;  %v1306_v4 = vmul.f32 %v7120_v51, %v6950_v36  ;;  %v1337_v9 = vmul.f32 %v6955_v37, %v1322_v49  ;;  %v1323_v7 = vld [vmem:[%s7080_s27 + $0x90] sm:$0xfe] }
 0x11e   : >> { %v1410_v10 = vmul.f32 %v6962_v38, %v1395_v35  ;;  %v1824_v13 = vmul.f32 %v6997_v45, %v1810_v33  ;;  %v1484_v14 = vmul.f32 %v7211_v29, %v6967_v39  ;;  %v1515_v18 = vmul.f32 %v6972_v40, %v5645_v0  ;;  %v5646_v0 = vld [vmem:[%s7080_s27 + $0xc0] sm:$0xfe] }
 0x11f   : >> { %v1635_v3 = vadd.f32 %v1615_v58, %v1563_v60  ;;  %v1719_v16 = vsel %vm1353_vm5, %v1717_v19, %v1718_v57  ;;  %v1367_v17 = vrot.slane %v1337_v9, 1  ;;  %v1587_v51 = vmul.f32 %v6977_v41, %v5654_v56 }
 0x120   : >> { %v1440_v20 = vrot.slane %v1410_v10, 2  ;;  %v1838_v21 = vadd.f32 %v7002_v46, %v1824_v13  ;;  %v1791_v23 = vsel %vm1426_vm6, %v1789_v2, %v1790_v5  ;;  %v1544_v25 = vrot.slane %v1515_v18, 1 }
 0x121   : >> { %v1667_v22 = vadd.f32 %v1659_v8, %v1635_v3  ;;  %v1368_v28 = vsel %vm1353_vm5, %v1365_v62, %v1367_v17  ;;  %v1616_v47 = vrot.slane %v1587_v51, 2  ;;  %v1691_v63 = vmul.f32 %v6987_v43, %v5674_v15 }
 0x122   : >> { %v1441_v34 = vsel %vm1426_vm6, %v1438_v11, %v1440_v20  ;;  %v1846_v50 = vmax.f32 %v1838_v21, 0.0  ;;  %v1387_v55 = vadd.f32 %v1368_v28, %v1306_v4  ;;  %v1660_v59 = vmul.f32 %v6982_v42, %v7322_v54 }
 0x123   : >> { %v1739_v32 = vadd.f32 %v1719_v16, %v1667_v22  ;;  %v1545_v61 = vsel %vm1353_vm5, %v1542_v24, %v1544_v25  ;;  %v1617_v62 = vsel %vm1426_vm6, %v1614_v52, %v1616_v47  ;;  %v1720_v48 = vrot.slane %v1691_v63, 1  ;;  %v7413_v22 = vld [vmem:[%s7080_s27 + $0x100] sm:$0xff]  ;;  %v5684_v47 = vld [vmem:[%s7080_s27 + $0xf0] sm:$0xfc] }
 0x124   : >> { %v1763_v11 = vmul.f32 %v6992_v44, %v5683_v12  ;;  %v1863_v1 = vrot.slane %v1846_v50, 7  ;;  %v1460_v35 = vadd.f32 %v1441_v34, %v1387_v55  ;;  %v1338_v58 = vmul.f32 %v6955_v37, %v1323_v7 }
 0x125   : >> { %v1811_v49 = vadd.f32 %v1791_v23, %v1739_v32  ;;  %v1721_v8 = vsel %vm1353_vm5, %v1718_v57, %v1720_v48  ;;  %v1307_v19 = vmul.f32 %v7226_v27, %v6950_v36  ;;  %v7382_v24 = vmul.f32 %v7211_v29, %v6955_v37  ;;  %v5655_v57 = vld [vmem:[%s7080_s27 + $0xc0] sm:$0xfc]  ;;  %v5675_v23 = vld [vmem:[%s7080_s27 + $0xf0] sm:$0xfe] }
 0x126   : >> { %v1411_v52 = vmul.f32 %v6962_v38, %v1396_v53  ;;  %v1864_v33 = vsel %vm1118_vm2, %v7315_v30, %v1863_v1  ;;  %5696 = vst.msk [vmem:[%s7245_s29 + $0x80] sm:$0x1] %vm1219_vm3, %v1863_v1  ;;  %v1492_v2 = vadd.f32 %v1484_v14, %v1460_v35  ;;  %v1369_v56 = vrot.slane %v1338_v58, 1  ;;  %v1324_v1 = vld [vmem:[%s7080_s27 + $0xb0] sm:$0x1] }
 0x127   : >> { %v1825_v60 = vmul.f32 %v6997_v45, %v1811_v49  ;;  %5695 = vst.msk [vmem:[%s7245_s29 + $0x70] sm:$0xff] %vm1217_vm4, %v1864_v33  ;;  %v1792_v27 = vrot.slane %v1763_v11, 2  ;;  %v1370_v4 = vrot.slane %v7382_v24, 1  ;;  %v7397_v9 = vmul.f32 %v7211_v29, %v6962_v38  ;;  %v1397_v49 = vld [vmem:[%s7080_s27 + $0xb0] sm:$0x3] }
 0x128   : >> { %v1442_v10 = vrot.slane %v1411_v52, 2  ;;  %v1564_v13 = vadd.f32 %v1545_v61, %v1492_v2  ;;  %v1485_v3 = vmul.f32 %v7329_v26, %v6967_v39  ;;  %v1516_v14 = vmul.f32 %v6972_v40, %v5646_v0  ;;  %v5666_v61 = vld [vmem:[%s7080_s27 + $0xf0] sm:$0xff]  ;;  %v5647_v52 = vld [vmem:[%s7080_s27 + $0xe0] sm:$0x1] }
 0x129   : >> { %v1839_v30 = vadd.f32 %v7002_v46, %v1825_v60  ;;  %v1371_v18 = vsel %vm1353_vm5, %v1369_v56, %v1370_v4  ;;  %v1443_v15 = vrot.slane %v7397_v9, 2  ;;  %v7409_v16 = vmul.f32 %v7322_v54, %v6972_v40  ;;  %v5656_v2 = vld [vmem:[%s7080_s27 + $0xe0] sm:$0x3] }
 0x12a   : >> { %v1588_v17 = vmul.f32 %v6977_v41, %v5655_v57  ;;  %v1636_v51 = vadd.f32 %v1617_v62, %v1564_v13  ;;  %v1388_v21 = vadd.f32 %v1371_v18, %v1307_v19  ;;  %v1546_v26 = vrot.slane %v1516_v14, 1 }
 0x12b   : >> { %v1847_v20 = vmax.f32 %v1839_v30, 0.0  ;;  %v1444_v25 = vsel %vm1426_vm6, %v1442_v10, %v1443_v15  ;;  %v1547_v12 = vrot.slane %v7409_v16, 1  ;;  %v7420_v28 = vmul.f32 %v7322_v54, %v6977_v41 }
 0x12c   : >> { %v1618_v34 = vrot.slane %v1588_v17, 2  ;;  %v1668_v7 = vadd.f32 %v1660_v59, %v1636_v51  ;;  %v1793_v50 = vsel %vm1426_vm6, %v1790_v5, %v1792_v27  ;;  %v1461_v32 = vadd.f32 %v1444_v25, %v1388_v21  ;;  %v5676_v51 = vld [vmem:[%s7080_s27 + $0x110] sm:$0x1] }
 0x12d   : >> { %v1865_v63 = vrot.slane %v1847_v20, 7  ;;  %v1548_v55 = vsel %vm1353_vm5, %v1546_v26, %v1547_v12  ;;  %v1619_v53 = vrot.slane %v7420_v28, 2  ;;  %v1692_v62 = vmul.f32 %v6987_v43, %v5675_v23 }
 0x12e   : >> { %v1693_v48 = vmul.f32 %v6987_v43, %v7413_v22  ;;  %v1740_v59 = vadd.f32 %v1721_v8, %v1668_v7  ;;  %v1493_v11 = vadd.f32 %v1485_v3, %v1461_v32  ;;  %v1764_v6 = vmul.f32 %v6992_v44, %v5684_v47  ;;  %v5685_v7 = vld [vmem:[%s7080_s27 + $0x110] sm:$0x3] }
 0x12f   : >> { %5697 = vst.msk [vmem:[%s7245_s29 + $0x90] sm:$0xfe] %vm1215_vm1, %v1865_v63  ;;  %v1765_v5 = vmul.f32 %v6992_v44, %v7413_v22  ;;  %v1620_v35 = vsel %vm1426_vm6, %v1618_v34, %v1619_v53  ;;  %v1722_v58 = vrot.slane %v1692_v62, 1  ;;  %v1661_v60 = vmul.f32 %v6982_v42, %v5666_v61 }
 0x130   : >> { %v1723_v19 = vrot.slane %v1693_v48, 1  ;;  %v1812_v0 = vadd.f32 %v1793_v50, %v1740_v59  ;;  %v1565_v33 = vadd.f32 %v1548_v55, %v1493_v11  ;;  %v1794_v8 = vrot.slane %v1764_v6, 2 }
 0x131   : >> { %v1795_v56 = vrot.slane %v1765_v5, 2  ;;  %v1340_v57 = vmul.f32 %v6955_v37, %v1324_v1  ;;  %v1413_v27 = vmul.f32 %v6962_v38, %v1397_v49  ;;  %v1308_v30 = vmul.f32 %v7211_v29, %v6950_v36  ;;  %v7511_v36 = vld [vmem:[%s10139_s0 + $0x5] ss:$0 sm:$0xff] (%p1281_p11)  ;;  %v7516_v37 = vld [vmem:[%s10139_s0 + $0x6] ss:$0 sm:$0xff] (%p1281_p11) }
 0x132   : >> { %v1826_v9 = vmul.f32 %v6997_v45, %v1812_v0  ;;  %v1637_v10 = vadd.f32 %v1620_v35, %v1565_v33  ;;  %v1518_v13 = vmul.f32 %v6972_v40, %v5647_v52  ;;  %v1724_v3 = vsel %vm1353_vm5, %v1722_v58, %v1723_v19  ;;  %v7521_v38 = vld [vmem:[%s10139_s0 + $0x8] ss:$0 sm:$0xff] (%p1281_p11)  ;;  %v7531_v40 = vld [vmem:[%s10139_s0 + $0xa] ss:$0 sm:$0xff] (%p1281_p11) }
 0x133   : >> { %v1372_v14 = vrot.slane %v1340_v57, 1  ;;  %v1445_v18 = vrot.slane %v1413_v27, 2  ;;  %v1590_v16 = vmul.f32 %v6977_v41, %v5656_v2  ;;  %v1796_v21 = vsel %vm1426_vm6, %v1794_v8, %v1795_v56  ;;  %v7501_v27 = vld [vmem:[%s10139_s0 + $0x2] ss:$0 sm:$0xff] (%p1281_p11)  ;;  %v7536_v41 = vld [vmem:[%s10140_s4] ss:$0 sm:$0xff] (%p1281_p11) }
 0x134   : >> { %v1840_v17 = vadd.f32 %v7002_v46, %v1826_v9  ;;  %v1669_v20 = vadd.f32 %v1661_v60, %v1637_v10  ;;  %v1549_v23 = vrot.slane %v1518_v13, 1  ;;  %v1486_v47 = vmul.f32 %v7322_v54, %v6967_v39  ;;  %v7506_v9 = vld [vmem:[%s10139_s0 + $0x4] ss:$0 sm:$0xff] (%p1281_p11)  ;;  %v7526_v39 = vld [vmem:[%s10139_s0 + $0x9] ss:$0 sm:$0xff] (%p1281_p11) }
 0x135   : >> { %v1373_v26 = vsel %vm1353_vm5, %v1370_v4, %v1372_v14  ;;  %v1446_v29 = vsel %vm1426_vm6, %v1443_v15, %v1445_v18  ;;  %v1621_v50 = vrot.slane %v1590_v16, 2  ;;  %v1694_v32 = vmul.f32 %v6987_v43, %v5676_v51 }
 0x136   : >> { %v1848_v25 = vmax.f32 %v1840_v17, 0.0  ;;  %v1741_v28 = vadd.f32 %v1724_v3, %v1669_v20  ;;  %v1389_v34 = vadd.f32 %v1373_v26, %v1308_v30  ;;  %v1550_v4 = vsel %vm1353_vm5, %v1547_v12, %v1549_v23 }
 0x137   : >> { %v1766_v62 = vmul.f32 %v6992_v44, %v5685_v7  ;;  %v1622_v54 = vsel %vm1426_vm6, %v1619_v53, %v1621_v50  ;;  %v1725_v11 = vrot.slane %v1694_v32, 1  ;;  %v1662_v12 = vmul.f32 %v6982_v42, %v7413_v22  ;;  %v7541_v42 = vld [vmem:[%s10141_s7] ss:$0 sm:$0xff] (%p1281_p11) }
 0x138   : >> { %v1866_v55 = vrot.slane %v1848_v25, 7  ;;  %v1813_v61 = vadd.f32 %v1796_v21, %v1741_v28  ;;  %v1462_v24 = vadd.f32 %v1446_v29, %v1389_v34 }
 0x139   : >> { %v1797_v1 = vrot.slane %v1766_v62, 2  ;;  %v1726_v35 = vsel %vm1353_vm5, %v1723_v19, %v1725_v11  ;;  %v7491_v19 = vld [vmem:[%s10139_s0] ss:$0 sm:$0xff] (%p1281_p11) }
 0x13a   : >> { %v1867_v15 = vsel %vm1118_vm2, %v1865_v63, %v1866_v55  ;;  %5699 = vst.msk [vmem:[%s7245_s29 + $0xb0] sm:$0x1] %vm1219_vm3, %v1866_v55  ;;  %v1827_v48 = vmul.f32 %v6997_v45, %v1813_v61  ;;  %v1494_v59 = vadd.f32 %v1486_v47, %v1462_v24 }
 0x13b   : >> { %5698 = vst.msk [vmem:[%s7245_s29 + $0xa0] sm:$0xff] %vm1217_vm4, %v1867_v15  ;;  %v1798_v0 = vsel %vm1426_vm6, %v1795_v56, %v1797_v1  ;;  %v7496_v56 = vld [vmem:[%s10139_s0 + $0x1] ss:$0 sm:$0xff] (%p1281_p11) }
 0x13c   : >> { %v1841_v6 = vadd.f32 %v7002_v46, %v1827_v48  ;;  %v1566_v5 = vadd.f32 %v1550_v4, %v1494_v59 }
 0x13e   : >> { %v1849_v63 = vmax.f32 %v1841_v6, 0.0  ;;  %v1638_v49 = vadd.f32 %v1622_v54, %v1566_v5 }
 0x140   : >> { %v1868_v58 = vrot.slane %v1849_v63, 7  ;;  %v1670_v52 = vadd.f32 %v1662_v12, %v1638_v49 }
 0x142   : >> { %5700 = vst.msk [vmem:[%s7245_s29 + $0xc0] sm:$0xfe] %vm1215_vm1, %v1868_v58  ;;  %v1742_v53 = vadd.f32 %v1726_v35, %v1670_v52 }
 0x144   : >> { %v1814_v33 = vadd.f32 %v1798_v0, %v1742_v53 }
 0x146   : >> { %v1828_v60 = vmul.f32 %v6997_v45, %v1814_v33 }
 0x148   : >> { %v1842_v2 = vadd.f32 %v7002_v46, %v1828_v60 }
 0x14a   : >> { %v1850_v22 = vmax.f32 %v1842_v2, 0.0 }
 0x14b   : > { %1283 = sbr.rel (!%p1281_p11) target bundleno = 231 (0xe7), region = 301 }
 0x14c   : >> { %v1869_v8 = vrot.slane %v1850_v22, 7 }
 0x14e   : >> { %v1870_v57 = vsel %vm1118_vm2, %v1868_v58, %v1869_v8  ;;  %5702 = vst.msk [vmem:[%s7245_s29 + $0xe0] sm:$0x1] %vm1219_vm3, %v1869_v8 }
 0x14f   : >> { %5701 = vst.msk [vmem:[%s7245_s29 + $0xd0] sm:$0xff] %vm1217_vm4, %v1870_v57 }
 0x150 LB: >> { %s6076_s28 = smul.u32 192, %s6479_s5  ;;  %s6078_s24 = sshll.u32 %s6479_s5, 7  ;;  %s6479_s5 = sphi %s7543_s5, %s1915_s5  }
 0x151   : >> { %s7706_s27 = scalar_lea.vmem [#allocation4], %s6078_s24  ;;  %s1915_s5 = sadd.s32 1, %s6479_s5  }
 0x152   : >> { %s7549_s8 = scalar_lea.vmem [#allocation3], %s6076_s28  ;;  %p1912_p12 = scmp.ge.s32.totalorder %s1915_s5, 4  }
 0x153   : > { %s10142_s30 = sld [smem:[#allocation44_spill]] (%p1912_p12)  ;;  %s7947_s7 = smov (%p1912_p12), 0  }
 0x156   : >> { %v1920_v43 = vld [vmem:[%s7549_s8] sm:$0xff]  ;;  %v1921_v44 = vld [vmem:[%s7549_s8 + $0x10] sm:$0xff] }
 0x157   : >> { %v1948_v45 = vld [vmem:[%s7549_s8] sm:$0xfe]  ;;  %v7556_v10 = vmul.f32 %v7496_v56, %v1921_v44  ;;  %v7560_v13 = vmul.f32 %v7501_v27, %v1921_v44  ;;  %v1932_v14 = vmul.f32 %v7491_v19, %v1920_v43  ;;  %v5726_v16 = vld [vmem:[%s7549_s8 + $0x30] sm:$0xfe]  ;;  %v1949_v6 = vld [vmem:[%s7549_s8 + $0x20] sm:$0x1] }
 0x158   : >> { %v1960_v46 = vmul.f32 %v7496_v56, %v1948_v45  ;;  %v2021_v30 = vld [vmem:[%s7549_s8] sm:$0xfc]  ;;  %v5735_v20 = vld [vmem:[%s7549_s8 + $0x30] sm:$0xfc]  ;;  %v2138_v23 = vmul.f32 %v7511_v36, %v5726_v16  ;;  %v2022_v5 = vld [vmem:[%s7549_s8 + $0x20] sm:$0x3]  ;;  %v1962_v22 = vmul.f32 %v7496_v56, %v1949_v6 }
 0x159   : >> { %v7563_v3 = vld [vmem:[%s7549_s8 + $0x40] sm:$0xff]  ;;  %v2033_v18 = vmul.f32 %v7501_v27, %v2021_v30  ;;  %v1986_v26 = vrot.slane %v7556_v10, 1  ;;  %v2059_v29 = vrot.slane %v7560_v13, 2  ;;  %v5717_v34 = vld [vmem:[%s7549_s8 + $0x30] sm:$0xff]  ;;  %v2210_v7 = vmul.f32 %v7516_v37, %v5735_v20 }
 0x15a   : >> { %v7570_v17 = vmul.f32 %v7511_v36, %v7563_v3  ;;  %v7575_v51 = vmul.f32 %v7516_v37, %v7563_v3  ;;  %v1985_v21 = vrot.slane %v1960_v46, 1  ;;  %v5755_v25 = vld [vmem:[%s7549_s8 + $0x60] sm:$0xfe]  ;;  %v2110_v61 = vmul.f32 %v7506_v9, %v5717_v34  ;;  %v7589_v4 = vld [vmem:[%s7549_s8 + $0x70] sm:$0xff]  ;;  %v5756_v57 = vld [vmem:[%s7549_s8 + $0x80] sm:$0x1] }
 0x15b   : >> { %v2058_v28 = vrot.slane %v2033_v18, 2  ;;  %v5764_v32 = vld [vmem:[%s7549_s8 + $0x60] sm:$0xfc]  ;;  %v2162_v24 = vrot.slane %v2138_v23, 1  ;;  %v2314_v62 = vmul.f32 %v7526_v39, %v5755_v25  ;;  %v2234_v59 = vrot.slane %v2210_v7, 2 }
 0x15c   : >> { %v2163_v47 = vrot.slane %v7570_v17, 1  ;;  %v2235_v50 = vrot.slane %v7575_v51, 2  ;;  %v1987_v55 = vsel %vm1353_vm5, %v1985_v21, %v1986_v26  ;;  %v7594_v54 = vld [vmem:[%s7549_s8 + $0x60] sm:$0xff]  ;;  %v2315_v11 = vmul.f32 %v7526_v39, %v7589_v4  ;;  %v5727_v35 = vld [vmem:[%s7549_s8 + $0x50] sm:$0x1] }
 0x15d   : >> { %v2013_v15 = vadd.f32 %v1987_v55, %v1932_v14  ;;  %v2060_v48 = vsel %vm1426_vm6, %v2058_v28, %v2059_v29  ;;  %v2286_v12 = vmul.f32 %v7521_v38, %v7594_v54  ;;  %v2338_v1 = vrot.slane %v2314_v62, 1  ;;  %v5736_v33 = vld [vmem:[%s7549_s8 + $0x50] sm:$0x3]  ;;  %v5765_v30 = vld [vmem:[%s7549_s8 + $0x80] sm:$0x3] }
 0x15e   : >> { %v2386_v63 = vmul.f32 %v7531_v40, %v5764_v32  ;;  %v7605_v49 = vmul.f32 %v7531_v40, %v7589_v4  ;;  %v2164_v52 = vsel %vm1353_vm5, %v2162_v24, %v2163_v47  ;;  %v2236_v0 = vsel %vm1426_vm6, %v2234_v59, %v2235_v50  ;;  %v2023_v62 = vld [vmem:[%s7549_s8 + $0x30] sm:$0xfc] }
 0x15f   : >> { %v2086_v58 = vadd.f32 %v2060_v48, %v2013_v15  ;;  %v2339_v53 = vrot.slane %v2315_v11, 1  ;;  %v2035_v8 = vmul.f32 %v7501_v27, %v2022_v5  ;;  %v1933_v46 = vmul.f32 %v7491_v19, %v1921_v44  ;;  %v1950_v44 = vld [vmem:[%s7549_s8 + $0x30] sm:$0xfe] }
 0x160   : >> { %v2410_v60 = vrot.slane %v2386_v63, 2  ;;  %v2411_v2 = vrot.slane %v7605_v49, 2  ;;  %v2140_v10 = vmul.f32 %v7511_v36, %v5727_v35  ;;  %v1988_v13 = vrot.slane %v1962_v22, 1 }
 0x161   : >> { %v2118_v43 = vadd.f32 %v2110_v61, %v2086_v58  ;;  %v2340_v45 = vsel %vm1353_vm5, %v2338_v1, %v2339_v53  ;;  %v2061_v14 = vrot.slane %v2035_v8, 2  ;;  %v2111_v18 = vmul.f32 %v7506_v9, %v7563_v3  ;;  %v5728_v1 = vld [vmem:[%s7549_s8 + $0x60] sm:$0xfe] }
 0x162   : >> { %v2212_v16 = vmul.f32 %v7516_v37, %v5736_v33  ;;  %v2412_v20 = vsel %vm1426_vm6, %v2410_v60, %v2411_v2  ;;  %v2165_v51 = vrot.slane %v2140_v10, 1  ;;  %v2316_v21 = vmul.f32 %v7526_v39, %v5756_v57  ;;  %v5737_v58 = vld [vmem:[%s7549_s8 + $0x60] sm:$0xfc] }
 0x163   : >> { %v2190_v17 = vadd.f32 %v2164_v52, %v2118_v43  ;;  %v1989_v23 = vsel %vm1353_vm5, %v1986_v26, %v1988_v13  ;;  %v2062_v25 = vsel %vm1426_vm6, %v2059_v29, %v2061_v14  ;;  %v2388_v7 = vmul.f32 %v7531_v40, %v5765_v30 }
 0x164   : >> { %v2237_v28 = vrot.slane %v2212_v16, 2  ;;  %v2014_v55 = vadd.f32 %v1989_v23, %v1933_v46  ;;  %v2287_v61 = vmul.f32 %v7521_v38, %v7589_v4  ;;  %v2341_v24 = vrot.slane %v2316_v21, 1  ;;  %v5757_v46 = vld [vmem:[%s7549_s8 + $0x90] sm:$0xfe] }
 0x165   : >> { %v2262_v32 = vadd.f32 %v2236_v0, %v2190_v17  ;;  %v2166_v15 = vsel %vm1353_vm5, %v2163_v47, %v2165_v51  ;;  %v2413_v59 = vrot.slane %v2388_v7, 2  ;;  %v1963_v26 = vmul.f32 %v7496_v56, %v1950_v44  ;;  %v5766_v51 = vld [vmem:[%s7549_s8 + $0x90] sm:$0xfc] }
 0x166   : >> { %v2238_v48 = vsel %vm1426_vm6, %v2235_v50, %v2237_v28  ;;  %v2087_v11 = vadd.f32 %v2062_v25, %v2014_v55  ;;  %v1934_v6 = vmul.f32 %v5717_v34, %v7491_v19  ;;  %v7639_v5 = vmul.f32 %v7563_v3, %v7496_v56  ;;  %v7681_v25 = vld [vmem:[%s7549_s8 + $0xa0] sm:$0xff] }
 0x167   : >> { %v2294_v29 = vadd.f32 %v2286_v12, %v2262_v32  ;;  %v2342_v63 = vsel %vm1353_vm5, %v2339_v53, %v2341_v24  ;;  %v1990_v35 = vrot.slane %v1963_v26, 1  ;;  %v2036_v47 = vmul.f32 %v7501_v27, %v2023_v62 }
 0x168   : >> { %v7646_v50 = vmul.f32 %v7563_v3, %v7501_v27  ;;  %v2119_v52 = vadd.f32 %v2111_v18, %v2087_v11  ;;  %v1991_v34 = vrot.slane %v7639_v5, 1  ;;  %v2112_v0 = vmul.f32 %v7594_v54, %v7506_v9  ;;  %v7697_v11 = vld [vmem:[%s7549_s8 + $0x90] sm:$0xff] }
 0x169   : >> { %v2366_v12 = vadd.f32 %v2340_v45, %v2294_v29  ;;  %v2063_v33 = vrot.slane %v2036_v47, 2  ;;  %v2141_v60 = vmul.f32 %v7511_v36, %v5728_v1  ;;  %v7656_v22 = vmul.f32 %v7589_v4, %v7511_v36  ;;  %v5729_v1 = vld [vmem:[%s7549_s8 + $0x80] sm:$0x1] }
 0x16a   : >> { %v2064_v53 = vrot.slane %v7646_v50, 2  ;;  %v2191_v57 = vadd.f32 %v2166_v15, %v2119_v52  ;;  %v1992_v43 = vsel %vm1353_vm5, %v1990_v35, %v1991_v34  ;;  %v2213_v45 = vmul.f32 %v7516_v37, %v5737_v58  ;;  %v5738_v52 = vld [vmem:[%s7549_s8 + $0x80] sm:$0x3] }
 0x16b   : >> { %v2438_v8 = vadd.f32 %v2412_v20, %v2366_v12  ;;  %v2015_v10 = vadd.f32 %v1992_v43, %v1934_v6  ;;  %v2167_v13 = vrot.slane %v2141_v60, 1  ;;  %v2168_v14 = vrot.slane %v7656_v22, 1 }
 0x16c   : >> { %v2065_v30 = vsel %vm1426_vm6, %v2063_v33, %v2064_v53  ;;  %v2263_v16 = vadd.f32 %v2238_v48, %v2191_v57  ;;  %v7671_v17 = vmul.f32 %v7589_v4, %v7516_v37  ;;  %v2239_v20 = vrot.slane %v2213_v45, 2  ;;  %v1951_v48 = vld [vmem:[%s7549_s8 + $0x50] sm:$0x1] }
 0x16d   : >> { %v2452_v18 = vmul.f32 %v7536_v41, %v2438_v8  ;;  %v2414_v21 = vsel %vm1426_vm6, %v2411_v2, %v2413_v59  ;;  %v2088_v44 = vadd.f32 %v2065_v30, %v2015_v10  ;;  %v2169_v23 = vsel %vm1353_vm5, %v2167_v13, %v2168_v14  ;;  %v2024_v59 = vld [vmem:[%s7549_s8 + $0x50] sm:$0x3] }
 0x16e   : >> { %v2317_v28 = vmul.f32 %v7526_v39, %v5757_v46  ;;  %v2295_v32 = vadd.f32 %v2287_v61, %v2263_v16  ;;  %v2240_v55 = vrot.slane %v7671_v17, 2  ;;  %v2318_v49 = vmul.f32 %v7526_v39, %v7681_v25  ;;  %v5758_v8 = vld [vmem:[%s7549_s8 + $0xb0] sm:$0x1] }
 0x16f   : >> { %v2466_v7 = vadd.f32 %v7541_v42, %v2452_v18  ;;  %v2120_v2 = vadd.f32 %v2112_v0, %v2088_v44  ;;  %v2389_v62 = vmul.f32 %v7531_v40, %v5766_v51  ;;  %v7691_v15 = vmul.f32 %v7531_v40, %v7681_v25  ;;  %v5767_v51 = vld [vmem:[%s7549_s8 + $0xb0] sm:$0x3] }
 0x170   : >> { %v2343_v24 = vrot.slane %v2317_v28, 1  ;;  %v2367_v29 = vadd.f32 %v2342_v63, %v2295_v32  ;;  %v2241_v61 = vsel %vm1426_vm6, %v2239_v20, %v2240_v55  ;;  %v2344_v6 = vrot.slane %v2318_v49, 1 }
 0x171   : >> { %v2474_v26 = vmax.f32 %v2466_v7, 0.0  ;;  %v2192_v35 = vadd.f32 %v2169_v23, %v2120_v2  ;;  %v2288_v47 = vmul.f32 %v7521_v38, %v7697_v11  ;;  %v2415_v58 = vrot.slane %v2389_v62, 2  ;;  %v1952_v7 = vld [vmem:[%s7549_s8 + $0x60] sm:$0xfe] }
 0x172   : >> { %v2416_v12 = vrot.slane %v7691_v15, 2  ;;  %v2439_v63 = vadd.f32 %v2414_v21, %v2367_v29  ;;  %v1935_v0 = vmul.f32 %v7563_v3, %v7491_v19  ;;  %v1965_v33 = vmul.f32 %v7496_v56, %v1951_v48  ;;  %v2025_v62 = vld [vmem:[%s7549_s8 + $0x60] sm:$0xfc] }
 0x173   : >> { %2485 = vst.msk [vmem:[%s7706_s27] sm:$0xff] %vm1217_vm4, %v2474_v26  ;;  %v2038_v60 = vmul.f32 %v7501_v27, %v2024_v59  ;;  %v2264_v57 = vadd.f32 %v2241_v61, %v2192_v35  ;;  %v2345_v43 = vsel %vm1353_vm5, %v2343_v24, %v2344_v6  ;;  %v2143_v46 = vmul.f32 %v7511_v36, %v5729_v1  ;;  %v5730_v1 = vld [vmem:[%s7549_s8 + $0x90] sm:$0xfe] }
 0x174   : >> { %v2417_v45 = vsel %vm1426_vm6, %v2415_v58, %v2416_v12  ;;  %v2453_v10 = vmul.f32 %v7536_v41, %v2439_v63  ;;  %v1993_v30 = vrot.slane %v1965_v33, 1  ;;  %v2215_v13 = vmul.f32 %v7516_v37, %v5738_v52  ;;  %v5739_v52 = vld [vmem:[%s7549_s8 + $0x90] sm:$0xfc] }
 0x175   : >> { %v2066_v3 = vrot.slane %v2038_v60, 2  ;;  %v2296_v18 = vadd.f32 %v2288_v47, %v2264_v57  ;;  %v2113_v16 = vmul.f32 %v7589_v4, %v7506_v9  ;;  %v2170_v17 = vrot.slane %v2143_v46, 1 }
 0x176   : >> { %v2319_v20 = vmul.f32 %v7526_v39, %v5758_v8  ;;  %v2467_v21 = vadd.f32 %v7541_v42, %v2453_v10  ;;  %v1994_v44 = vsel %vm1353_vm5, %v1991_v34, %v1993_v30  ;;  %v2242_v28 = vrot.slane %v2215_v13, 2 }
 0x177   : >> { %v2067_v23 = vsel %vm1426_vm6, %v2064_v53, %v2066_v3  ;;  %v2368_v32 = vadd.f32 %v2345_v43, %v2296_v18  ;;  %v2016_v49 = vadd.f32 %v1994_v44, %v1935_v0  ;;  %v2289_v2 = vmul.f32 %v7521_v38, %v7681_v25  ;;  %v5759_v3 = vld [vmem:[%s7549_s8 + $0xc0] sm:$0xfe] }
 0x178   : >> { %v2346_v24 = vrot.slane %v2319_v20, 1  ;;  %v2475_v48 = vmax.f32 %v2467_v21, 0.0  ;;  %v2171_v5 = vsel %vm1353_vm5, %v2168_v14, %v2170_v17  ;;  %v2243_v50 = vsel %vm1426_vm6, %v2240_v55, %v2242_v28  ;;  %v5768_v20 = vld [vmem:[%s7549_s8 + $0xc0] sm:$0xfc]  ;;  %v7787_v28 = vld [vmem:[%s7549_s8 + $0xd0] sm:$0xff] }
 0x179   : >> { %v2391_v34 = vmul.f32 %v7531_v40, %v5767_v51  ;;  %v2440_v53 = vadd.f32 %v2417_v45, %v2368_v32  ;;  %v2089_v59 = vadd.f32 %v2067_v23, %v2016_v49  ;;  %v1936_v26 = vmul.f32 %v7594_v54, %v7491_v19  ;;  %v7792_v49 = vld [vmem:[%s7549_s8 + $0xc0] sm:$0xff] }
 0x17a   : >> { %v1966_v29 = vmul.f32 %v7496_v56, %v1952_v7  ;;  %2486 = vst.msk [vmem:[%s7706_s27 + $0x10] sm:$0xff] %vm1217_vm4, %v2475_v48  ;;  %v2347_v61 = vsel %vm1353_vm5, %v2344_v6, %v2346_v24  ;;  %v7750_v22 = vmul.f32 %v7589_v4, %v7496_v56  ;;  %v2039_v14 = vmul.f32 %v7501_v27, %v2025_v62 }
 0x17b   : >> { %v7755_v55 = vmul.f32 %v7589_v4, %v7501_v27  ;;  %v2454_v35 = vmul.f32 %v7536_v41, %v2440_v53  ;;  %v2121_v54 = vadd.f32 %v2113_v16, %v2089_v59  ;;  %v2418_v47 = vrot.slane %v2391_v34, 2 }
 0x17c   : >> { %v1995_v58 = vrot.slane %v1966_v29, 1  ;;  %v1996_v6 = vrot.slane %v7750_v22, 1  ;;  %v2068_v63 = vrot.slane %v2039_v14, 2  ;;  %v2114_v33 = vmul.f32 %v7697_v11, %v7506_v9  ;;  %v5731_v29 = vld [vmem:[%s7549_s8 + $0xb0] sm:$0x1] }
 0x17d   : >> { %v2069_v0 = vrot.slane %v7755_v55, 2  ;;  %v2468_v60 = vadd.f32 %v7541_v42, %v2454_v35  ;;  %v2193_v8 = vadd.f32 %v2171_v5, %v2121_v54  ;;  %v2144_v57 = vmul.f32 %v7511_v36, %v5730_v1  ;;  %v5740_v54 = vld [vmem:[%s7549_s8 + $0xb0] sm:$0x3] }
 0x17e   : >> { %v7768_v43 = vmul.f32 %v7681_v25, %v7511_v36  ;;  %v1997_v45 = vsel %vm1353_vm5, %v1995_v58, %v1996_v6  ;;  %v2216_v10 = vmul.f32 %v7516_v37, %v5739_v52  ;;  %v7777_v30 = vmul.f32 %v7681_v25, %v7516_v37 }
 0x17f   : >> { %v2070_v46 = vsel %vm1426_vm6, %v2068_v63, %v2069_v0  ;;  %v2476_v13 = vmax.f32 %v2468_v60, 0.0  ;;  %v2265_v18 = vadd.f32 %v2243_v50, %v2193_v8  ;;  %v2017_v16 = vadd.f32 %v1997_v45, %v1936_v26  ;;  %v2026_v50 = vld [vmem:[%s7549_s8 + $0x80] sm:$0x3] }
 0x180   : >> { %v2172_v17 = vrot.slane %v2144_v57, 1  ;;  %v2419_v51 = vsel %vm1426_vm6, %v2416_v12, %v2418_v47  ;;  %v2173_v21 = vrot.slane %v7768_v43, 1  ;;  %v2244_v44 = vrot.slane %v2216_v10, 2  ;;  %v1953_v12 = vld [vmem:[%s7549_s8 + $0x80] sm:$0x1] }
 0x181   : >> { %v2245_v23 = vrot.slane %v7777_v30, 2  ;;  %2487 = vst.msk [vmem:[%s7706_s27 + $0x20] sm:$0xff] %vm1217_vm4, %v2476_v13  ;;  %v2297_v7 = vadd.f32 %v2289_v2, %v2265_v18  ;;  %v2090_v32 = vadd.f32 %v2070_v46, %v2017_v16  ;;  %v2320_v24 = vmul.f32 %v7526_v39, %v5759_v3  ;;  %v5760_v63 = vld [vmem:[%s7549_s8 + $0xe0] sm:$0x1] }
 0x182   : >> { %v2321_v15 = vmul.f32 %v7526_v39, %v7787_v28  ;;  %v2174_v62 = vsel %vm1353_vm5, %v2172_v17, %v2173_v21  ;;  %v2290_v48 = vmul.f32 %v7521_v38, %v7792_v49  ;;  %v2392_v5 = vmul.f32 %v7531_v40, %v5768_v20  ;;  %v5769_v10 = vld [vmem:[%s7549_s8 + $0xe0] sm:$0x3] }
 0x183   : >> { %v7804_v2 = vmul.f32 %v7531_v40, %v7787_v28  ;;  %v2369_v34 = vadd.f32 %v2347_v61, %v2297_v7  ;;  %v2122_v53 = vadd.f32 %v2114_v33, %v2090_v32  ;;  %v2348_v59 = vrot.slane %v2320_v24, 1 }
 0x184   : >> { %v2349_v26 = vrot.slane %v2321_v15, 1  ;;  %v2246_v22 = vsel %vm1426_vm6, %v2244_v44, %v2245_v23  ;;  %v2420_v14 = vrot.slane %v2392_v5, 2  ;;  %v1968_v35 = vmul.f32 %v7496_v56, %v1953_v12  ;;  %v1954_v44 = vld [vmem:[%s7549_s8 + $0x90] sm:$0xfe] }
 0x185   : >> { %v2421_v1 = vrot.slane %v7804_v2, 2  ;;  %v2441_v47 = vadd.f32 %v2419_v51, %v2369_v34  ;;  %v2194_v58 = vadd.f32 %v2174_v62, %v2122_v53  ;;  %v1937_v52 = vmul.f32 %v7589_v4, %v7491_v19  ;;  %v2027_v15 = vld [vmem:[%s7549_s8 + $0x90] sm:$0xfc] }
 0x186   : >> { %v2041_v61 = vmul.f32 %v7501_v27, %v2026_v50  ;;  %v2350_v33 = vsel %vm1353_vm5, %v2348_v59, %v2349_v26  ;;  %v1998_v8 = vrot.slane %v1968_v35, 1  ;;  %v2146_v57 = vmul.f32 %v7511_v36, %v5731_v29 }
 0x187   : >> { %v2422_v60 = vsel %vm1426_vm6, %v2420_v14, %v2421_v1  ;;  %v2455_v43 = vmul.f32 %v7536_v41, %v2441_v47  ;;  %v2266_v45 = vadd.f32 %v2246_v22, %v2194_v58  ;;  %v2218_v4 = vmul.f32 %v7516_v37, %v5740_v54  ;;  %v5741_v14 = vld [vmem:[%s7549_s8 + $0xc0] sm:$0xfc] }
 0x188   : >> { %v2071_v46 = vrot.slane %v2041_v61, 2  ;;  %v1999_v30 = vsel %vm1353_vm5, %v1996_v6, %v1998_v8  ;;  %v2115_v3 = vmul.f32 %v7681_v25, %v7506_v9  ;;  %v2175_v13 = vrot.slane %v2146_v57, 1 }
 0x189   : >> { %v2322_v18 = vmul.f32 %v7526_v39, %v5760_v63  ;;  %v2469_v16 = vadd.f32 %v7541_v42, %v2455_v43  ;;  %v2298_v17 = vadd.f32 %v2290_v48, %v2266_v45  ;;  %v2018_v20 = vadd.f32 %v1999_v30, %v1937_v52  ;;  %v5761_v45 = vld [vmem:[%s7549_s8 + $0xf0] sm:$0xfe] }
 0x18a   : >> { %v2072_v51 = vsel %vm1426_vm6, %v2069_v0, %v2071_v46  ;;  %v2247_v7 = vrot.slane %v2218_v4, 2  ;;  %v2291_v6 = vmul.f32 %v7521_v38, %v7787_v28  ;;  %v2394_v24 = vmul.f32 %v7531_v40, %v5769_v10 }
 0x18b   : >> { %v2351_v32 = vrot.slane %v2322_v18, 1  ;;  %v2477_v12 = vmax.f32 %v2469_v16, 0.0  ;;  %v2370_v62 = vadd.f32 %v2350_v33, %v2298_v17  ;;  %v2091_v48 = vadd.f32 %v2072_v51, %v2018_v20  ;;  %v5752_v51 = vld [vmem:[%s7549_s8 + $0xf0] sm:$0xff] }
 0x18c   : >> { %v2176_v5 = vsel %vm1353_vm5, %v2173_v21, %v2175_v13  ;;  %v2248_v55 = vsel %vm1426_vm6, %v2245_v23, %v2247_v7  ;;  %v1938_v50 = vmul.f32 %v7697_v11, %v7491_v19  ;;  %v1969_v34 = vmul.f32 %v7496_v56, %v1954_v44  ;;  %v5732_v21 = vld [vmem:[%s7549_s8 + $0xc0] sm:$0xfe]  ;;  %v5770_v13 = vld [vmem:[%s7549_s8 + $0xf0] sm:$0xfc] }
 0x18d   : >> { %v2352_v0 = vsel %vm1353_vm5, %v2349_v26, %v2351_v32  ;;  %2488 = vst.msk [vmem:[%s7706_s27 + $0x30] sm:$0xff] %vm1217_vm4, %v2477_v12  ;;  %v2442_v53 = vadd.f32 %v2422_v60, %v2370_v62  ;;  %v2123_v59 = vadd.f32 %v2115_v3, %v2091_v48  ;;  %v7847_v29 = vmul.f32 %v7681_v25, %v7496_v56  ;;  %v7877_v3 = vld [vmem:[%s7549_s8 + $0x100] sm:$0xff]  ;;  %v2028_v48 = vld [vmem:[%s7549_s8 + $0xb0] sm:$0x3] }
 0x18e   : >> { %v2042_v22 = vmul.f32 %v7501_v27, %v2027_v15  ;;  %v2423_v23 = vrot.slane %v2394_v24, 2  ;;  %v2000_v26 = vrot.slane %v1969_v34, 1  ;;  %v7854_v11 = vmul.f32 %v7681_v25, %v7501_v27  ;;  %v1955_v24 = vld [vmem:[%s7549_s8 + $0xb0] sm:$0x1] }
 0x18f   : >> { %v2116_v35 = vmul.f32 %v7792_v49, %v7506_v9  ;;  %v2456_v54 = vmul.f32 %v7536_v41, %v2442_v53  ;;  %v2195_v47 = vadd.f32 %v2176_v5, %v2123_v59  ;;  %v2001_v58 = vrot.slane %v7847_v29, 1  ;;  %v5742_v29 = vld [vmem:[%s7549_s8 + $0xe0] sm:$0x3] }
 0x190   : >> { %v2073_v52 = vrot.slane %v2042_v22, 2  ;;  %v2074_v61 = vrot.slane %v7854_v11, 2  ;;  %v2147_v63 = vmul.f32 %v7511_v36, %v5732_v21  ;;  %v7864_v33 = vmul.f32 %v7787_v28, %v7511_v36 }
 0x191   : >> { %v2219_v60 = vmul.f32 %v7516_v37, %v5741_v14  ;;  %v2470_v49 = vadd.f32 %v7541_v42, %v2456_v54  ;;  %v2267_v8 = vadd.f32 %v2248_v55, %v2195_v47  ;;  %v2002_v57 = vsel %vm1353_vm5, %v2000_v26, %v2001_v58 }
 0x192   : >> { %v7871_v43 = vmul.f32 %v7787_v28, %v7516_v37  ;;  %v2019_v46 = vadd.f32 %v2002_v57, %v1938_v50  ;;  %v2075_v4 = vsel %vm1426_vm6, %v2073_v52, %v2074_v61  ;;  %v2177_v10 = vrot.slane %v2147_v63, 1  ;;  %v5733_v50 = vld [vmem:[%s7549_s8 + $0xe0] sm:$0x1] }
 0x193   : >> { %v2178_v30 = vrot.slane %v7864_v33, 1  ;;  %v2478_v18 = vmax.f32 %v2470_v49, 0.0  ;;  %v2299_v16 = vadd.f32 %v2291_v6, %v2267_v8  ;;  %v2249_v17 = vrot.slane %v2219_v60, 2  ;;  %v5762_v33 = vld [vmem:[%s7549_s8 + $0x110] sm:$0x1] }
 0x194   : >> { %v2250_v20 = vrot.slane %v7871_v43, 2  ;;  %v2424_v44 = vsel %vm1426_vm6, %v2421_v1, %v2423_v23  ;;  %v2092_v7 = vadd.f32 %v2075_v4, %v2019_v46  ;;  %v2323_v32 = vmul.f32 %v7526_v39, %v5761_v45  ;;  %v5771_v4 = vld [vmem:[%s7549_s8 + $0x110] sm:$0x3] }
 0x195   : >> { %2489 = vst.msk [vmem:[%s7706_s27 + $0x40] sm:$0xff] %vm1217_vm4, %v2478_v18  ;;  %v2371_v15 = vadd.f32 %v2352_v0, %v2299_v16  ;;  %v2179_v12 = vsel %vm1353_vm5, %v2177_v10, %v2178_v30  ;;  %v2324_v6 = vmul.f32 %v7526_v39, %v7877_v3  ;;  %v2395_v62 = vmul.f32 %v7531_v40, %v5770_v13 }
 0x196   : >> { %v2124_v5 = vadd.f32 %v2116_v35, %v2092_v7  ;;  %v2251_v2 = vsel %vm1426_vm6, %v2249_v17, %v2250_v20  ;;  %v2292_v1 = vmul.f32 %v7521_v38, %v5752_v51  ;;  %v2396_v55 = vmul.f32 %v7531_v40, %v7877_v3 }
 0x197   : >> { %v2443_v34 = vadd.f32 %v2424_v44, %v2371_v15  ;;  %v2353_v0 = vrot.slane %v2323_v32, 1  ;;  %v2354_v53 = vrot.slane %v2324_v6, 1  ;;  %v1971_v59 = vmul.f32 %v7496_v56, %v1955_v24 }
 0x198   : >> { %v2196_v22 = vadd.f32 %v2179_v12, %v2124_v5  ;;  %v2425_v21 = vrot.slane %v2395_v62, 2  ;;  %v1939_v14 = vmul.f32 %v7681_v25, %v7491_v19  ;;  %v2044_v23 = vmul.f32 %v7501_v27, %v2028_v48 }
 0x199   : >> { %v2457_v26 = vmul.f32 %v7536_v41, %v2443_v34  ;;  %v2426_v11 = vrot.slane %v2396_v55, 2  ;;  %v2003_v35 = vrot.slane %v1971_v59, 1  ;;  %v2149_v54 = vmul.f32 %v7511_v36, %v5733_v50 }
 0x19a   : >> { %v2268_v47 = vadd.f32 %v2251_v2, %v2196_v22  ;;  %v2076_v52 = vrot.slane %v2044_v23, 2  ;;  %v2221_v63 = vmul.f32 %v7516_v37, %v5742_v29  ;;  %v2355_v49 = vsel %vm1353_vm5, %v2353_v0, %v2354_v53 }
 0x19b   : >> { %v2471_v60 = vadd.f32 %v7541_v42, %v2457_v26  ;;  %v2004_v25 = vsel %vm1353_vm5, %v2001_v58, %v2003_v35  ;;  %v2180_v8 = vrot.slane %v2149_v54, 1  ;;  %v2117_v46 = vmul.f32 %v7787_v28, %v7506_v9 }
 0x19c   : >> { %v2300_v57 = vadd.f32 %v2292_v1, %v2268_v47  ;;  %v2020_v43 = vadd.f32 %v2004_v25, %v1939_v14  ;;  %v2077_v45 = vsel %vm1426_vm6, %v2074_v61, %v2076_v52  ;;  %v2427_v13 = vsel %vm1426_vm6, %v2425_v21, %v2426_v11 }
 0x19d   : >> { %v2479_v10 = vmax.f32 %v2471_v60, 0.0  ;;  %v2252_v18 = vrot.slane %v2221_v63, 2  ;;  %v2325_v16 = vmul.f32 %v7526_v39, %v5762_v33  ;;  %v2181_v58 = vsel %vm1353_vm5, %v2178_v30, %v2180_v8 }
 0x19e   : >> { %v2372_v17 = vadd.f32 %v2355_v49, %v2300_v57  ;;  %v2093_v51 = vadd.f32 %v2077_v45, %v2020_v43  ;;  %v2397_v44 = vmul.f32 %v7531_v40, %v5771_v4  ;;  %v2293_v12 = vmul.f32 %v7521_v38, %v7877_v3  ;;  %v7940_v3 = vld [vmem:[%s10142_s30] ss:$0 sm:$0xff] (%p1912_p12) }
 0x19f   : >> { %2490 = vst.msk [vmem:[%s7706_s27 + $0x50] sm:$0xff] %vm1217_vm4, %v2479_v10  ;;  %v2253_v28 = vsel %vm1426_vm6, %v2250_v20, %v2252_v18  ;;  %v2356_v32 = vrot.slane %v2325_v16, 1 }
 0x1a0   : >> { %v2444_v61 = vadd.f32 %v2427_v13, %v2372_v17  ;;  %v2125_v7 = vadd.f32 %v2117_v46, %v2093_v51  ;;  %v2428_v6 = vrot.slane %v2397_v44, 2 }
 0x1a1   : >> { %v2357_v30 = vsel %vm1353_vm5, %v2354_v53, %v2356_v32  ;;  %v7945_v53 = vld [vmem:[%s10004_s9] ss:$0 sm:$0xff] (%p1912_p12) }
 0x1a2   : >> { %v2458_v24 = vmul.f32 %v7536_v41, %v2444_v61  ;;  %v2197_v15 = vadd.f32 %v2181_v58, %v2125_v7  ;;  %v2429_v1 = vsel %vm1426_vm6, %v2426_v11, %v2428_v6 }
 0x1a4   : >> { %v2472_v62 = vadd.f32 %v7541_v42, %v2458_v24  ;;  %v2269_v48 = vadd.f32 %v2253_v28, %v2197_v15 }
 0x1a6   : >> { %v2480_v5 = vmax.f32 %v2472_v62, 0.0  ;;  %v2301_v2 = vadd.f32 %v2293_v12, %v2269_v48 }
 0x1a8   : >> { %2491 = vst.msk [vmem:[%s7706_s27 + $0x60] sm:$0xff] %vm1217_vm4, %v2480_v5  ;;  %v2373_v20 = vadd.f32 %v2357_v30, %v2301_v2 }
 0x1aa   : >> { %v2445_v55 = vadd.f32 %v2429_v1, %v2373_v20 }
 0x1ac   : >> { %v2459_v50 = vmul.f32 %v7536_v41, %v2445_v55 }
 0x1ae   : >> { %v2473_v34 = vadd.f32 %v7541_v42, %v2459_v50  ;;  %1914 = sbr.rel (!%p1912_p12) target bundleno = 336 (0x150), region = 312 }
 0x1b0   : >> { %v2481_v0 = vmax.f32 %v2473_v34, 0.0 }
 0x1b2   : >> { %2492 = vst.msk [vmem:[%s7706_s27 + $0x70] sm:$0xff] %vm1217_vm4, %v2481_v0 }
 0x1b3 LB: >> { %s10143_s8 = sld [smem:[#allocation43_spill]]  ;;  %s6080_s29 = sshll.u32 %s6483_s7, 7  ;;  %s6483_s7 = sphi %s7947_s7, %s2500_s7  }
 0x1b4   : >> { %s2504_s4 = scalar_lea.vmem [#allocation4], %s6080_s29  ;;  %s5791_s5 = smul.u32 192, %s6483_s7 }
 0x1b5   : >> { %s2500_s7 = sadd.s32 1, %s6483_s7  }
 0x1b6   : >> { %s5508_s24 = scalar_lea.vmem [#allocation2], %s5791_s5  ;;  %p2497_p13 = scmp.ge.s32.totalorder %s2500_s7, 4  }
 0x1b7   : > { %v7996_v0 = vld [vmem:[%s10005_s10] ss:$0 sm:$0xff] (%p2497_p13)  ;;  %s8048_s2 = smov (%p2497_p13), 0  }
 0x1b9   : >> { %v6303_v19 = vld [vmem:[%s10143_s8 + $0x18] sm:$0xff]   ;;  %v6304_v56 = vld [vmem:[%s10143_s8 + $0x10] sm:$0xff]   ;;  %v6305_v27 = vld [vmem:[%s10143_s8 + $0x8] sm:$0xff]  }
 0x1ba   : >> { %6155 = vmatprep.subr.bf16.mxu0 %v6303_v19  ;;  %6171 = vmatprep.subr.bf16.mxu1 %v6303_v19  ;;  %v2505_v9 = vld [vmem:[%s2504_s4] sm:$0xff]  ;;  %v2506_v36 = vld [vmem:[%s2504_s4 + $0x10] sm:$0xff] }
 0x1bb   : >> { %6156 = vmatpush3.bf16.msra.mxu0 %v6303_v19  ;;  %6175 = vmatpush3.bf16.msra.mxu1 %v6303_v19  ;;  %v2509_v37 = vld [vmem:[%s2504_s4 + $0x40] sm:$0xff]  ;;  %v2513_v38 = vpack.c.bf16 %v2506_v36, %v2505_v9  ;;  %v2510_v39 = vld [vmem:[%s2504_s4 + $0x50] sm:$0xff]  ;;  %v8026_v9 = vld [vmem:[%s10005_s10 + $0x8] ss:$0 sm:$0xff] (%p2497_p13) }
 0x1bc   : >> { %6157 = vmatprep.subr.bf16.mxu0 %v6304_v56  ;;  %6172 = vmatprep.subr.bf16.mxu1 %v6304_v56  ;;  %v2515_v40 = vpack.c.bf16 %v2510_v39, %v2509_v37  ;;  %v6306_v41 = vld [vmem:[%s10143_s8] sm:$0xff]   ;;  %v2508_v59 = vld [vmem:[%s2504_s4 + $0x30] sm:$0xff]  ;;  %v8031_v36 = vld [vmem:[%s10005_s10 + $0x9] ss:$0 sm:$0xff] (%p2497_p13) }
 0x1bd   : >> { %6163 = vmatprep.mubr.msk.bf16.mxu0 %vm1217_vm4, %v2513_v38  ;;  %v2507_v42 = vld [vmem:[%s2504_s4 + $0x20] sm:$0xff]  ;;  %v2512_v22 = vld [vmem:[%s2504_s4 + $0x70] sm:$0xff]  ;;  %v8036_v37 = vld [vmem:[%s10005_s10 + $0xa] ss:$0 sm:$0xff] (%p2497_p13) }
 0x1be   : >> { %6167 = vmatprep.mubr.msk.bf16.mxu1 %vm1217_vm4, %v2515_v40  ;;  %v2511_v29 = vld [vmem:[%s2504_s4 + $0x60] sm:$0xff]  ;;  %v2514_v21 = vpack.c.bf16 %v2508_v59, %v2507_v42 }
 0x1bf   : >> { %6158 = vmatpush3.bf16.msra.mxu0 %v6304_v56  ;;  %6176 = vmatpush3.bf16.msra.mxu1 %v6304_v56  ;;  %v2516_v14 = vpack.c.bf16 %v2512_v22, %v2511_v29  ;;  %v8001_v19 = vld [vmem:[%s10005_s10 + $0x1] ss:$0 sm:$0xff] (%p2497_p13)  ;;  %v8006_v56 = vld [vmem:[%s10005_s10 + $0x2] ss:$0 sm:$0xff] (%p2497_p13)  ;;  %v8041_v38 = vld [vmem:[%s10006_s11] ss:$0 sm:$0xff] (%p2497_p13) }
 0x1c0   : >> { %6159 = vmatprep.subr.bf16.mxu0 %v6305_v27  ;;  %6173 = vmatprep.subr.bf16.mxu1 %v6305_v27  ;;  %v8046_v39 = vld [vmem:[%s10007_s12] ss:$0 sm:$0xff] (%p2497_p13) }
 0x1c3   : >> { %6160 = vmatpush3.bf16.msra.mxu0 %v6305_v27  ;;  %6177 = vmatpush3.bf16.msra.mxu1 %v6305_v27  ;;  %v8011_v27 = vld [vmem:[%s10005_s10 + $0x4] ss:$0 sm:$0xff] (%p2497_p13) }
 0x1c4   : >> { %6161 = vmatprep.subr.bf16.mxu0 %v6306_v41  ;;  %6174 = vmatprep.subr.bf16.mxu1 %v6306_v41 }
 0x1c7   : >> { %6162 = vmatpush3.bf16.msra.mxu0 %v6306_v41  ;;  %6178 = vmatpush3.bf16.msra.mxu1 %v6306_v41 }
 0x1ca   : >> { %6164 = vmatmul.mubr.msk.bf16.vlgmr.msra.gmra.mxu0 %vm1217_vm4, %v2514_v21  ;;  %6168 = vmatmul.mubr.msk.bf16.vlgmr.msra.gmra.mxu1 %vm1217_vm4, %v2516_v14 }
 0x28a   : >> { %v6165_v23 = vpop.f32.mrf.mxu0  ;;  %v6169_v26 = vpop.f32.mrf.mxu1 }
 0x28b   : >> { %v2634_v11 = vmul.f32 %v6165_v23, %v7940_v3  ;;  %v2638_v35 = vmul.f32 %v6169_v26, %v7940_v3 }
 0x28c   : >> { %v2595_v54 = vpop.f32.mrf.mxu0  ;;  %v2611_v47 = vpop.f32.mrf.mxu1 }
 0x28d   : >> { %v2648_v52 = vadd.f32 %v7945_v53, %v2634_v11  ;;  %v2652_v63 = vadd.f32 %v7945_v53, %v2638_v35  ;;  %v2632_v33 = vmul.f32 %v7940_v3, %v2595_v54  ;;  %v2636_v60 = vmul.f32 %v7940_v3, %v2611_v47 }
 0x28e   : >> { %v6166_v49 = vpop.f32.mrf.mxu0  ;;  %v6170_v25 = vpop.f32.mrf.mxu1 }
 0x28f   : >> { %v2656_v8 = vmax.f32 %v2648_v52, 0.0  ;;  %v2660_v57 = vmax.f32 %v2652_v63, 0.0  ;;  %v2646_v43 = vadd.f32 %v7945_v53, %v2632_v33  ;;  %v2650_v45 = vadd.f32 %v7945_v53, %v2636_v60 }
 0x290   : >> { %v2635_v46 = vmul.f32 %v6166_v49, %v7940_v3  ;;  %v2639_v4 = vmul.f32 %v6170_v25, %v7940_v3  ;;  %v2598_v10 = vpop.f32.mrf.mxu0  ;;  %v2614_v13 = vpop.f32.mrf.mxu1 }
 0x291   : >> { %v2674_v18 = vrot.slane %v2656_v8, 7  ;;  %v2680_v16 = vrot.slane %v2660_v57, 7  ;;  %v2654_v17 = vmax.f32 %v2646_v43, 0.0  ;;  %v2658_v51 = vmax.f32 %v2650_v45, 0.0 }
 0x292   : >> { %v2649_v58 = vadd.f32 %v7945_v53, %v2635_v46  ;;  %v2653_v44 = vadd.f32 %v7945_v53, %v2639_v4  ;;  %v2633_v61 = vmul.f32 %v7940_v3, %v2598_v10  ;;  %v2637_v7 = vmul.f32 %v7940_v3, %v2614_v13  ;;  %v8016_v3 = vld [vmem:[%s10005_s10 + $0x5] ss:$0 sm:$0xff] (%p2497_p13) }
 0x293   : >> { %5795 = vst [vmem:[%s5508_s24 + $0x60] sm:$0xfe] %v2674_v18  ;;  %5801 = vst [vmem:[%s5508_s24 + $0xc0] sm:$0xfe] %v2680_v16  ;;  %v2671_v28 = vrot.slane %v2654_v17, 7  ;;  %v2677_v32 = vrot.slane %v2658_v51, 7 }
 0x294   : >> { %v2657_v24 = vmax.f32 %v2649_v58, 0.0  ;;  %v2661_v15 = vmax.f32 %v2653_v44, 0.0  ;;  %v2647_v12 = vadd.f32 %v7945_v53, %v2633_v61  ;;  %v2651_v6 = vadd.f32 %v7945_v53, %v2637_v7  ;;  %v8021_v53 = vld [vmem:[%s10005_s10 + $0x6] ss:$0 sm:$0xff] (%p2497_p13) }
 0x295   : >> { %5792 = vst [vmem:[%s5508_s24 + $0x30] sm:$0xfe] %v2671_v28  ;;  %5798 = vst [vmem:[%s5508_s24 + $0x90] sm:$0xfe] %v2677_v32 }
 0x296   : >> { %v2675_v62 = vrot.slane %v2657_v24, 7  ;;  %v2681_v48 = vrot.slane %v2661_v15, 7  ;;  %v2655_v30 = vmax.f32 %v2647_v12, 0.0  ;;  %v2659_v5 = vmax.f32 %v2651_v6, 0.0 }
 0x297   : > { %2499 = sbr.rel (!%p2497_p13) target bundleno = 435 (0x1b3), region = 323 }
 0x298   : >> { %v2676_v2 = vsel %vm1118_vm2, %v2674_v18, %v2675_v62  ;;  %5797 = vst [vmem:[%s5508_s24 + $0x80] sm:$0x1] %v2675_v62  ;;  %v2682_v1 = vsel %vm1118_vm2, %v2680_v16, %v2681_v48  ;;  %5803 = vst [vmem:[%s5508_s24 + $0xe0] sm:$0x1] %v2681_v48  ;;  %v2672_v20 = vrot.slane %v2655_v30, 7  ;;  %v2678_v55 = vrot.slane %v2659_v5, 7 }
 0x299   : >> { %5796 = vst [vmem:[%s5508_s24 + $0x70] sm:$0xff] %v2676_v2  ;;  %5802 = vst [vmem:[%s5508_s24 + $0xd0] sm:$0xff] %v2682_v1 }
 0x29a   : >> { %v2673_v50 = vsel %vm1118_vm2, %v2671_v28, %v2672_v20  ;;  %5794 = vst [vmem:[%s5508_s24 + $0x50] sm:$0x1] %v2672_v20  ;;  %v2679_v34 = vsel %vm1118_vm2, %v2677_v32, %v2678_v55  ;;  %5800 = vst [vmem:[%s5508_s24 + $0xb0] sm:$0x1] %v2678_v55 }
 0x29b   : >> { %5793 = vst [vmem:[%s5508_s24 + $0x40] sm:$0xff] %v2673_v50  ;;  %5799 = vst [vmem:[%s5508_s24 + $0xa0] sm:$0xff] %v2679_v34 }
 0x29c LB: >> { %s6081_s30 = smul.u32 192, %s6487_s2  ;;  %s6083_s1 = sshll.u32 %s6487_s2, 7  ;;  %s6487_s2 = sphi %s8048_s2, %s2728_s2  }
 0x29d   : >> { %s8211_s28 = scalar_lea.vmem [#allocation4], %s6083_s1  ;;  %s2728_s2 = sadd.s32 1, %s6487_s2  }
 0x29e   : >> { %s8054_s4 = scalar_lea.vmem [#allocation2], %s6081_s30  ;;  %p2725_p0 = scmp.ge.s32.totalorder %s2728_s2, 4  }
 0x29f   : > { %s8444_s29 = smov (%p2725_p0), 0  }
 0x2a2   : >> { %v2733_v40 = vld [vmem:[%s8054_s4] sm:$0xff]  ;;  %v2734_v41 = vld [vmem:[%s8054_s4 + $0x10] sm:$0xff] }
 0x2a3   : >> { %v2761_v42 = vld [vmem:[%s8054_s4] sm:$0xfe]  ;;  %v8061_v29 = vmul.f32 %v8001_v19, %v2734_v41  ;;  %v8065_v21 = vmul.f32 %v8006_v56, %v2734_v41  ;;  %v2745_v23 = vmul.f32 %v7996_v0, %v2733_v40  ;;  %v5827_v11 = vld [vmem:[%s8054_s4 + $0x30] sm:$0xfe]  ;;  %v2762_v7 = vld [vmem:[%s8054_s4 + $0x20] sm:$0x1] }
 0x2a4   : >> { %v2773_v59 = vmul.f32 %v8001_v19, %v2761_v42  ;;  %v2834_v22 = vld [vmem:[%s8054_s4] sm:$0xfc]  ;;  %v5836_v54 = vld [vmem:[%s8054_s4 + $0x30] sm:$0xfc]  ;;  %v2951_v60 = vmul.f32 %v8016_v3, %v5827_v11  ;;  %v2835_v28 = vld [vmem:[%s8054_s4 + $0x20] sm:$0x3]  ;;  %v2775_v55 = vmul.f32 %v8001_v19, %v2762_v7 }
 0x2a5   : >> { %v8068_v14 = vld [vmem:[%s8054_s4 + $0x40] sm:$0xff]  ;;  %v2846_v26 = vmul.f32 %v8006_v56, %v2834_v22  ;;  %v2799_v63 = vrot.slane %v8061_v29, 1  ;;  %v2872_v33 = vrot.slane %v8065_v21, 2  ;;  %v5818_v8 = vld [vmem:[%s8054_s4 + $0x30] sm:$0xff]  ;;  %v3023_v43 = vmul.f32 %v8021_v53, %v5836_v54 }
 0x2a6   : >> { %v8075_v35 = vmul.f32 %v8016_v3, %v8068_v14  ;;  %v8080_v47 = vmul.f32 %v8021_v53, %v8068_v14  ;;  %v2798_v52 = vrot.slane %v2773_v59, 1  ;;  %v5856_v49 = vld [vmem:[%s8054_s4 + $0x60] sm:$0xfe]  ;;  %v2923_v10 = vmul.f32 %v8011_v27, %v5818_v8  ;;  %v8094_v18 = vld [vmem:[%s8054_s4 + $0x70] sm:$0xff]  ;;  %v5857_v34 = vld [vmem:[%s8054_s4 + $0x80] sm:$0x1] }
 0x2a7   : >> { %v2871_v25 = vrot.slane %v2846_v26, 2  ;;  %v5865_v46 = vld [vmem:[%s8054_s4 + $0x60] sm:$0xfc]  ;;  %v2975_v13 = vrot.slane %v2951_v60, 1  ;;  %v3127_v16 = vmul.f32 %v8031_v36, %v5856_v49  ;;  %v3047_v58 = vrot.slane %v3023_v43, 2 }
 0x2a8   : >> { %v2976_v57 = vrot.slane %v8075_v35, 1  ;;  %v3048_v45 = vrot.slane %v8080_v47, 2  ;;  %v2800_v4 = vsel %vm1353_vm5, %v2798_v52, %v2799_v63  ;;  %v8099_v44 = vld [vmem:[%s8054_s4 + $0x60] sm:$0xff]  ;;  %v3128_v61 = vmul.f32 %v8031_v36, %v8094_v18  ;;  %v5828_v6 = vld [vmem:[%s8054_s4 + $0x50] sm:$0x1] }
 0x2a9   : >> { %v2826_v17 = vadd.f32 %v2800_v4, %v2745_v23  ;;  %v2873_v51 = vsel %vm1426_vm6, %v2871_v25, %v2872_v33  ;;  %v3099_v32 = vmul.f32 %v8026_v9, %v8099_v44  ;;  %v3151_v24 = vrot.slane %v3127_v16, 1  ;;  %v5837_v2 = vld [vmem:[%s8054_s4 + $0x50] sm:$0x3]  ;;  %v5866_v22 = vld [vmem:[%s8054_s4 + $0x80] sm:$0x3] }
 0x2aa   : >> { %v3199_v15 = vmul.f32 %v8036_v37, %v5865_v46  ;;  %v8110_v12 = vmul.f32 %v8036_v37, %v8094_v18  ;;  %v2977_v48 = vsel %vm1353_vm5, %v2975_v13, %v2976_v57  ;;  %v3049_v30 = vsel %vm1426_vm6, %v3047_v58, %v3048_v45  ;;  %v2836_v16 = vld [vmem:[%s8054_s4 + $0x30] sm:$0xfc] }
 0x2ab   : >> { %v2899_v62 = vadd.f32 %v2873_v51, %v2826_v17  ;;  %v3152_v5 = vrot.slane %v3128_v61, 1  ;;  %v2848_v50 = vmul.f32 %v8006_v56, %v2835_v28  ;;  %v2746_v59 = vmul.f32 %v7996_v0, %v2734_v41  ;;  %v2763_v41 = vld [vmem:[%s8054_s4 + $0x30] sm:$0xfe] }
 0x2ac   : >> { %v3223_v1 = vrot.slane %v3199_v15, 2  ;;  %v3224_v20 = vrot.slane %v8110_v12, 2  ;;  %v2953_v29 = vmul.f32 %v8016_v3, %v5828_v6  ;;  %v2801_v21 = vrot.slane %v2775_v55, 1 }
 0x2ad   : >> { %v2931_v40 = vadd.f32 %v2923_v10, %v2899_v62  ;;  %v3153_v42 = vsel %vm1353_vm5, %v3151_v24, %v3152_v5  ;;  %v2874_v23 = vrot.slane %v2848_v50, 2  ;;  %v2924_v26 = vmul.f32 %v8011_v27, %v8068_v14  ;;  %v5829_v24 = vld [vmem:[%s8054_s4 + $0x60] sm:$0xfe] }
 0x2ae   : >> { %v3025_v11 = vmul.f32 %v8021_v53, %v5837_v2  ;;  %v3225_v54 = vsel %vm1426_vm6, %v3223_v1, %v3224_v20  ;;  %v2978_v47 = vrot.slane %v2953_v29, 1  ;;  %v3129_v52 = vmul.f32 %v8031_v36, %v5857_v34  ;;  %v5838_v62 = vld [vmem:[%s8054_s4 + $0x60] sm:$0xfc] }
 0x2af   : >> { %v3003_v35 = vadd.f32 %v2977_v48, %v2931_v40  ;;  %v2802_v60 = vsel %vm1353_vm5, %v2799_v63, %v2801_v21  ;;  %v2875_v49 = vsel %vm1426_vm6, %v2872_v33, %v2874_v23  ;;  %v3201_v43 = vmul.f32 %v8036_v37, %v5866_v22 }
 0x2b0   : >> { %v3050_v25 = vrot.slane %v3025_v11, 2  ;;  %v2827_v4 = vadd.f32 %v2802_v60, %v2746_v59  ;;  %v3100_v10 = vmul.f32 %v8026_v9, %v8094_v18  ;;  %v3154_v13 = vrot.slane %v3129_v52, 1  ;;  %v5858_v59 = vld [vmem:[%s8054_s4 + $0x90] sm:$0xfe] }
 0x2b1   : >> { %v3075_v46 = vadd.f32 %v3049_v30, %v3003_v35  ;;  %v2979_v17 = vsel %vm1353_vm5, %v2976_v57, %v2978_v47  ;;  %v3226_v58 = vrot.slane %v3201_v43, 2  ;;  %v2776_v63 = vmul.f32 %v8001_v19, %v2763_v41  ;;  %v5867_v47 = vld [vmem:[%s8054_s4 + $0x90] sm:$0xfc] }
 0x2b2   : >> { %v3051_v51 = vsel %vm1426_vm6, %v3048_v45, %v3050_v25  ;;  %v2900_v61 = vadd.f32 %v2875_v49, %v2827_v4  ;;  %v2747_v7 = vmul.f32 %v5818_v8, %v7996_v0  ;;  %v8144_v28 = vmul.f32 %v8068_v14, %v8001_v19  ;;  %v8186_v49 = vld [vmem:[%s8054_s4 + $0xa0] sm:$0xff] }
 0x2b3   : >> { %v3107_v33 = vadd.f32 %v3099_v32, %v3075_v46  ;;  %v3155_v15 = vsel %vm1353_vm5, %v3152_v5, %v3154_v13  ;;  %v2803_v6 = vrot.slane %v2776_v63, 1  ;;  %v2849_v57 = vmul.f32 %v8006_v56, %v2836_v16 }
 0x2b4   : >> { %v8151_v45 = vmul.f32 %v8068_v14, %v8006_v56  ;;  %v2932_v48 = vadd.f32 %v2924_v26, %v2900_v61  ;;  %v2804_v8 = vrot.slane %v8144_v28, 1  ;;  %v2925_v30 = vmul.f32 %v8099_v44, %v8011_v27  ;;  %v8202_v61 = vld [vmem:[%s8054_s4 + $0x90] sm:$0xff] }
 0x2b5   : >> { %v3179_v32 = vadd.f32 %v3153_v42, %v3107_v33  ;;  %v2876_v2 = vrot.slane %v2849_v57, 2  ;;  %v2954_v1 = vmul.f32 %v8016_v3, %v5829_v24  ;;  %v8161_v55 = vmul.f32 %v8094_v18, %v8016_v3  ;;  %v5830_v24 = vld [vmem:[%s8054_s4 + $0x80] sm:$0x1] }
 0x2b6   : >> { %v2877_v5 = vrot.slane %v8151_v45, 2  ;;  %v3004_v34 = vadd.f32 %v2979_v17, %v2932_v48  ;;  %v2805_v40 = vsel %vm1353_vm5, %v2803_v6, %v2804_v8  ;;  %v3026_v42 = vmul.f32 %v8021_v53, %v5838_v62  ;;  %v5839_v48 = vld [vmem:[%s8054_s4 + $0x80] sm:$0x3] }
 0x2b7   : >> { %v3251_v50 = vadd.f32 %v3225_v54, %v3179_v32  ;;  %v2828_v29 = vadd.f32 %v2805_v40, %v2747_v7  ;;  %v2980_v21 = vrot.slane %v2954_v1, 1  ;;  %v2981_v23 = vrot.slane %v8161_v55, 1 }
 0x2b8   : >> { %v2878_v22 = vsel %vm1426_vm6, %v2876_v2, %v2877_v5  ;;  %v3076_v11 = vadd.f32 %v3051_v51, %v3004_v34  ;;  %v8176_v35 = vmul.f32 %v8094_v18, %v8021_v53  ;;  %v3052_v54 = vrot.slane %v3026_v42, 2  ;;  %v2764_v51 = vld [vmem:[%s8054_s4 + $0x50] sm:$0x1] }
 0x2b9   : >> { %v3265_v26 = vmul.f32 %v8041_v38, %v3251_v50  ;;  %v3227_v52 = vsel %vm1426_vm6, %v3224_v20, %v3226_v58  ;;  %v2901_v41 = vadd.f32 %v2878_v22, %v2828_v29  ;;  %v2982_v60 = vsel %vm1353_vm5, %v2980_v21, %v2981_v23  ;;  %v2837_v58 = vld [vmem:[%s8054_s4 + $0x50] sm:$0x3] }
 0x2ba   : >> { %v3130_v25 = vmul.f32 %v8031_v36, %v5858_v59  ;;  %v3108_v46 = vadd.f32 %v3100_v10, %v3076_v11  ;;  %v3053_v4 = vrot.slane %v8176_v35, 2  ;;  %v3131_v12 = vmul.f32 %v8031_v36, %v8186_v49  ;;  %v5859_v50 = vld [vmem:[%s8054_s4 + $0xb0] sm:$0x1] }
 0x2bb   : >> { %v3279_v43 = vadd.f32 %v8046_v39, %v3265_v26  ;;  %v2933_v20 = vadd.f32 %v2925_v30, %v2901_v41  ;;  %v3202_v16 = vmul.f32 %v8036_v37, %v5867_v47  ;;  %v8196_v17 = vmul.f32 %v8036_v37, %v8186_v49  ;;  %v5868_v47 = vld [vmem:[%s8054_s4 + $0xb0] sm:$0x3] }
 0x2bc   : >> { %v3156_v13 = vrot.slane %v3130_v25, 1  ;;  %v3180_v33 = vadd.f32 %v3155_v15, %v3108_v46  ;;  %v3054_v10 = vsel %vm1426_vm6, %v3052_v54, %v3053_v4  ;;  %v3157_v7 = vrot.slane %v3131_v12, 1 }
 0x2bd   : >> { %v3287_v63 = vmax.f32 %v3279_v43, 0.0  ;;  %v3005_v6 = vadd.f32 %v2982_v60, %v2933_v20  ;;  %v3101_v57 = vmul.f32 %v8026_v9, %v8202_v61  ;;  %v3228_v62 = vrot.slane %v3202_v16, 2  ;;  %v2765_v43 = vld [vmem:[%s8054_s4 + $0x60] sm:$0xfe] }
 0x2be   : >> { %v3229_v32 = vrot.slane %v8196_v17, 2  ;;  %v3252_v15 = vadd.f32 %v3227_v52, %v3180_v33  ;;  %v2748_v30 = vmul.f32 %v8068_v14, %v7996_v0  ;;  %v2778_v2 = vmul.f32 %v8001_v19, %v2764_v51  ;;  %v2838_v16 = vld [vmem:[%s8054_s4 + $0x60] sm:$0xfc] }
 0x2bf   : >> { %3298 = vst [vmem:[%s8211_s28] sm:$0xff] %v3287_v63  ;;  %v2851_v1 = vmul.f32 %v8006_v56, %v2837_v58  ;;  %v3077_v34 = vadd.f32 %v3054_v10, %v3005_v6  ;;  %v3158_v40 = vsel %vm1353_vm5, %v3156_v13, %v3157_v7  ;;  %v2956_v59 = vmul.f32 %v8016_v3, %v5830_v24  ;;  %v5831_v24 = vld [vmem:[%s8054_s4 + $0x90] sm:$0xfe] }
 0x2c0   : >> { %v3230_v42 = vsel %vm1426_vm6, %v3228_v62, %v3229_v32  ;;  %v3266_v29 = vmul.f32 %v8041_v38, %v3252_v15  ;;  %v2806_v22 = vrot.slane %v2778_v2, 1  ;;  %v3028_v21 = vmul.f32 %v8021_v53, %v5839_v48  ;;  %v5840_v48 = vld [vmem:[%s8054_s4 + $0x90] sm:$0xfc] }
 0x2c1   : >> { %v2879_v14 = vrot.slane %v2851_v1, 2  ;;  %v3109_v26 = vadd.f32 %v3101_v57, %v3077_v34  ;;  %v2926_v11 = vmul.f32 %v8094_v18, %v8011_v27  ;;  %v2983_v35 = vrot.slane %v2956_v59, 1 }
 0x2c2   : >> { %v3132_v54 = vmul.f32 %v8031_v36, %v5859_v50  ;;  %v3280_v52 = vadd.f32 %v8046_v39, %v3266_v29  ;;  %v2807_v41 = vsel %vm1353_vm5, %v2804_v8, %v2806_v22  ;;  %v3055_v25 = vrot.slane %v3028_v21, 2 }
 0x2c3   : >> { %v2880_v60 = vsel %vm1426_vm6, %v2877_v5, %v2879_v14  ;;  %v3181_v46 = vadd.f32 %v3158_v40, %v3109_v26  ;;  %v2829_v12 = vadd.f32 %v2807_v41, %v2748_v30  ;;  %v3102_v20 = vmul.f32 %v8026_v9, %v8186_v49  ;;  %v5860_v14 = vld [vmem:[%s8054_s4 + $0xc0] sm:$0xfe] }
 0x2c4   : >> { %v3159_v13 = vrot.slane %v3132_v54, 1  ;;  %v3288_v51 = vmax.f32 %v3280_v52, 0.0  ;;  %v2984_v28 = vsel %vm1353_vm5, %v2981_v23, %v2983_v35  ;;  %v3056_v45 = vsel %vm1426_vm6, %v3053_v4, %v3055_v25  ;;  %v5869_v54 = vld [vmem:[%s8054_s4 + $0xc0] sm:$0xfc]  ;;  %v8290_v25 = vld [vmem:[%s8054_s4 + $0xd0] sm:$0xff] }
 0x2c5   : >> { %v3204_v8 = vmul.f32 %v8036_v37, %v5868_v47  ;;  %v3253_v5 = vadd.f32 %v3230_v42, %v3181_v46  ;;  %v2902_v58 = vadd.f32 %v2880_v60, %v2829_v12  ;;  %v2749_v63 = vmul.f32 %v8099_v44, %v7996_v0  ;;  %v8294_v12 = vld [vmem:[%s8054_s4 + $0xc0] sm:$0xff] }
 0x2c6   : >> { %v2779_v33 = vmul.f32 %v8001_v19, %v2765_v43  ;;  %3299 = vst [vmem:[%s8211_s28 + $0x10] sm:$0xff] %v3288_v51  ;;  %v3160_v10 = vsel %vm1353_vm5, %v3157_v7, %v3159_v13  ;;  %v8253_v55 = vmul.f32 %v8094_v18, %v8001_v19  ;;  %v2852_v23 = vmul.f32 %v8006_v56, %v2838_v16 }
 0x2c7   : >> { %v8258_v4 = vmul.f32 %v8094_v18, %v8006_v56  ;;  %v3267_v6 = vmul.f32 %v8041_v38, %v3253_v5  ;;  %v2934_v57 = vadd.f32 %v2926_v11, %v2902_v58  ;;  %v3231_v44 = vrot.slane %v3204_v8, 2 }
 0x2c8   : >> { %v2808_v62 = vrot.slane %v2779_v33, 1  ;;  %v2809_v7 = vrot.slane %v8253_v55, 1  ;;  %v2881_v15 = vrot.slane %v2852_v23, 2  ;;  %v2927_v2 = vmul.f32 %v8202_v61, %v8011_v27  ;;  %v5832_v33 = vld [vmem:[%s8054_s4 + $0xb0] sm:$0x1] }
 0x2c9   : >> { %v2882_v30 = vrot.slane %v8258_v4, 2  ;;  %v3281_v1 = vadd.f32 %v8046_v39, %v3267_v6  ;;  %v3006_v50 = vadd.f32 %v2984_v28, %v2934_v57  ;;  %v2957_v34 = vmul.f32 %v8016_v3, %v5831_v24  ;;  %v5841_v57 = vld [vmem:[%s8054_s4 + $0xb0] sm:$0x3] }
 0x2ca   : >> { %v8271_v40 = vmul.f32 %v8186_v49, %v8016_v3  ;;  %v2810_v42 = vsel %vm1353_vm5, %v2808_v62, %v2809_v7  ;;  %v3029_v29 = vmul.f32 %v8021_v53, %v5840_v48  ;;  %v8280_v22 = vmul.f32 %v8186_v49, %v8021_v53 }
 0x2cb   : >> { %v2883_v59 = vsel %vm1426_vm6, %v2881_v15, %v2882_v30  ;;  %v3289_v21 = vmax.f32 %v3281_v1, 0.0  ;;  %v3078_v26 = vadd.f32 %v3056_v45, %v3006_v50  ;;  %v2830_v11 = vadd.f32 %v2810_v42, %v2749_v63  ;;  %v2839_v45 = vld [vmem:[%s8054_s4 + $0x80] sm:$0x3] }
 0x2cc   : >> { %v2985_v35 = vrot.slane %v2957_v34, 1  ;;  %v3232_v47 = vsel %vm1426_vm6, %v3229_v32, %v3231_v44  ;;  %v2986_v52 = vrot.slane %v8271_v40, 1  ;;  %v3057_v41 = vrot.slane %v3029_v29, 2  ;;  %v2766_v32 = vld [vmem:[%s8054_s4 + $0x80] sm:$0x1] }
 0x2cd   : >> { %v3058_v60 = vrot.slane %v8280_v22, 2  ;;  %3300 = vst [vmem:[%s8211_s28 + $0x20] sm:$0xff] %v3289_v21  ;;  %v3110_v43 = vadd.f32 %v3102_v20, %v3078_v26  ;;  %v2903_v46 = vadd.f32 %v2883_v59, %v2830_v11  ;;  %v3133_v13 = vmul.f32 %v8031_v36, %v5860_v14  ;;  %v5861_v15 = vld [vmem:[%s8054_s4 + $0xe0] sm:$0x1] }
 0x2ce   : >> { %v3134_v17 = vmul.f32 %v8031_v36, %v8290_v25  ;;  %v2987_v16 = vsel %vm1353_vm5, %v2985_v35, %v2986_v52  ;;  %v3103_v51 = vmul.f32 %v8026_v9, %v8294_v12  ;;  %v3205_v28 = vmul.f32 %v8036_v37, %v5869_v54  ;;  %v5870_v29 = vld [vmem:[%s8054_s4 + $0xe0] sm:$0x3] }
 0x2cf   : >> { %v8306_v20 = vmul.f32 %v8036_v37, %v8290_v25  ;;  %v3182_v8 = vadd.f32 %v3160_v10, %v3110_v43  ;;  %v2935_v5 = vadd.f32 %v2927_v2, %v2903_v46  ;;  %v3161_v58 = vrot.slane %v3133_v13, 1 }
 0x2d0   : >> { %v3162_v63 = vrot.slane %v3134_v17, 1  ;;  %v3059_v55 = vsel %vm1426_vm6, %v3057_v41, %v3058_v60  ;;  %v3233_v23 = vrot.slane %v3205_v28, 2  ;;  %v2781_v6 = vmul.f32 %v8001_v19, %v2766_v32  ;;  %v2767_v41 = vld [vmem:[%s8054_s4 + $0x90] sm:$0xfe] }
 0x2d1   : >> { %v3234_v24 = vrot.slane %v8306_v20, 2  ;;  %v3254_v44 = vadd.f32 %v3232_v47, %v3182_v8  ;;  %v3007_v62 = vadd.f32 %v2987_v16, %v2935_v5  ;;  %v2750_v48 = vmul.f32 %v8094_v18, %v7996_v0  ;;  %v2840_v17 = vld [vmem:[%s8054_s4 + $0x90] sm:$0xfc] }
 0x2d2   : >> { %v2854_v10 = vmul.f32 %v8006_v56, %v2839_v45  ;;  %v3163_v2 = vsel %vm1353_vm5, %v3161_v58, %v3162_v63  ;;  %v2811_v50 = vrot.slane %v2781_v6, 1  ;;  %v2959_v34 = vmul.f32 %v8016_v3, %v5832_v33 }
 0x2d3   : >> { %v3235_v1 = vsel %vm1426_vm6, %v3233_v23, %v3234_v24  ;;  %v3268_v40 = vmul.f32 %v8041_v38, %v3254_v44  ;;  %v3079_v42 = vadd.f32 %v3059_v55, %v3007_v62  ;;  %v3031_v18 = vmul.f32 %v8021_v53, %v5841_v57  ;;  %v5833_v23 = vld [vmem:[%s8054_s4 + $0xc0] sm:$0xfe] }
 0x2d4   : >> { %v2884_v59 = vrot.slane %v2854_v10, 2  ;;  %v2812_v22 = vsel %vm1353_vm5, %v2809_v7, %v2811_v50  ;;  %v2928_v14 = vmul.f32 %v8186_v49, %v8011_v27  ;;  %v2988_v21 = vrot.slane %v2959_v34, 1 }
 0x2d5   : >> { %v3135_v26 = vmul.f32 %v8031_v36, %v5861_v15  ;;  %v3282_v11 = vadd.f32 %v8046_v39, %v3268_v40  ;;  %v3111_v35 = vadd.f32 %v3103_v51, %v3079_v42  ;;  %v2831_v54 = vadd.f32 %v2812_v22, %v2750_v48  ;;  %v5862_v42 = vld [vmem:[%s8054_s4 + $0xf0] sm:$0xfe] }
 0x2d6   : >> { %v2885_v47 = vsel %vm1426_vm6, %v2882_v30, %v2884_v59  ;;  %v3060_v43 = vrot.slane %v3031_v18, 2  ;;  %v3104_v7 = vmul.f32 %v8026_v9, %v8290_v25  ;;  %v3207_v13 = vmul.f32 %v8036_v37, %v5870_v29 }
 0x2d7   : >> { %v3164_v46 = vrot.slane %v3135_v26, 1  ;;  %v3290_v32 = vmax.f32 %v3282_v11, 0.0  ;;  %v3183_v16 = vadd.f32 %v3163_v2, %v3111_v35  ;;  %v2904_v51 = vadd.f32 %v2885_v47, %v2831_v54  ;;  %v5853_v47 = vld [vmem:[%s8054_s4 + $0xf0] sm:$0xff] }
 0x2d8   : >> { %v2989_v28 = vsel %vm1353_vm5, %v2986_v52, %v2988_v21  ;;  %v3061_v4 = vsel %vm1426_vm6, %v3058_v60, %v3060_v43  ;;  %v2751_v45 = vmul.f32 %v8202_v61, %v7996_v0  ;;  %v2782_v8 = vmul.f32 %v8001_v19, %v2767_v41  ;;  %v5842_v52 = vld [vmem:[%s8054_s4 + $0xc0] sm:$0xfc]  ;;  %v5871_v21 = vld [vmem:[%s8054_s4 + $0xf0] sm:$0xfc] }
 0x2d9   : >> { %v3165_v30 = vsel %vm1353_vm5, %v3162_v63, %v3164_v46  ;;  %3301 = vst [vmem:[%s8211_s28 + $0x30] sm:$0xff] %v3290_v32  ;;  %v3255_v5 = vadd.f32 %v3235_v1, %v3183_v16  ;;  %v2936_v58 = vadd.f32 %v2928_v14, %v2904_v51  ;;  %v8348_v33 = vmul.f32 %v8186_v49, %v8001_v19  ;;  %v8378_v14 = vld [vmem:[%s8054_s4 + $0x100] sm:$0xff]  ;;  %v2841_v51 = vld [vmem:[%s8054_s4 + $0xb0] sm:$0x3] }
 0x2da   : >> { %v2855_v55 = vmul.f32 %v8006_v56, %v2840_v17  ;;  %v3236_v6 = vrot.slane %v3207_v13, 2  ;;  %v2813_v60 = vrot.slane %v2782_v8, 1  ;;  %v8355_v63 = vmul.f32 %v8186_v49, %v8006_v56  ;;  %v2768_v13 = vld [vmem:[%s8054_s4 + $0xb0] sm:$0x1] }
 0x2db   : >> { %v2929_v61 = vmul.f32 %v8294_v12, %v8011_v27  ;;  %v3269_v57 = vmul.f32 %v8041_v38, %v3255_v5  ;;  %v3008_v44 = vadd.f32 %v2989_v28, %v2936_v58  ;;  %v2814_v62 = vrot.slane %v8348_v33, 1  ;;  %v5843_v33 = vld [vmem:[%s8054_s4 + $0xe0] sm:$0x3] }
 0x2dc   : >> { %v2886_v48 = vrot.slane %v2855_v55, 2  ;;  %v2887_v10 = vrot.slane %v8355_v63, 2  ;;  %v2960_v15 = vmul.f32 %v8016_v3, %v5833_v23  ;;  %v8365_v2 = vmul.f32 %v8290_v25, %v8016_v3 }
 0x2dd   : >> { %v3032_v1 = vmul.f32 %v8021_v53, %v5842_v52  ;;  %v3283_v12 = vadd.f32 %v8046_v39, %v3269_v57  ;;  %v3080_v50 = vadd.f32 %v3061_v4, %v3008_v44  ;;  %v2815_v34 = vsel %vm1353_vm5, %v2813_v60, %v2814_v62 }
 0x2de   : >> { %v8372_v40 = vmul.f32 %v8290_v25, %v8021_v53  ;;  %v2832_v59 = vadd.f32 %v2815_v34, %v2751_v45  ;;  %v2888_v18 = vsel %vm1426_vm6, %v2886_v48, %v2887_v10  ;;  %v2990_v29 = vrot.slane %v2960_v15, 1  ;;  %v5834_v45 = vld [vmem:[%s8054_s4 + $0xe0] sm:$0x1] }
 0x2df   : >> { %v2991_v22 = vrot.slane %v8365_v2, 1  ;;  %v3291_v26 = vmax.f32 %v3283_v12, 0.0  ;;  %v3112_v11 = vadd.f32 %v3104_v7, %v3080_v50  ;;  %v3062_v35 = vrot.slane %v3032_v1, 2  ;;  %v5863_v2 = vld [vmem:[%s8054_s4 + $0x110] sm:$0x1] }
 0x2e0   : >> { %v3063_v54 = vrot.slane %v8372_v40, 2  ;;  %v3237_v41 = vsel %vm1426_vm6, %v3234_v24, %v3236_v6  ;;  %v2905_v43 = vadd.f32 %v2888_v18, %v2832_v59  ;;  %v3136_v46 = vmul.f32 %v8031_v36, %v5862_v42  ;;  %v5872_v18 = vld [vmem:[%s8054_s4 + $0x110] sm:$0x3] }
 0x2e1   : >> { %3302 = vst [vmem:[%s8211_s28 + $0x40] sm:$0xff] %v3291_v26  ;;  %v3184_v17 = vadd.f32 %v3165_v30, %v3112_v11  ;;  %v2992_v32 = vsel %vm1353_vm5, %v2990_v29, %v2991_v22  ;;  %v3137_v7 = vmul.f32 %v8031_v36, %v8378_v14  ;;  %v3208_v16 = vmul.f32 %v8036_v37, %v5871_v21 }
 0x2e2   : >> { %v2937_v28 = vadd.f32 %v2929_v61, %v2905_v43  ;;  %v3064_v20 = vsel %vm1426_vm6, %v3062_v35, %v3063_v54  ;;  %v3105_v24 = vmul.f32 %v8026_v9, %v5853_v47  ;;  %v3209_v4 = vmul.f32 %v8036_v37, %v8378_v14 }
 0x2e3   : >> { %v3256_v8 = vadd.f32 %v3237_v41, %v3184_v17  ;;  %v3166_v30 = vrot.slane %v3136_v46, 1  ;;  %v3167_v5 = vrot.slane %v3137_v7, 1  ;;  %v2784_v58 = vmul.f32 %v8001_v19, %v2768_v13 }
 0x2e4   : >> { %v3009_v55 = vadd.f32 %v2992_v32, %v2937_v28  ;;  %v3238_v23 = vrot.slane %v3208_v16, 2  ;;  %v2752_v52 = vmul.f32 %v8186_v49, %v7996_v0  ;;  %v2857_v6 = vmul.f32 %v8006_v56, %v2841_v51 }
 0x2e5   : >> { %v3270_v60 = vmul.f32 %v8041_v38, %v3256_v8  ;;  %v3239_v63 = vrot.slane %v3209_v4, 2  ;;  %v2816_v61 = vrot.slane %v2784_v58, 1  ;;  %v2962_v57 = vmul.f32 %v8016_v3, %v5834_v45 }
 0x2e6   : >> { %v3081_v44 = vadd.f32 %v3064_v20, %v3009_v55  ;;  %v2889_v48 = vrot.slane %v2857_v6, 2  ;;  %v3034_v15 = vmul.f32 %v8021_v53, %v5843_v33  ;;  %v3168_v12 = vsel %vm1353_vm5, %v3166_v30, %v3167_v5 }
 0x2e7   : >> { %v3284_v1 = vadd.f32 %v8046_v39, %v3270_v60  ;;  %v2817_v49 = vsel %vm1353_vm5, %v2814_v62, %v2816_v61  ;;  %v2993_v50 = vrot.slane %v2962_v57, 1  ;;  %v2930_v59 = vmul.f32 %v8290_v25, %v8011_v27 }
 0x2e8   : >> { %v3113_v34 = vadd.f32 %v3105_v24, %v3081_v44  ;;  %v2833_v40 = vadd.f32 %v2817_v49, %v2752_v52  ;;  %v2890_v42 = vsel %vm1426_vm6, %v2887_v10, %v2889_v48  ;;  %v3240_v21 = vsel %vm1426_vm6, %v3238_v23, %v3239_v63 }
 0x2e9   : >> { %v3292_v29 = vmax.f32 %v3284_v1, 0.0  ;;  %v3065_v26 = vrot.slane %v3034_v15, 2  ;;  %v3138_v11 = vmul.f32 %v8031_v36, %v5863_v2  ;;  %v2994_v62 = vsel %vm1353_vm5, %v2991_v22, %v2993_v50 }
 0x2ea   : >> { %v3185_v35 = vadd.f32 %v3168_v12, %v3113_v34  ;;  %v2906_v47 = vadd.f32 %v2890_v42, %v2833_v40  ;;  %v3210_v41 = vmul.f32 %v8036_v37, %v5872_v18  ;;  %v3106_v32 = vmul.f32 %v8026_v9, %v8378_v14  ;;  %v8437_v14 = vld [vmem:[%s10009_s14] sm:$0x3] (%p2725_p0) }
 0x2eb   : >> { %3303 = vst [vmem:[%s8211_s28 + $0x50] sm:$0xff] %v3292_v29  ;;  %v3066_v46 = vsel %vm1426_vm6, %v3063_v54, %v3065_v26  ;;  %v3169_v25 = vrot.slane %v3138_v11, 1 }
 0x2ec   : >> { %v3257_v43 = vadd.f32 %v3240_v21, %v3185_v35  ;;  %v2938_v10 = vadd.f32 %v2930_v59, %v2906_v47  ;;  %v3241_v7 = vrot.slane %v3210_v41, 2 }
 0x2ed   : >> { %v3170_v22 = vsel %vm1353_vm5, %v3167_v5, %v3169_v25  ;;  %v8442_v5 = vld [vmem:[%s10010_s15] sm:$0x3] (%p2725_p0) }
 0x2ee   : >> { %v3271_v13 = vmul.f32 %v8041_v38, %v3257_v43  ;;  %v3010_v17 = vadd.f32 %v2994_v62, %v2938_v10  ;;  %v3242_v24 = vsel %vm1426_vm6, %v3239_v63, %v3241_v7 }
 0x2f0   : >> { %v3285_v16 = vadd.f32 %v8046_v39, %v3271_v13  ;;  %v3082_v51 = vadd.f32 %v3066_v46, %v3010_v17 }
 0x2f2   : >> { %v3293_v28 = vmax.f32 %v3285_v16, 0.0  ;;  %v3114_v20 = vadd.f32 %v3106_v32, %v3082_v51 }
 0x2f4   : >> { %3304 = vst [vmem:[%s8211_s28 + $0x60] sm:$0xff] %v3293_v28  ;;  %v3186_v54 = vadd.f32 %v3170_v22, %v3114_v20 }
 0x2f6   : >> { %v3258_v4 = vadd.f32 %v3242_v24, %v3186_v54 }
 0x2f8   : >> { %v3272_v45 = vmul.f32 %v8041_v38, %v3258_v4 }
 0x2fa   : >> { %v3286_v8 = vadd.f32 %v8046_v39, %v3272_v45  ;;  %2727 = sbr.rel (!%p2725_p0) target bundleno = 668 (0x29c), region = 334 }
 0x2fc   : >> { %v3294_v30 = vmax.f32 %v3286_v8, 0.0 }
 0x2fe   : >> { %3305 = vst [vmem:[%s8211_s28 + $0x70] sm:$0xff] %v3294_v30 }
 0x2ff LB: >> { %v6307_v0 = vld [vmem:[%s10008_s13 + $0x74] ss:$8 sps:$4 sm:$0xff]   ;;  %v6309_v19 = vld [vmem:[%s10008_s13 + $0x70] ss:$8 sps:$4 sm:$0xff]   ;;  %v6507_v56 = vmov 0   ;;  %s6085_s27 = sshll.u32 %s6491_s29, 7  ;;  %s6491_s29 = sphi %s8444_s29, %s3313_s29  }
 0x300   : >> { %3458 = vmatprep.mubr.bf16.mxu0 %v6507_v56  ;;  %3478 = vmatprep.mubr.bf16.mxu1 %v6507_v56  ;;  %v6310_v27 = vld [vmem:[%s10008_s13 + $0x64] ss:$8 sps:$4 sm:$0xff]   ;;  %v6312_v3 = vld [vmem:[%s10008_s13 + $0x60] ss:$8 sps:$4 sm:$0xff]   ;;  %v6313_v53 = vld [vmem:[%s10008_s13 + $0x54] ss:$8 sps:$4 sm:$0xff]  }
 0x301   : >> { %3426 = vmatprep.subr.bf16.mxu0 %v6307_v0  ;;  %6179 = vmatprep.subr.bf16.mxu1 %v6307_v0  ;;  %v6315_v9 = vld [vmem:[%s10008_s13 + $0x50] ss:$8 sps:$4 sm:$0xff]   ;;  %v6316_v36 = vld [vmem:[%s10008_s13 + $0x44] ss:$8 sps:$4 sm:$0xff]   ;;  %v6318_v37 = vld [vmem:[%s10008_s13 + $0x40] ss:$8 sps:$4 sm:$0xff]  }
 0x302   : >> { %3427 = vmatpush1.bf16.msra.mxu0 %v6309_v19  ;;  %6187 = vmatpush1.bf16.msra.mxu1 %v6309_v19  ;;  %v6319_v38 = vld [vmem:[%s10008_s13 + $0x34] ss:$8 sps:$4 sm:$0xff]   ;;  %v6321_v39 = vld [vmem:[%s10008_s13 + $0x30] ss:$8 sps:$4 sm:$0xff]   ;;  %v6322_v58 = vld [vmem:[%s10008_s13 + $0x24] ss:$8 sps:$4 sm:$0xff]  }
 0x303   : >> { %3428 = vmatprep.subr.bf16.mxu0 %v6310_v27  ;;  %6180 = vmatprep.subr.bf16.mxu1 %v6310_v27  ;;  %v6324_v33 = vld [vmem:[%s10008_s13 + $0x20] ss:$8 sps:$4 sm:$0xff]   ;;  %v6325_v55 = vld [vmem:[%s10008_s13 + $0x14] ss:$8 sps:$4 sm:$0xff]   ;;  %v6327_v23 = vld [vmem:[%s10008_s13 + $0x10] ss:$8 sps:$4 sm:$0xff]  }
 0x304   : >> { %v6328_v52 = vld [vmem:[%s10008_s13 + $0x4] ss:$8 sps:$4 sm:$0xff]   ;;  %v6330_v6 = vld [vmem:[%s10008_s13] ss:$8 sps:$4 sm:$0xff]   ;;  %s3317_s0 = scalar_lea.vmem [#allocation4], %s6085_s27  ;;  %v3501_v34 = vshrl.u32 %v750_v31, 7 }
 0x305   : >> { %v3318_v60 = vld [vmem:[%s3317_s0] sm:$0xff]  ;;  %v3319_v63 = vld [vmem:[%s3317_s0 + $0x10] sm:$0xff] }
 0x306   : >> { %3429 = vmatpush1.bf16.msra.mxu0 %v6312_v3  ;;  %6188 = vmatpush1.bf16.msra.mxu1 %v6312_v3  ;;  %v3322_v61 = vld [vmem:[%s3317_s0 + $0x40] sm:$0xff]  ;;  %v3323_v57 = vld [vmem:[%s3317_s0 + $0x50] sm:$0xff]  ;;  %v3326_v44 = vpack.c.bf16 %v3319_v63, %v3318_v60  ;;  %v8499_v40 = vsub.s32 0, %v3501_v34  ;;  %v8501_v42 = vsub.s32 1, %v3501_v34 }
 0x307   : >> { %3430 = vmatprep.subr.bf16.mxu0 %v6313_v53  ;;  %6181 = vmatprep.subr.bf16.mxu1 %v6313_v53  ;;  %v3328_v48 = vpack.c.bf16 %v3323_v57, %v3322_v61  ;;  %v3320_v15 = vld [vmem:[%s3317_s0 + $0x20] sm:$0xff]  ;;  %v3321_v2 = vld [vmem:[%s3317_s0 + $0x30] sm:$0xff] }
 0x308   : >> { %v3324_v1 = vld [vmem:[%s3317_s0 + $0x60] sm:$0xff]  ;;  %v3325_v12 = vld [vmem:[%s3317_s0 + $0x70] sm:$0xff]  ;;  %v3327_v49 = vpack.c.bf16 %v3321_v2, %v3320_v15  ;;  %10144 = vst [vmem:[#allocation14_spill] sm:$0xff] %v8499_v40  ;;  %10145 = vst [vmem:[#allocation15_spill] sm:$0xff] %v8501_v42  ;;  %v8505_v59 = vrot.slane %v8437_v14, %v8499_v40  ;;  %v8509_v18 = vrot.slane %v8442_v5, %v8499_v40  ;;  %s5898_s0 = smul.u32 192, %s6491_s29  ;;  %s3313_s29 = sadd.s32 1, %s6491_s29  }
 0x309   : >> { %v3329_v50 = vpack.c.bf16 %v3325_v12, %v3324_v1  ;;  %v8513_v29 = vrot.slane %v8437_v14, %v8501_v42  ;;  %v8519_v47 = vrot.slane %v8442_v5, %v8501_v42  ;;  %p3310_p1 = scmp.ge.s32.totalorder %s3313_s29, 4  }
 0x30a   : >> { %3431 = vmatpush1.bf16.msra.mxu0 %v6315_v9  ;;  %6189 = vmatpush1.bf16.msra.mxu1 %v6315_v9  ;;  %s8534_s7 = scalar_lea.vmem [#allocation3], %s5898_s0  ;;  %v8612_v31 = vld [vmem:[%s10011_s16 + $0x9] ss:$4 sm:$0x3] (%p3310_p1)  ;;  %s8644_s24 = smov (%p3310_p1), 0  }
 0x30b   : >> { %3432 = vmatprep.subr.bf16.mxu0 %v6316_v36  ;;  %6182 = vmatprep.subr.bf16.mxu1 %v6316_v36  ;;  %10150 = vst [vmem:[#allocation20_spill] sm:$0xff] (%p3310_p1), %v8612_v31  ;;  %v8617_v14 = vld [vmem:[%s10011_s16 + $0xa] ss:$4 sm:$0x3] (%p3310_p1) }
 0x30c   : > { %10151 = vst [vmem:[#allocation21_spill] sm:$0xff] (%p3310_p1), %v8617_v14  ;;  %v8622_v5 = vld [vmem:[%s10011_s16 + $0x10] ss:$4 sm:$0x3] (%p3310_p1) }
 0x30d   : > { %10152 = vst [vmem:[#allocation22_spill] sm:$0xff] (%p3310_p1), %v8622_v5 }
 0x30e   : >> { %3433 = vmatpush1.bf16.msra.mxu0 %v6318_v37  ;;  %6190 = vmatpush1.bf16.msra.mxu1 %v6318_v37 }
 0x30f   : >> { %3434 = vmatprep.subr.bf16.mxu0 %v6319_v38  ;;  %6183 = vmatprep.subr.bf16.mxu1 %v6319_v38 }
 0x312   : >> { %3435 = vmatpush1.bf16.msra.mxu0 %v6321_v39  ;;  %6191 = vmatpush1.bf16.msra.mxu1 %v6321_v39 }
 0x313   : >> { %3436 = vmatprep.subr.bf16.mxu0 %v6322_v58  ;;  %6184 = vmatprep.subr.bf16.mxu1 %v6322_v58 }
 0x316   : >> { %3437 = vmatpush1.bf16.msra.mxu0 %v6324_v33  ;;  %6192 = vmatpush1.bf16.msra.mxu1 %v6324_v33 }
 0x317   : >> { %3438 = vmatprep.subr.bf16.mxu0 %v6325_v55  ;;  %6185 = vmatprep.subr.bf16.mxu1 %v6325_v55 }
 0x31a   : >> { %3439 = vmatpush1.bf16.msra.mxu0 %v6327_v23  ;;  %6193 = vmatpush1.bf16.msra.mxu1 %v6327_v23 }
 0x31b   : >> { %3440 = vmatprep.subr.bf16.mxu0 %v6328_v52  ;;  %6186 = vmatprep.subr.bf16.mxu1 %v6328_v52 }
 0x31e   : >> { %3441 = vmatpush1.bf16.msra.mxu0 %v6330_v6  ;;  %6194 = vmatpush1.bf16.msra.mxu1 %v6330_v6 }
 0x321   : >> { %3459 = vmatmul.mubr.bf16.vlgmr.msra.gmra.mxu0 %v3326_v44  ;;  %3479 = vmatmul.mubr.bf16.vlgmr.msra.gmra.mxu1 %v3328_v48 }
 0x322   : >> { %3468 = vmatprep.mubr.bf16.mxu0 %v6507_v56  ;;  %3488 = vmatprep.mubr.bf16.mxu1 %v6507_v56 }
 0x329   : >> { %3469 = vmatmul.mubr.bf16.gmra.mxu0 %v3327_v49  ;;  %3489 = vmatmul.mubr.bf16.gmra.mxu1 %v3329_v50 }
 0x3e1   : >> { %v3460_v21 = vpop.f32.mrf.mxu0  ;;  %v3480_v26 = vpop.f32.mrf.mxu1 }
 0x3e2   : >> { %v3510_v11 = vmul.f32 %v8505_v59, %v3460_v21  ;;  %v3518_v35 = vmul.f32 %v8505_v59, %v3480_v26 }
 0x3e3   : >> { %v3462_v62 = vpop.f32.mrf.mxu0  ;;  %v3482_v41 = vpop.f32.mrf.mxu1 }
 0x3e4   : >> { %v3537_v43 = vadd.f32 %v8509_v18, %v3510_v11  ;;  %v3545_v10 = vadd.f32 %v8509_v18, %v3518_v35  ;;  %v3511_v46 = vmul.f32 %v8513_v29, %v3462_v62  ;;  %v3519_v25 = vmul.f32 %v8513_v29, %v3482_v41 }
 0x3e5   : >> { %v3464_v13 = vpop.f32.mrf.mxu0  ;;  %v3484_v17 = vpop.f32.mrf.mxu1 }
 0x3e6   : >> { %v3553_v32 = vmax.f32 %v3537_v43, 0.0  ;;  %v3561_v7 = vmax.f32 %v3545_v10, 0.0  ;;  %v3538_v16 = vadd.f32 %v8519_v47, %v3511_v46  ;;  %v3546_v51 = vadd.f32 %v8519_v47, %v3519_v25 }
 0x3e7   : >> { %v3512_v22 = vmul.f32 %v8505_v59, %v3464_v13  ;;  %v3520_v28 = vmul.f32 %v8505_v59, %v3484_v17  ;;  %v3466_v20 = vpop.f32.mrf.mxu0  ;;  %v3486_v24 = vpop.f32.mrf.mxu1 }
 0x3e8   : >> { %v3586_v54 = vrot.slane %v3553_v32, 7  ;;  %v3598_v4 = vrot.slane %v3561_v7, 7  ;;  %v3554_v45 = vmax.f32 %v3538_v16, 0.0  ;;  %v3562_v8 = vmax.f32 %v3546_v51, 0.0 }
 0x3e9   : >> { %v3539_v30 = vadd.f32 %v8509_v18, %v3512_v22  ;;  %v3547_v0 = vadd.f32 %v8509_v18, %v3520_v28  ;;  %v3513_v19 = vmul.f32 %v8513_v29, %v3466_v20  ;;  %v3521_v56 = vmul.f32 %v8513_v29, %v3486_v24  ;;  %v3470_v27 = vpop.f32.mrf.mxu0  ;;  %v3490_v3 = vpop.f32.mrf.mxu1 }
 0x3ea   : >> { %5899 = vst [vmem:[%s8534_s7 + $0x30] sm:$0xfe] %v3586_v54  ;;  %5911 = vst [vmem:[%s8534_s7 + $0x90] sm:$0xfe] %v3598_v4  ;;  %v3587_v53 = vrot.slane %v3554_v45, 7  ;;  %v3599_v9 = vrot.slane %v3562_v8, 7  ;;  %v3514_v36 = vmul.f32 %v8505_v59, %v3470_v27  ;;  %v3522_v37 = vmul.f32 %v8505_v59, %v3490_v3 }
 0x3eb   : >> { %v3555_v38 = vmax.f32 %v3539_v30, 0.0  ;;  %v3563_v39 = vmax.f32 %v3547_v0, 0.0  ;;  %v3540_v58 = vadd.f32 %v8519_v47, %v3513_v19  ;;  %v3548_v33 = vadd.f32 %v8519_v47, %v3521_v56  ;;  %v3472_v55 = vpop.f32.mrf.mxu0  ;;  %v3492_v23 = vpop.f32.mrf.mxu1  ;;  %v8592_v3 = vld [vmem:[%s10011_s16] ss:$4 sm:$0x3] (%p3310_p1) }
 0x3ec   : >> { %5900 = vst [vmem:[%s8534_s7 + $0x38] sm:$0xfe] %v3587_v53  ;;  %5912 = vst [vmem:[%s8534_s7 + $0x98] sm:$0xfe] %v3599_v9  ;;  %v3541_v52 = vadd.f32 %v8509_v18, %v3514_v36  ;;  %v3549_v6 = vadd.f32 %v8509_v18, %v3522_v37  ;;  %v3515_v60 = vmul.f32 %v8513_v29, %v3472_v55 }
 0x3ed   : >> { %v3523_v63 = vmul.f32 %v8513_v29, %v3492_v23  ;;  %v3588_v61 = vrot.slane %v3555_v38, 7  ;;  %v3600_v57 = vrot.slane %v3563_v39, 7  ;;  %v3556_v44 = vmax.f32 %v3540_v58, 0.0  ;;  %v3474_v15 = vpop.f32.mrf.mxu0  ;;  %v3494_v2 = vpop.f32.mrf.mxu1  ;;  %10146 = vst [vmem:[#allocation16_spill] sm:$0xff] (%p3310_p1), %v8592_v3  ;;  %v8637_v39 = vld [vmem:[%s10012_s17] sm:$0x3] (%p3310_p1) }
 0x3ee   : >> { %v3564_v48 = vmax.f32 %v3548_v33, 0.0  ;;  %v3557_v1 = vmax.f32 %v3541_v52, 0.0  ;;  %v3565_v12 = vmax.f32 %v3549_v6, 0.0  ;;  %v3542_v49 = vadd.f32 %v8519_v47, %v3515_v60  ;;  %v8607_v36 = vld [vmem:[%s10011_s16 + $0x8] ss:$4 sm:$0x3] (%p3310_p1) }
 0x3ef   : >> { %v3550_v50 = vadd.f32 %v8519_v47, %v3523_v63  ;;  %v3589_v34 = vsel %vm1118_vm2, %v3586_v54, %v3588_v61  ;;  %5903 = vst [vmem:[%s8534_s7 + $0x50] sm:$0x1] %v3588_v61  ;;  %v3601_v21 = vsel %vm1118_vm2, %v3598_v4, %v3600_v57  ;;  %5915 = vst [vmem:[%s8534_s7 + $0xb0] sm:$0x1] %v3600_v57  ;;  %v3590_v26 = vrot.slane %v3556_v44, 7  ;;  %v3476_v35 = vpop.f32.mrf.mxu0  ;;  %v3496_v62 = vpop.f32.mrf.mxu1 }
 0x3f0   : >> { %v3602_v11 = vrot.slane %v3564_v48, 7  ;;  %5901 = vst [vmem:[%s8534_s7 + $0x40] sm:$0xff] %v3589_v34  ;;  %5913 = vst [vmem:[%s8534_s7 + $0xa0] sm:$0xff] %v3601_v21  ;;  %v3592_v41 = vrot.slane %v3557_v1, 7  ;;  %v3604_v43 = vrot.slane %v3565_v12, 7  ;;  %v3558_v10 = vmax.f32 %v3542_v49, 0.0 }
 0x3f1   : >> { %v3566_v46 = vmax.f32 %v3550_v50, 0.0  ;;  %v3591_v25 = vsel %vm1118_vm2, %v3587_v53, %v3590_v26  ;;  %5904 = vst [vmem:[%s8534_s7 + $0x58] sm:$0x1] %v3590_v26  ;;  %v3516_v17 = vmul.f32 %v8505_v59, %v3474_v15  ;;  %v3524_v32 = vmul.f32 %v8505_v59, %v3494_v2  ;;  %v8597_v53 = vld [vmem:[%s10011_s16 + $0x1] ss:$4 sm:$0x3] (%p3310_p1) }
 0x3f2   : >> { %v3603_v13 = vsel %vm1118_vm2, %v3599_v9, %v3602_v11  ;;  %5916 = vst [vmem:[%s8534_s7 + $0xb8] sm:$0x1] %v3602_v11  ;;  %5902 = vst [vmem:[%s8534_s7 + $0x48] sm:$0xff] %v3591_v25  ;;  %v3593_v7 = vrot.slane %v3558_v10, 7  ;;  %v3517_v51 = vmul.f32 %v8513_v29, %v3476_v35  ;;  %v3525_v22 = vmul.f32 %v8513_v29, %v3496_v62  ;;  %v8642_v58 = vld [vmem:[%s10013_s18] sm:$0x3] (%p3310_p1) }
 0x3f3   : >> { %5914 = vst [vmem:[%s8534_s7 + $0xa8] sm:$0xff] %v3603_v13  ;;  %5905 = vst [vmem:[%s8534_s7 + $0x60] sm:$0xfe] %v3592_v41  ;;  %v3605_v16 = vrot.slane %v3566_v46, 7  ;;  %v3543_v28 = vadd.f32 %v8509_v18, %v3516_v17  ;;  %v3551_v20 = vadd.f32 %v8509_v18, %v3524_v32 }
 0x3f4   : >> { %5917 = vst [vmem:[%s8534_s7 + $0xc0] sm:$0xfe] %v3604_v43  ;;  %5906 = vst [vmem:[%s8534_s7 + $0x68] sm:$0xfe] %v3593_v7  ;;  %v3544_v59 = vadd.f32 %v8519_v47, %v3517_v51  ;;  %v3552_v24 = vadd.f32 %v8519_v47, %v3525_v22 }
 0x3f5   : >> { %5918 = vst [vmem:[%s8534_s7 + $0xc8] sm:$0xfe] %v3605_v16  ;;  %v3559_v54 = vmax.f32 %v3543_v28, 0.0  ;;  %v3567_v4 = vmax.f32 %v3551_v20, 0.0  ;;  %10147 = vst [vmem:[#allocation17_spill] sm:$0xff] (%p3310_p1), %v8597_v53 }
 0x3f6   : >> { %v3560_v45 = vmax.f32 %v3544_v59, 0.0  ;;  %v3568_v29 = vmax.f32 %v3552_v24, 0.0  ;;  %v8602_v9 = vld [vmem:[%s10011_s16 + $0x2] ss:$4 sm:$0x3] (%p3310_p1)  ;;  %10149 = vst [vmem:[#allocation19_spill] sm:$0xff] (%p3310_p1), %v8607_v36 }
 0x3f7   : >> { %v3594_v8 = vrot.slane %v3559_v54, 7  ;;  %v3606_v30 = vrot.slane %v3567_v4, 7  ;;  %10148 = vst [vmem:[#allocation18_spill] sm:$0xff] (%p3310_p1), %v8602_v9  ;;  %v8627_v37 = vld [vmem:[%s10011_s16 + $0x11] ss:$4 sm:$0x3] (%p3310_p1) }
 0x3f8   : >> { %v3596_v18 = vrot.slane %v3560_v45, 7  ;;  %v3608_v0 = vrot.slane %v3568_v29, 7  ;;  %3312 = sbr.rel (!%p3310_p1) target bundleno = 767 (0x2ff), region = 345  ;;  %10153 = vst [vmem:[#allocation23_spill] sm:$0xff] (%p3310_p1), %v8627_v37  ;;  %10155 = vst [vmem:[#allocation25_spill] sm:$0xff] (%p3310_p1), %v8637_v39 }
 0x3f9   : >> { %v3595_v19 = vsel %vm1118_vm2, %v3592_v41, %v3594_v8  ;;  %5909 = vst [vmem:[%s8534_s7 + $0x80] sm:$0x1] %v3594_v8  ;;  %v3607_v56 = vsel %vm1118_vm2, %v3604_v43, %v3606_v30  ;;  %5921 = vst [vmem:[%s8534_s7 + $0xe0] sm:$0x1] %v3606_v30 }
 0x3fa   : >> { %5907 = vst [vmem:[%s8534_s7 + $0x70] sm:$0xff] %v3595_v19  ;;  %5919 = vst [vmem:[%s8534_s7 + $0xd0] sm:$0xff] %v3607_v56  ;;  %v3597_v47 = vsel %vm1118_vm2, %v3593_v7, %v3596_v18  ;;  %v3609_v27 = vsel %vm1118_vm2, %v3605_v16, %v3608_v0  ;;  %v8632_v38 = vld [vmem:[%s10011_s16 + $0x12] ss:$4 sm:$0x3] (%p3310_p1) }
 0x3fb   : >> { %5910 = vst [vmem:[%s8534_s7 + $0x88] sm:$0x1] %v3596_v18  ;;  %5922 = vst [vmem:[%s8534_s7 + $0xe8] sm:$0x1] %v3608_v0 }
 0x3fc   : >> { %5908 = vst [vmem:[%s8534_s7 + $0x78] sm:$0xff] %v3597_v47  ;;  %5920 = vst [vmem:[%s8534_s7 + $0xd8] sm:$0xff] %v3609_v27 }
 0x3fd   : > { %10154 = vst [vmem:[#allocation24_spill] sm:$0xff] %v8632_v38  ;;  %10156 = vst [vmem:[#allocation26_spill] sm:$0xff] %v8642_v58 }
 0x3fe LB: >> { %v10157_v40 = vld [vmem:[#allocation14_spill] sm:$0xff]  ;;  %v10158_v42 = vld [vmem:[#allocation15_spill] sm:$0xff]  ;;  %v10160_v53 = vld [vmem:[#allocation17_spill] sm:$0xff]  ;;  %s6086_s27 = smul.u32 192, %s6495_s24  ;;  %s6088_s2 = sshll.u32 %s6495_s24, 7  ;;  %s6495_s24 = sphi %s8644_s24, %s3685_s24  }
 0x3ff   : >> { %v10161_v39 = vld [vmem:[#allocation25_spill] sm:$0xff]  ;;  %v10163_v37 = vld [vmem:[#allocation23_spill] sm:$0xff]  ;;  %v10165_v31 = vld [vmem:[#allocation20_spill] sm:$0xff]  ;;  %v8655_v55 = vrot.slane %v10160_v53, %v10157_v40  ;;  %v8700_v2 = vrot.slane %v10160_v53, %v10158_v42  ;;  %s8945_s4 = scalar_lea.vmem [#allocation4], %s6088_s2  ;;  %s3685_s24 = sadd.s32 1, %s6495_s24  }
 0x400   : >> { %v10164_v36 = vld [vmem:[#allocation19_spill] sm:$0xff]  ;;  %v10166_v14 = vld [vmem:[#allocation21_spill] sm:$0xff]  ;;  %v10167_v9 = vld [vmem:[#allocation18_spill] sm:$0xff]  ;;  %v8667_v6 = vrot.slane %v10165_v31, %v10157_v40  ;;  %v8680_v61 = vrot.slane %v10163_v37, %v10157_v40  ;;  %v8688_v44 = vrot.slane %v10161_v39, %v10157_v40  ;;  %v8712_v49 = vrot.slane %v10165_v31, %v10158_v42  ;;  %s8722_s30 = scalar_lea.vmem [#allocation3], %s6086_s27  ;;  %p3682_p2 = scmp.ge.s32.totalorder %s3685_s24, 4  }
 0x401   : >> { %v10168_v5 = vld [vmem:[#allocation22_spill] sm:$0xff]  ;;  %v10169_v3 = vld [vmem:[#allocation16_spill] sm:$0xff]  ;;  %v8659_v23 = vrot.slane %v10167_v9, %v10157_v40  ;;  %v8663_v52 = vrot.slane %v10164_v36, %v10157_v40  ;;  %v8671_v60 = vrot.slane %v10166_v14, %v10157_v40  ;;  %v8704_v1 = vrot.slane %v10167_v9, %v10158_v42  ;;  %s9682_s0 = smov (%p3682_p2), 0  }
 0x402   : >> { %v8651_v33 = vrot.slane %v10169_v3, %v10157_v40  ;;  %v8676_v63 = vrot.slane %v10168_v5, %v10157_v40  ;;  %10171 = vst [vmem:[#allocation28_spill] sm:$0xff] %v8680_v61  ;;  %10173 = vst [vmem:[#allocation30_spill] sm:$0xff] %v8688_v44  ;;  %v8696_v15 = vrot.slane %v10169_v3, %v10158_v42 }
 0x403   : >> { %v8708_v12 = vrot.slane %v10164_v36, %v10158_v42  ;;  %v8716_v50 = vrot.slane %v10166_v14, %v10158_v42  ;;  %v8720_v34 = vrot.slane %v10168_v5, %v10158_v42  ;;  %v3690_v21 = vld [vmem:[%s8722_s30] sm:$0xff]  ;;  %v8726_v26 = vld [vmem:[%s8722_s30 + $0x10] sm:$0xff]  ;;  %v8731_v35 = vrot.slane %v10163_v37, %v10158_v42  ;;  %v5953_v14 = vld [vmem:[%s8722_s30 + $0x38] sm:$0xfe] }
 0x404   : >> { %v10159_v58 = vld [vmem:[#allocation26_spill] sm:$0xff]  ;;  %v10162_v38 = vld [vmem:[#allocation24_spill] sm:$0xff]  ;;  %10170 = vst [vmem:[#allocation27_spill] sm:$0xff] %v8676_v63  ;;  %v8739_v41 = vrot.slane %v10161_v39, %v10158_v42  ;;  %v3717_v10 = vmul.f32 %v8651_v33, %v3690_v21  ;;  %v8749_v25 = vmul.f32 %v8655_v55, %v8726_v26  ;;  %v8754_v17 = vmul.f32 %v8659_v23, %v8726_v26 }
 0x405   : >> { %v8684_v57 = vrot.slane %v10162_v38, %v10157_v40  ;;  %v8692_v48 = vrot.slane %v10159_v58, %v10157_v40  ;;  %v3749_v11 = vld [vmem:[%s8722_s30] sm:$0xfe]  ;;  %v8735_v62 = vrot.slane %v10162_v38, %v10158_v42  ;;  %v8743_v43 = vrot.slane %v10159_v58, %v10158_v42  ;;  %v8757_v32 = vld [vmem:[%s8722_s30 + $0x30] sm:$0xff]  ;;  %v8848_v36 = vld [vmem:[%s8722_s30 + $0x48] sm:$0xff] }
 0x406   : >> { %v3776_v46 = vmul.f32 %v8655_v55, %v3749_v11  ;;  %v3897_v13 = vld [vmem:[%s8722_s30] sm:$0xfc]  ;;  %10175 = vst [vmem:[#allocation32_spill] sm:$0xff] %v8757_v32  ;;  %v4076_v51 = vmul.f32 %v8757_v32, %v8663_v52  ;;  %v5952_v22 = vld [vmem:[%s8722_s30 + $0x30] sm:$0xfe]  ;;  %v10032_v54 = vrot.slane %v8749_v25, 1  ;;  %v4136_v37 = vmul.f32 %v5953_v14, %v8712_v49 }
 0x407   : >> { %10172 = vst [vmem:[#allocation29_spill] sm:$0xff] %v8684_v57  ;;  %10174 = vst [vmem:[#allocation31_spill] sm:$0xff] %v8692_v48  ;;  %v8760_v7 = vld [vmem:[%s8722_s30 + $0x40] sm:$0xff]  ;;  %v3924_v16 = vmul.f32 %v8659_v23, %v3897_v13  ;;  %v5968_v20 = vld [vmem:[%s8722_s30 + $0x30] sm:$0xfc]  ;;  %v10033_v4 = vrot.slane %v8754_v17, 2  ;;  %v4135_v45 = vmul.f32 %v5952_v22, %v8667_v6 }
 0x408   : >> { %v8768_v28 = vmul.f32 %v8760_v7, %v8667_v6  ;;  %v8773_v59 = vmul.f32 %v8760_v7, %v8671_v60  ;;  %v3825_v24 = vrot.slane %v3776_v46, 1  ;;  %v6002_v29 = vld [vmem:[%s8722_s30 + $0x60] sm:$0xfe]  ;;  %v4282_v18 = vmul.f32 %v5968_v20, %v8671_v60  ;;  %v8790_v21 = vld [vmem:[%s8722_s30 + $0x70] sm:$0xff]  ;;  %v3691_v13 = vld [vmem:[%s8722_s30 + $0x8] sm:$0xff] }
 0x409   : >> { %v3973_v8 = vrot.slane %v3924_v16, 2  ;;  %v8783_v19 = vld [vmem:[%s8722_s30 + $0x60] sm:$0xff]  ;;  %v4183_v27 = vrot.slane %v4135_v45, 1  ;;  %v4492_v46 = vmul.f32 %v6002_v29, %v8680_v61  ;;  %v8801_v0 = vmul.f32 %v8790_v21, %v8680_v61  ;;  %v3750_v45 = vld [vmem:[%s8722_s30 + $0x8] sm:$0xfe]  ;;  %v8874_v42 = vld [vmem:[%s8722_s30 + $0x78] sm:$0xff] }
 0x40a   : >> { %v10037_v30 = vrot.slane %v8768_v28, 1  ;;  %10176 = vst [vmem:[#allocation33_spill] sm:$0xff] %v8783_v19  ;;  %v6018_v56 = vld [vmem:[%s8722_s30 + $0x60] sm:$0xfc]  ;;  %v3827_v47 = vsel %vm1353_vm5, %v3825_v24, %v10032_v54  ;;  %v4433_v11 = vmul.f32 %v8783_v19, %v8676_v63  ;;  %v4330_v20 = vrot.slane %v4282_v18, 2  ;;  %v8804_v24 = vld [vmem:[%s8722_s30 + $0x18] sm:$0xff] }
 0x40b   : >> { %v3881_v16 = vadd.f32 %v3827_v47, %v3717_v10  ;;  %v3975_v22 = vsel %vm1426_vm6, %v3973_v8, %v10033_v4  ;;  %v4540_v29 = vrot.slane %v4492_v46, 1  ;;  %v4639_v10 = vmul.f32 %v6018_v56, %v8684_v57  ;;  %v3898_v18 = vld [vmem:[%s8722_s30 + $0x8] sm:$0xfc] }
 0x40c   : >> { %v4185_v54 = vsel %vm1353_vm5, %v4183_v27, %v10037_v30  ;;  %v8813_v8 = vmul.f32 %v8790_v21, %v8684_v57  ;;  %v10177_v4 = vrot.slane %v8773_v59, 2  ;;  %v10040_v5 = vrot.slane %v8801_v0, 1 }
 0x40d   : >> { %v4029_v47 = vadd.f32 %v3975_v22, %v3881_v16  ;;  %v3718_v9 = vmul.f32 %v8696_v15, %v3691_v13  ;;  %v4687_v27 = vrot.slane %v4639_v10, 2  ;;  %v3777_v56 = vmul.f32 %v8700_v2, %v3750_v45  ;;  %v5969_v45 = vld [vmem:[%s8722_s30 + $0x38] sm:$0xfc] }
 0x40e   : >> { %v4332_v3 = vsel %vm1426_vm6, %v4330_v20, %v10177_v4  ;;  %v10043_v46 = vrot.slane %v8813_v8, 2  ;;  %v8825_v30 = vmul.f32 %v8700_v2, %v8804_v24  ;;  %v4542_v4 = vsel %vm1353_vm5, %v4540_v29, %v10040_v5  ;;  %v8837_v20 = vld [vmem:[%s8722_s30 + $0x38] sm:$0xff] }
 0x40f   : >> { %v4092_v16 = vadd.f32 %v4076_v51, %v4029_v47  ;;  %v3925_v22 = vmul.f32 %v8704_v1, %v3898_v18  ;;  %v8834_v13 = vmul.f32 %v8704_v1, %v8804_v24  ;;  %10178 = vst [vmem:[#allocation34_spill] sm:$0xff] %v8837_v20  ;;  %v3828_v31 = vrot.slane %v3777_v56, 1 }
 0x410   : >> { %v4689_v10 = vsel %vm1426_vm6, %v4687_v27, %v10043_v46  ;;  %v10046_v51 = vrot.slane %v8825_v30, 1  ;;  %v4077_v29 = vmul.f32 %v8837_v20, %v8708_v12  ;;  %v8856_v56 = vmul.f32 %v8848_v36, %v8712_v49  ;;  %v5954_v20 = vld [vmem:[%s8722_s30 + $0x50] sm:$0x1] }
 0x411   : >> { %v4239_v18 = vadd.f32 %v4185_v54, %v4092_v16  ;;  %v3976_v47 = vrot.slane %v3925_v22, 2  ;;  %v4283_v46 = vmul.f32 %v5969_v45, %v8716_v50  ;;  %v8861_v54 = vmul.f32 %v8848_v36, %v8716_v50  ;;  %v6003_v16 = vld [vmem:[%s8722_s30 + $0x68] sm:$0xfe] }
 0x412   : >> { %v3830_v27 = vsel %vm1353_vm5, %v3828_v31, %v10046_v51  ;;  %v10179_v14 = vrot.slane %v8834_v13, 2  ;;  %v4186_v39 = vrot.slane %v4136_v37, 1  ;;  %v8868_v31 = vld [vmem:[%s8722_s30 + $0x68] sm:$0xff]  ;;  %v10058_v53 = vrot.slane %v8856_v56, 1 }
 0x413   : >> { %v4386_v22 = vadd.f32 %v4332_v3, %v4239_v18  ;;  %v3882_v5 = vadd.f32 %v3830_v27, %v3718_v9  ;;  %10180 = vst [vmem:[#allocation35_spill] sm:$0xff] %v8868_v31  ;;  %v6019_v51 = vld [vmem:[%s8722_s30 + $0x68] sm:$0xfc]  ;;  %v4333_v45 = vrot.slane %v4283_v46, 2  ;;  %v10059_v58 = vrot.slane %v8861_v54, 2 }
 0x414   : >> { %v3978_v38 = vsel %vm1426_vm6, %v3976_v47, %v10179_v14  ;;  %v4434_v3 = vmul.f32 %v8868_v31, %v8720_v34  ;;  %v4493_v47 = vmul.f32 %v6003_v16, %v8731_v35  ;;  %v8881_v37 = vmul.f32 %v8874_v42, %v8731_v35  ;;  %v3751_v27 = vld [vmem:[%s8722_s30 + $0x20] sm:$0x1] }
 0x415   : >> { %v4449_v9 = vadd.f32 %v4433_v11, %v4386_v22  ;;  %v4030_v18 = vadd.f32 %v3978_v38, %v3882_v5  ;;  %v4188_v46 = vsel %vm1353_vm5, %v4186_v39, %v10058_v53  ;;  %v4335_v14 = vsel %vm1426_vm6, %v4333_v45, %v10059_v58  ;;  %v3899_v38 = vld [vmem:[%s8722_s30 + $0x20] sm:$0x3]  ;;  %v5970_v58 = vld [vmem:[%s8722_s30 + $0x50] sm:$0x3] }
 0x416   : >> { %v4640_v40 = vmul.f32 %v6019_v51, %v8735_v62  ;;  %v8893_v5 = vmul.f32 %v8874_v42, %v8735_v62  ;;  %v4543_v22 = vrot.slane %v4493_v47, 1  ;;  %v10064_v31 = vrot.slane %v8881_v37, 1 }
 0x417   : >> { %v4596_v11 = vadd.f32 %v4542_v4, %v4449_v9  ;;  %v4093_v16 = vadd.f32 %v4077_v29, %v4030_v18  ;;  %v3719_v45 = vmul.f32 %v8651_v33, %v8726_v26  ;;  %v3780_v51 = vmul.f32 %v8655_v55, %v3751_v27  ;;  %v6004_v9 = vld [vmem:[%s8722_s30 + $0x80] sm:$0x1] }
 0x418   : >> { %v4690_v39 = vrot.slane %v4640_v40, 2  ;;  %v10063_v53 = vrot.slane %v8893_v5, 2  ;;  %v4545_v4 = vsel %vm1353_vm5, %v4543_v22, %v10064_v31  ;;  %v3928_v29 = vmul.f32 %v8659_v23, %v3899_v38 }
 0x419   : >> { %v4743_v19 = vadd.f32 %v4689_v10, %v4596_v11  ;;  %v4240_v32 = vadd.f32 %v4188_v46, %v4093_v16  ;;  %v3831_v18 = vrot.slane %v3780_v51, 1  ;;  %v4078_v26 = vmul.f32 %v8760_v7, %v8663_v52  ;;  %v6020_v11 = vld [vmem:[%s8722_s30 + $0x80] sm:$0x3] }
 0x41a   : >> { %v4692_v40 = vsel %vm1426_vm6, %v4690_v39, %v10063_v53  ;;  %v4139_v47 = vmul.f32 %v5954_v20, %v8667_v6  ;;  %v3979_v46 = vrot.slane %v3928_v29, 2  ;;  %v4286_v38 = vmul.f32 %v5970_v58, %v8671_v60  ;;  %v3752_v53 = vld [vmem:[%s8722_s30 + $0x28] sm:$0x1] }
 0x41b   : >> { %v4770_v10 = vmul.f32 %v8688_v44, %v4743_v19  ;;  %v4387_v27 = vadd.f32 %v4335_v14, %v4240_v32  ;;  %v10181_v16 = vrot.slane %v8749_v25, 1  ;;  %v4435_v51 = vmul.f32 %v8790_v21, %v8676_v63  ;;  %v3900_v63 = vld [vmem:[%s8722_s30 + $0x28] sm:$0x3] }
 0x41c   : >> { %v4189_v39 = vrot.slane %v4139_v47, 1  ;;  %v4496_v20 = vmul.f32 %v6004_v9, %v8680_v61  ;;  %v10182_v29 = vrot.slane %v8754_v17, 2  ;;  %v10183_v25 = vrot.slane %v8768_v28, 1  ;;  %v5955_v17 = vld [vmem:[%s8722_s30 + $0x58] sm:$0x1] }
 0x41d   : >> { %v3832_v22 = vsel %vm1353_vm5, %v10181_v16, %v3831_v18  ;;  %v4797_v19 = vadd.f32 %v8692_v48, %v4770_v10  ;;  %v4450_v32 = vadd.f32 %v4434_v3, %v4387_v27  ;;  %v4336_v47 = vrot.slane %v4286_v38, 2 }
 0x41e   : >> { %v3883_v14 = vadd.f32 %v3832_v22, %v3719_v45  ;;  %v3980_v58 = vsel %vm1426_vm6, %v10182_v29, %v3979_v46  ;;  %v4190_v18 = vsel %vm1353_vm5, %v10183_v25, %v4189_v39  ;;  %v4546_v16 = vrot.slane %v4496_v20, 1  ;;  %v5971_v45 = vld [vmem:[%s8722_s30 + $0x58] sm:$0x3]  ;;  %v6005_v20 = vld [vmem:[%s8722_s30 + $0x88] sm:$0x1] }
 0x41f   : >> { %v4643_v31 = vmul.f32 %v6020_v11, %v8684_v57  ;;  %v4813_v9 = vmax.f32 %v4797_v19, 0.0  ;;  %v4597_v61 = vadd.f32 %v4545_v4, %v4450_v32  ;;  %v3720_v3 = vmul.f32 %v8696_v15, %v8804_v24 }
 0x420   : >> { %v4031_v10 = vadd.f32 %v3980_v58, %v3883_v14  ;;  %v10184_v27 = vrot.slane %v8773_v59, 2  ;;  %v10185_v46 = vrot.slane %v8801_v0, 1  ;;  %v3781_v11 = vmul.f32 %v8700_v2, %v3752_v53 }
 0x421   : >> { %v4693_v22 = vrot.slane %v4643_v31, 2  ;;  %4832 = vst [vmem:[%s8945_s4] sm:$0xff] %v4813_v9  ;;  %v4744_v4 = vadd.f32 %v4692_v40, %v4597_v61  ;;  %v3929_v39 = vmul.f32 %v8704_v1, %v3900_v63  ;;  %v4079_v59 = vmul.f32 %v8848_v36, %v8708_v12 }
 0x422   : >> { %v4337_v28 = vsel %vm1426_vm6, %v10184_v27, %v4336_v47  ;;  %v4547_v38 = vsel %vm1353_vm5, %v10185_v46, %v4546_v16  ;;  %v4094_v24 = vadd.f32 %v4078_v26, %v4031_v10  ;;  %v10186_v0 = vrot.slane %v8813_v8, 2  ;;  %v6021_v26 = vld [vmem:[%s8722_s30 + $0x88] sm:$0x3] }
 0x423   : >> { %v3833_v31 = vrot.slane %v3781_v11, 1  ;;  %v4140_v53 = vmul.f32 %v5955_v17, %v8712_v49  ;;  %v4287_v32 = vmul.f32 %v5971_v45, %v8716_v50  ;;  %v4771_v14 = vmul.f32 %v8739_v41, %v4744_v4  ;;  %v3753_v45 = vld [vmem:[%s8722_s30 + $0x30] sm:$0xfe] }
 0x424   : >> { %v4694_v19 = vsel %vm1426_vm6, %v10186_v0, %v4693_v22  ;;  %v4241_v61 = vadd.f32 %v4190_v18, %v4094_v24  ;;  %v3981_v40 = vrot.slane %v3929_v39, 2  ;;  %v4436_v63 = vmul.f32 %v8874_v42, %v8720_v34  ;;  %v10191_v39 = vld [vmem:[#allocation32_spill] sm:$0xff] }
 0x425   : >> { %v10187_v29 = vrot.slane %v8825_v30, 1  ;;  %v4191_v58 = vrot.slane %v4140_v53, 1  ;;  %v4338_v25 = vrot.slane %v4287_v32, 2  ;;  %v4497_v47 = vmul.f32 %v6005_v20, %v8731_v35 }
 0x426   : >> { %v4798_v16 = vadd.f32 %v8743_v43, %v4771_v14  ;;  %v4388_v9 = vadd.f32 %v4337_v28, %v4241_v61  ;;  %v10188_v18 = vrot.slane %v8834_v13, 2  ;;  %v10189_v27 = vrot.slane %v8856_v56, 1 }
 0x427   : >> { %v3834_v8 = vsel %vm1353_vm5, %v10187_v29, %v3833_v31  ;;  %v10190_v46 = vrot.slane %v8861_v54, 2  ;;  %v4548_v11 = vrot.slane %v4497_v47, 1  ;;  %v4644_v4 = vmul.f32 %v6021_v26, %v8735_v62 }
 0x428   : >> { %v3884_v10 = vadd.f32 %v3834_v8, %v3720_v3  ;;  %v3982_v17 = vsel %vm1426_vm6, %v10188_v18, %v3981_v40  ;;  %v4192_v30 = vsel %vm1353_vm5, %v10189_v27, %v4191_v58  ;;  %v3901_v3 = vld [vmem:[%s8722_s30 + $0x30] sm:$0xfc]  ;;  %v4814_v28 = vmax.f32 %v4798_v16, 0.0  ;;  %v5956_v40 = vld [vmem:[%s8722_s30 + $0x60] sm:$0xfe] }
 0x429   : >> { %v4339_v22 = vsel %vm1426_vm6, %v10190_v46, %v4338_v25  ;;  %v4451_v13 = vadd.f32 %v4435_v51, %v4388_v9  ;;  %v3721_v20 = vmul.f32 %v10191_v39, %v8651_v33  ;;  %v10192_v56 = vrot.slane %v8881_v37, 1  ;;  %v5972_v37 = vld [vmem:[%s8722_s30 + $0x60] sm:$0xfc]  ;;  %v10194_v25 = vld [vmem:[#allocation33_spill] sm:$0xff]  ;;  %v6006_v46 = vld [vmem:[%s8722_s30 + $0x90] sm:$0xfe] }
 0x42a   : >> { %v4032_v24 = vadd.f32 %v3982_v17, %v3884_v10  ;;  %v4695_v31 = vrot.slane %v4644_v4, 2  ;;  %v3782_v54 = vmul.f32 %v8655_v55, %v3753_v45  ;;  %v8986_v53 = vmul.f32 %v8760_v7, %v8655_v55  ;;  %4833 = vst [vmem:[%s8945_s4 + $0x8] sm:$0xff] %v4814_v28 }
 0x42b   : >> { %v4549_v0 = vsel %vm1353_vm5, %v10192_v56, %v4548_v11  ;;  %v4598_v32 = vadd.f32 %v4547_v38, %v4451_v13  ;;  %v3930_v51 = vmul.f32 %v8659_v23, %v3901_v3  ;;  %v8992_v61 = vmul.f32 %v8760_v7, %v8659_v23  ;;  %v9023_v13 = vld [vmem:[%s8722_s30 + $0x90] sm:$0xff]  ;;  %v9028_v56 = vld [vmem:[%s8722_s30 + $0xa0] sm:$0xff] }
 0x42c   : >> { %v4095_v14 = vadd.f32 %v4079_v59, %v4032_v24  ;;  %v10193_v26 = vrot.slane %v8893_v5, 2  ;;  %v3835_v8 = vrot.slane %v3782_v54, 1  ;;  %v10077_v58 = vrot.slane %v8986_v53, 1  ;;  %v6022_v24 = vld [vmem:[%s8722_s30 + $0x90] sm:$0xfc] }
 0x42d   : >> { %v4080_v38 = vmul.f32 %v10194_v25, %v8663_v52  ;;  %v4745_v59 = vadd.f32 %v4694_v19, %v4598_v32  ;;  %v3983_v16 = vrot.slane %v3930_v51, 2  ;;  %v10076_v9 = vrot.slane %v8992_v61, 2  ;;  %v10196_v51 = vld [vmem:[#allocation28_spill] sm:$0xff] }
 0x42e   : >> { %v4696_v29 = vsel %vm1426_vm6, %v10193_v26, %v4695_v31  ;;  %v4242_v47 = vadd.f32 %v4192_v30, %v4095_v14  ;;  %v3837_v5 = vsel %vm1353_vm5, %v3835_v8, %v10077_v58  ;;  %v4141_v10 = vmul.f32 %v5956_v40, %v8667_v6  ;;  %v10195_v31 = vld [vmem:[#allocation27_spill] sm:$0xff]  ;;  %v5974_v58 = vld [vmem:[%s8722_s30 + $0x80] sm:$0x3] }
 0x42f   : >> { %v9009_v18 = vmul.f32 %v8790_v21, %v8667_v6  ;;  %v4288_v17 = vmul.f32 %v5972_v37, %v8671_v60  ;;  %v4772_v19 = vmul.f32 %v8688_v44, %v4745_v59  ;;  %v3885_v27 = vadd.f32 %v3837_v5, %v3721_v20 }
 0x430   : >> { %v4389_v45 = vadd.f32 %v4339_v22, %v4242_v47  ;;  %v3985_v30 = vsel %vm1426_vm6, %v3983_v16, %v10076_v9  ;;  %v4193_v11 = vrot.slane %v4141_v10, 1  ;;  %v9020_v3 = vmul.f32 %v8790_v21, %v8671_v60  ;;  %v3754_v47 = vld [vmem:[%s8722_s30 + $0x38] sm:$0xfe] }
 0x431   : >> { %v10073_v4 = vrot.slane %v9009_v18, 1  ;;  %v4340_v28 = vrot.slane %v4288_v17, 2  ;;  %v4799_v22 = vadd.f32 %v8692_v48, %v4772_v19  ;;  %v4033_v20 = vadd.f32 %v3985_v30, %v3885_v27  ;;  %v3902_v19 = vld [vmem:[%s8722_s30 + $0x38] sm:$0xfc]  ;;  %v10197_v27 = vld [vmem:[#allocation34_spill] sm:$0xff] }
 0x432   : >> { %v4452_v39 = vadd.f32 %v4436_v63, %v4389_v45  ;;  %v4437_v54 = vmul.f32 %v9023_v13, %v10195_v31  ;;  %v10072_v14 = vrot.slane %v9020_v3, 2  ;;  %v4498_v40 = vmul.f32 %v6006_v46, %v10196_v51 }
 0x433   : >> { %v4195_v32 = vsel %vm1353_vm5, %v4193_v11, %v10073_v4  ;;  %v9039_v37 = vmul.f32 %v9028_v56, %v10196_v51  ;;  %v4815_v63 = vmax.f32 %v4799_v22, 0.0  ;;  %v4096_v8 = vadd.f32 %v4080_v38, %v4033_v20  ;;  %v9100_v4 = vld [vmem:[%s8722_s30 + $0x98] sm:$0xff] }
 0x434   : >> { %v4599_v26 = vadd.f32 %v4549_v0, %v4452_v39  ;;  %v4645_v59 = vmul.f32 %v6022_v24, %v8684_v57  ;;  %v4342_v16 = vsel %vm1426_vm6, %v4340_v28, %v10072_v14  ;;  %v4550_v5 = vrot.slane %v4498_v40, 1  ;;  %v5973_v40 = vld [vmem:[%s8722_s30 + $0x68] sm:$0xfc]  ;;  %10199 = vst [vmem:[#allocation32_spill] sm:$0xff] %v9100_v4 }
 0x435   : >> { %v10070_v10 = vrot.slane %v9039_v37, 1  ;;  %v9049_v17 = vmul.f32 %v9028_v56, %v8684_v57  ;;  %4834 = vst [vmem:[%s8945_s4 + $0x10] sm:$0xff] %v4815_v63  ;;  %v4243_v38 = vadd.f32 %v4195_v32, %v4096_v8  ;;  %v3722_v30 = vmul.f32 %v10197_v27, %v8696_v15  ;;  %v5957_v32 = vld [vmem:[%s8722_s30 + $0x68] sm:$0xfe] }
 0x436   : >> { %v4746_v0 = vadd.f32 %v4696_v29, %v4599_v26  ;;  %v4697_v45 = vrot.slane %v4645_v59, 2  ;;  %v3783_v28 = vmul.f32 %v8700_v2, %v3754_v47  ;;  %v9062_v24 = vmul.f32 %v8848_v36, %v8700_v2  ;;  %v10198_v59 = vld [vmem:[#allocation35_spill] sm:$0xff] }
 0x437   : >> { %v4552_v46 = vsel %vm1353_vm5, %v4550_v5, %v10070_v10  ;;  %v10069_v11 = vrot.slane %v9049_v17, 2  ;;  %v4390_v29 = vadd.f32 %v4342_v16, %v4243_v38  ;;  %v3931_v39 = vmul.f32 %v8704_v1, %v3902_v19  ;;  %v6023_v10 = vld [vmem:[%s8722_s30 + $0x98] sm:$0xfc] }
 0x438   : >> { %v4773_v22 = vmul.f32 %v8739_v41, %v4746_v0  ;;  %v9068_v20 = vmul.f32 %v8848_v36, %v8704_v1  ;;  %v3838_v26 = vrot.slane %v3783_v28, 1  ;;  %v10071_v8 = vrot.slane %v9062_v24, 1 }
 0x439   : >> { %v4699_v63 = vsel %vm1426_vm6, %v4697_v45, %v10069_v11  ;;  %v4081_v47 = vmul.f32 %v10198_v59, %v8708_v12  ;;  %v4453_v5 = vadd.f32 %v4437_v54, %v4390_v29  ;;  %v3986_v19 = vrot.slane %v3931_v39, 2 }
 0x43a   : >> { %v4800_v16 = vadd.f32 %v8743_v43, %v4773_v22  ;;  %v10075_v0 = vrot.slane %v9068_v20, 2  ;;  %v3840_v38 = vsel %vm1353_vm5, %v3838_v26, %v10071_v8  ;;  %v4142_v45 = vmul.f32 %v5957_v32, %v8712_v49  ;;  %v6007_v22 = vld [vmem:[%s8722_s30 + $0x98] sm:$0xfe] }
 0x43b   : >> { %v9086_v27 = vmul.f32 %v8874_v42, %v8712_v49  ;;  %v4289_v28 = vmul.f32 %v5973_v40, %v8716_v50  ;;  %v4600_v29 = vadd.f32 %v4552_v46, %v4453_v5  ;;  %v3886_v39 = vadd.f32 %v3840_v38, %v3722_v30  ;;  %v9104_v40 = vld [vmem:[%s8722_s30 + $0xa8] sm:$0xff] }
 0x43c   : >> { %v4816_v54 = vmax.f32 %v4800_v16, 0.0  ;;  %v3988_v11 = vsel %vm1426_vm6, %v3986_v19, %v10075_v0  ;;  %v4196_v26 = vrot.slane %v4142_v45, 1  ;;  %v9097_v8 = vmul.f32 %v8874_v42, %v8716_v50 }
 0x43d   : >> { %v10074_v32 = vrot.slane %v9086_v27, 1  ;;  %v4343_v14 = vrot.slane %v4289_v28, 2  ;;  %v4747_v30 = vadd.f32 %v4699_v63, %v4600_v29  ;;  %v4034_v46 = vadd.f32 %v3988_v11, %v3886_v39  ;;  %v3755_v11 = vld [vmem:[%s8722_s30 + $0x50] sm:$0x1] }
 0x43e   : >> { %4835 = vst [vmem:[%s8945_s4 + $0x18] sm:$0xff] %v4816_v54  ;;  %v4438_v16 = vmul.f32 %v9100_v4, %v8720_v34  ;;  %v4499_v5 = vmul.f32 %v6007_v22, %v8731_v35  ;;  %v10080_v38 = vrot.slane %v9097_v8, 2  ;;  %v9115_v45 = vmul.f32 %v9104_v40, %v8731_v35  ;;  %v3903_v39 = vld [vmem:[%s8722_s30 + $0x50] sm:$0x3] }
 0x43f   : >> { %v4198_v19 = vsel %vm1353_vm5, %v4196_v26, %v10074_v32  ;;  %v4646_v63 = vmul.f32 %v6023_v10, %v8735_v62  ;;  %v4774_v28 = vmul.f32 %v8688_v44, %v4747_v30  ;;  %v4097_v54 = vadd.f32 %v4081_v47, %v4034_v46  ;;  %v5958_v26 = vld [vmem:[%s8722_s30 + $0x80] sm:$0x1] }
 0x440   : >> { %v4553_v29 = vrot.slane %v4499_v5, 1  ;;  %v9122_v22 = vmul.f32 %v9104_v40, %v8735_v62  ;;  %v4345_v32 = vsel %vm1426_vm6, %v4343_v14, %v10080_v38  ;;  %v10083_v10 = vrot.slane %v9115_v45, 1 }
 0x441   : >> { %v4700_v0 = vrot.slane %v4646_v63, 2  ;;  %v3723_v30 = vmul.f32 %v8760_v7, %v8651_v33  ;;  %v4801_v47 = vadd.f32 %v8692_v48, %v4774_v28  ;;  %v4244_v46 = vadd.f32 %v4198_v19, %v4097_v54  ;;  %v6008_v28 = vld [vmem:[%s8722_s30 + $0xb0] sm:$0x1] }
 0x442   : >> { %v10086_v5 = vrot.slane %v9122_v22, 2  ;;  %v3786_v9 = vmul.f32 %v8655_v55, %v3755_v11  ;;  %v4555_v4 = vsel %vm1353_vm5, %v4553_v29, %v10083_v10  ;;  %v3934_v14 = vmul.f32 %v8659_v23, %v3903_v39  ;;  %v6024_v19 = vld [vmem:[%s8722_s30 + $0xb0] sm:$0x3] }
 0x443   : >> { %v4082_v63 = vmul.f32 %v8790_v21, %v8663_v52  ;;  %v4145_v7 = vmul.f32 %v5958_v26, %v8667_v6  ;;  %v4817_v54 = vmax.f32 %v4801_v47, 0.0  ;;  %v4391_v38 = vadd.f32 %v4345_v32, %v4244_v46 }
 0x444   : >> { %v4702_v11 = vsel %vm1426_vm6, %v4700_v0, %v10086_v5  ;;  %v3841_v59 = vrot.slane %v3786_v9, 1  ;;  %v3989_v48 = vrot.slane %v3934_v14, 2  ;;  %v4292_v39 = vmul.f32 %v5974_v58, %v8671_v60  ;;  %v3756_v9 = vld [vmem:[%s8722_s30 + $0x58] sm:$0x1] }
 0x445   : >> { %v4199_v29 = vrot.slane %v4145_v7, 1  ;;  %v4439_v10 = vmul.f32 %v9028_v56, %v10195_v31  ;;  %4836 = vst [vmem:[%s8945_s4 + $0x20] sm:$0xff] %v4817_v54  ;;  %v4454_v26 = vadd.f32 %v4438_v16, %v4391_v38  ;;  %v10200_v44 = vrot.slane %v8986_v53, 1  ;;  %v3904_v0 = vld [vmem:[%s8722_s30 + $0x58] sm:$0x3] }
 0x446   : >> { %v4502_v32 = vmul.f32 %v6008_v28, %v10196_v51  ;;  %v4649_v46 = vmul.f32 %v6024_v19, %v8684_v57  ;;  %v10201_v58 = vrot.slane %v8992_v61, 2  ;;  %v10202_v54 = vrot.slane %v9009_v18, 1  ;;  %v5959_v19 = vld [vmem:[%s8722_s30 + $0x88] sm:$0x1] }
 0x447   : >> { %v3842_v47 = vsel %vm1353_vm5, %v10200_v44, %v3841_v59  ;;  %v4346_v53 = vrot.slane %v4292_v39, 2  ;;  %v4601_v38 = vadd.f32 %v4555_v4, %v4454_v26  ;;  %v3724_v28 = vmul.f32 %v8848_v36, %v8696_v15  ;;  %v5975_v18 = vld [vmem:[%s8722_s30 + $0x88] sm:$0x3] }
 0x448   : >> { %v3887_v14 = vadd.f32 %v3842_v47, %v3723_v30  ;;  %v3990_v7 = vsel %vm1426_vm6, %v10201_v58, %v3989_v48  ;;  %v4200_v16 = vsel %vm1353_vm5, %v10202_v54, %v4199_v29  ;;  %v4556_v44 = vrot.slane %v4502_v32, 1  ;;  %v6009_v29 = vld [vmem:[%s8722_s30 + $0xb8] sm:$0x1] }
 0x449   : >> { %v4703_v59 = vrot.slane %v4649_v46, 2  ;;  %v10203_v57 = vrot.slane %v9020_v3, 2  ;;  %v3787_v61 = vmul.f32 %v8700_v2, %v3756_v9  ;;  %v3935_v48 = vmul.f32 %v8704_v1, %v3904_v0 }
 0x44a   : >> { %v4035_v5 = vadd.f32 %v3990_v7, %v3887_v14  ;;  %v4748_v39 = vadd.f32 %v4702_v11, %v4601_v38  ;;  %v10204_v4 = vrot.slane %v9039_v37, 1  ;;  %v10205_v36 = vrot.slane %v9049_v17, 2  ;;  %v6025_v14 = vld [vmem:[%s8722_s30 + $0xb8] sm:$0x3] }
 0x44b   : >> { %v4347_v30 = vsel %vm1426_vm6, %v10203_v57, %v4346_v53  ;;  %v4083_v3 = vmul.f32 %v8874_v42, %v8708_v12  ;;  %v3843_v32 = vrot.slane %v3787_v61, 1  ;;  %v3991_v46 = vrot.slane %v3935_v48, 2  ;;  %v3757_v61 = vld [vmem:[%s8722_s30 + $0x60] sm:$0xfe] }
 0x44c   : >> { %v4557_v26 = vsel %vm1353_vm5, %v10204_v4, %v4556_v44  ;;  %v4704_v47 = vsel %vm1426_vm6, %v10205_v36, %v4703_v59  ;;  %v4098_v57 = vadd.f32 %v4082_v63, %v4035_v5  ;;  %v4146_v9 = vmul.f32 %v5959_v19, %v8712_v49 }
 0x44d   : >> { %v4775_v0 = vmul.f32 %v8739_v41, %v4748_v39  ;;  %v4293_v11 = vmul.f32 %v5975_v18, %v8716_v50  ;;  %v4440_v37 = vmul.f32 %v9104_v40, %v8720_v34  ;;  %v4503_v17 = vmul.f32 %v6009_v29, %v8731_v35  ;;  %v3905_v29 = vld [vmem:[%s8722_s30 + $0x60] sm:$0xfc] }
 0x44e   : >> { %v4245_v58 = vadd.f32 %v4200_v16, %v4098_v57  ;;  %v10206_v7 = vrot.slane %v9062_v24, 1  ;;  %v10207_v63 = vrot.slane %v9068_v20, 2  ;;  %v4201_v53 = vrot.slane %v4146_v9, 1 }
 0x44f   : >> { %v4802_v38 = vadd.f32 %v8743_v43, %v4775_v0  ;;  %v4348_v59 = vrot.slane %v4293_v11, 2  ;;  %v4558_v19 = vrot.slane %v4503_v17, 1  ;;  %v10208_v16 = vrot.slane %v9086_v27, 1 }
 0x450   : >> { %v3844_v5 = vsel %vm1353_vm5, %v10206_v7, %v3843_v32  ;;  %v3992_v54 = vsel %vm1426_vm6, %v10207_v63, %v3991_v46  ;;  %v4392_v48 = vadd.f32 %v4347_v30, %v4245_v58  ;;  %v4650_v18 = vmul.f32 %v6025_v14, %v8735_v62 }
 0x451   : >> { %v3888_v44 = vadd.f32 %v3844_v5, %v3724_v28  ;;  %v4202_v24 = vsel %vm1353_vm5, %v10208_v16, %v4201_v53  ;;  %v3725_v20 = vmul.f32 %v10194_v25, %v8651_v33  ;;  %v4818_v39 = vmax.f32 %v4802_v38, 0.0  ;;  %v5960_v25 = vld [vmem:[%s8722_s30 + $0x90] sm:$0xfe] }
 0x452   : >> { %v10209_v28 = vrot.slane %v9097_v8, 2  ;;  %v10210_v57 = vrot.slane %v9115_v45, 1  ;;  %v4455_v27 = vadd.f32 %v4439_v10, %v4392_v48  ;;  %v4705_v32 = vrot.slane %v4650_v18, 2  ;;  %v5976_v10 = vld [vmem:[%s8722_s30 + $0x90] sm:$0xfc] }
 0x453   : >> { %v4036_v4 = vadd.f32 %v3992_v54, %v3888_v44  ;;  %v3788_v46 = vmul.f32 %v8655_v55, %v3757_v61  ;;  %v9214_v9 = vmul.f32 %v8790_v21, %v8655_v55  ;;  %4837 = vst [vmem:[%s8945_s4 + $0x28] sm:$0xff] %v4818_v39  ;;  %v3936_v11 = vmul.f32 %v8659_v23, %v3905_v29 }
 0x454   : >> { %v4349_v36 = vsel %vm1426_vm6, %v10209_v28, %v4348_v59  ;;  %v4559_v30 = vsel %vm1353_vm5, %v10210_v57, %v4558_v19  ;;  %v9221_v8 = vmul.f32 %v8790_v21, %v8659_v23  ;;  %v4084_v45 = vmul.f32 %v9023_v13, %v8663_v52  ;;  %v6010_v59 = vld [vmem:[%s8722_s30 + $0xc0] sm:$0xfe]  ;;  %v9255_v57 = vld [vmem:[%s8722_s30 + $0xd0] sm:$0xff] }
 0x455   : >> { %v4099_v0 = vadd.f32 %v4083_v3, %v4036_v4  ;;  %v4602_v17 = vadd.f32 %v4557_v26, %v4455_v27  ;;  %v10211_v14 = vrot.slane %v9122_v22, 2  ;;  %v3845_v7 = vrot.slane %v3788_v46, 1  ;;  %v9251_v4 = vld [vmem:[%s8722_s30 + $0xc0] sm:$0xff]  ;;  %v10213_v46 = vld [vmem:[#allocation31_spill] sm:$0xff] }
 0x456   : >> { %v10097_v5 = vrot.slane %v9214_v9, 1  ;;  %v3993_v63 = vrot.slane %v3936_v11, 2  ;;  %v10096_v54 = vrot.slane %v9221_v8, 2  ;;  %v4147_v53 = vmul.f32 %v5960_v25, %v8667_v6  ;;  %v6026_v28 = vld [vmem:[%s8722_s30 + $0xc0] sm:$0xfc] }
 0x457   : >> { %v4706_v58 = vsel %vm1426_vm6, %v10211_v14, %v4705_v32  ;;  %v4246_v3 = vadd.f32 %v4202_v24, %v4099_v0  ;;  %v4749_v38 = vadd.f32 %v4704_v47, %v4602_v17  ;;  %v9237_v22 = vmul.f32 %v9028_v56, %v8667_v6  ;;  %v10212_v47 = vld [vmem:[#allocation30_spill] sm:$0xff] }
 0x458   : >> { %v3847_v26 = vsel %vm1353_vm5, %v3845_v7, %v10097_v5  ;;  %v4294_v44 = vmul.f32 %v5976_v10, %v8671_v60  ;;  %v3995_v48 = vsel %vm1426_vm6, %v3993_v63, %v10096_v54  ;;  %v4203_v16 = vrot.slane %v4147_v53, 1  ;;  %v10214_v7 = vld [vmem:[#allocation29_spill] sm:$0xff]  ;;  %v3758_v63 = vld [vmem:[%s8722_s30 + $0x68] sm:$0xfe]  ;;  %v5978_v5 = vld [vmem:[%s8722_s30 + $0xb0] sm:$0x3] }
 0x459   : >> { %v4393_v19 = vadd.f32 %v4349_v36, %v4246_v3  ;;  %v3889_v61 = vadd.f32 %v3847_v26, %v3725_v20  ;;  %v4776_v24 = vmul.f32 %v10212_v47, %v4749_v38  ;;  %v10093_v18 = vrot.slane %v9237_v22, 1 }
 0x45a   : >> { %v9248_v29 = vmul.f32 %v9028_v56, %v8671_v60  ;;  %v4350_v39 = vrot.slane %v4294_v44, 2  ;;  %v4441_v27 = vmul.f32 %v9251_v4, %v10195_v31  ;;  %v4504_v32 = vmul.f32 %v6010_v59, %v10196_v51  ;;  %v3906_v59 = vld [vmem:[%s8722_s30 + $0x68] sm:$0xfc] }
 0x45b   : >> { %v4456_v36 = vadd.f32 %v4440_v37, %v4393_v19  ;;  %v4037_v20 = vadd.f32 %v3995_v48, %v3889_v61  ;;  %v4803_v25 = vadd.f32 %v10213_v46, %v4776_v24  ;;  %v4205_v0 = vsel %vm1353_vm5, %v4203_v16, %v10093_v18  ;;  %v10215_v61 = vld [vmem:[#allocation35_spill] sm:$0xff] }
 0x45c   : >> { %v10092_v11 = vrot.slane %v9248_v29, 2  ;;  %v9267_v37 = vmul.f32 %v9255_v57, %v10196_v51  ;;  %v4560_v14 = vrot.slane %v4504_v32, 1  ;;  %v4651_v3 = vmul.f32 %v6026_v28, %v10214_v7  ;;  %v9328_v18 = vld [vmem:[%s8722_s30 + $0xc8] sm:$0xff] }
 0x45d   : >> { %v4603_v10 = vadd.f32 %v4559_v30, %v4456_v36  ;;  %v4100_v17 = vadd.f32 %v4084_v45, %v4037_v20  ;;  %v4819_v53 = vmax.f32 %v4803_v25, 0.0  ;;  %v9277_v44 = vmul.f32 %v9255_v57, %v10214_v7  ;;  %v5961_v25 = vld [vmem:[%s8722_s30 + $0x98] sm:$0xfe]  ;;  %10217 = vst [vmem:[#allocation33_spill] sm:$0xff] %v9328_v18 }
 0x45e   : >> { %v4352_v38 = vsel %vm1426_vm6, %v4350_v39, %v10092_v11  ;;  %v10090_v26 = vrot.slane %v9267_v37, 1  ;;  %v4707_v19 = vrot.slane %v4651_v3, 2  ;;  %v3726_v48 = vmul.f32 %v10215_v61, %v8696_v15  ;;  %v10216_v3 = vld [vmem:[#allocation32_spill] sm:$0xff] }
 0x45f   : >> { %v4750_v30 = vadd.f32 %v4706_v58, %v4603_v10  ;;  %v4247_v45 = vadd.f32 %v4205_v0, %v4100_v17  ;;  %4838 = vst [vmem:[%s8945_s4 + $0x30] sm:$0xff] %v4819_v53  ;;  %v10089_v24 = vrot.slane %v9277_v44, 2  ;;  %v3789_v39 = vmul.f32 %v8700_v2, %v3758_v63  ;;  %v5977_v0 = vld [vmem:[%s8722_s30 + $0x98] sm:$0xfc] }
 0x460   : >> { %v4562_v16 = vsel %vm1353_vm5, %v4560_v14, %v10090_v26  ;;  %v9290_v28 = vmul.f32 %v8874_v42, %v8700_v2  ;;  %v3937_v20 = vmul.f32 %v8704_v1, %v3906_v59  ;;  %v9296_v32 = vmul.f32 %v8874_v42, %v8704_v1  ;;  %v6027_v26 = vld [vmem:[%s8722_s30 + $0xc8] sm:$0xfc] }
 0x461   : >> { %v4777_v58 = vmul.f32 %v8739_v41, %v4750_v30  ;;  %v4394_v36 = vadd.f32 %v4352_v38, %v4247_v45  ;;  %v4709_v10 = vsel %vm1426_vm6, %v4707_v19, %v10089_v24  ;;  %v3848_v17 = vrot.slane %v3789_v39, 1 }
 0x462   : >> { %v10091_v14 = vrot.slane %v9290_v28, 1  ;;  %v4085_v63 = vmul.f32 %v10216_v3, %v8708_v12  ;;  %v3996_v59 = vrot.slane %v3937_v20, 2  ;;  %v10095_v30 = vrot.slane %v9296_v32, 2 }
 0x463   : >> { %v4804_v53 = vadd.f32 %v8743_v43, %v4777_v58  ;;  %v4457_v38 = vadd.f32 %v4441_v27, %v4394_v36  ;;  %v4148_v19 = vmul.f32 %v5961_v25, %v8712_v49  ;;  %v9314_v61 = vmul.f32 %v9104_v40, %v8712_v49  ;;  %v6011_v58 = vld [vmem:[%s8722_s30 + $0xc8] sm:$0xfe] }
 0x464   : >> { %v3850_v45 = vsel %vm1353_vm5, %v3848_v17, %v10091_v14  ;;  %v4295_v39 = vmul.f32 %v5977_v0, %v8716_v50  ;;  %v3998_v24 = vsel %vm1426_vm6, %v3996_v59, %v10095_v30  ;;  %v9325_v14 = vmul.f32 %v9104_v40, %v8716_v50  ;;  %v9332_v0 = vld [vmem:[%s8722_s30 + $0xd8] sm:$0xff] }
 0x465   : >> { %v4820_v27 = vmax.f32 %v4804_v53, 0.0  ;;  %v4604_v36 = vadd.f32 %v4562_v16, %v4457_v38  ;;  %v3890_v20 = vadd.f32 %v3850_v45, %v3726_v48  ;;  %v4206_v17 = vrot.slane %v4148_v19, 1 }
 0x466   : >> { %v10094_v25 = vrot.slane %v9314_v61, 1  ;;  %v4353_v11 = vrot.slane %v4295_v39, 2  ;;  %v4442_v53 = vmul.f32 %v9328_v18, %v8720_v34  ;;  %v4505_v38 = vmul.f32 %v6011_v58, %v8731_v35 }
 0x467   : >> { %4839 = vst [vmem:[%s8945_s4 + $0x38] sm:$0xff] %v4820_v27  ;;  %v4751_v48 = vadd.f32 %v4709_v10, %v4604_v36  ;;  %v4038_v16 = vadd.f32 %v3998_v24, %v3890_v20  ;;  %v10099_v45 = vrot.slane %v9325_v14, 2  ;;  %v9343_v19 = vmul.f32 %v9332_v0, %v8731_v35  ;;  %v3759_v24 = vld [vmem:[%s8722_s30 + $0x80] sm:$0x1] }
 0x468   : >> { %v4208_v59 = vsel %vm1353_vm5, %v4206_v17, %v10094_v25  ;;  %v4652_v10 = vmul.f32 %v6027_v26, %v8735_v62  ;;  %v4563_v36 = vrot.slane %v4505_v38, 1  ;;  %v9350_v58 = vmul.f32 %v9332_v0, %v8735_v62  ;;  %v3907_v20 = vld [vmem:[%s8722_s30 + $0x80] sm:$0x3]  ;;  %v5962_v17 = vld [vmem:[%s8722_s30 + $0xb0] sm:$0x1] }
 0x469   : >> { %v4778_v39 = vmul.f32 %v10212_v47, %v4751_v48  ;;  %v4101_v27 = vadd.f32 %v4085_v63, %v4038_v16  ;;  %v4355_v25 = vsel %vm1426_vm6, %v4353_v11, %v10099_v45  ;;  %v10101_v26 = vrot.slane %v9343_v19, 1 }
 0x46a   : >> { %v4710_v30 = vrot.slane %v4652_v10, 2  ;;  %v3727_v48 = vmul.f32 %v8790_v21, %v8651_v33  ;;  %v10103_v38 = vrot.slane %v9350_v58, 2  ;;  %v3792_v54 = vmul.f32 %v8655_v55, %v3759_v24 }
 0x46b   : >> { %v4805_v63 = vadd.f32 %v10213_v46, %v4778_v39  ;;  %v4248_v16 = vadd.f32 %v4208_v59, %v4101_v27  ;;  %v4565_v18 = vsel %vm1353_vm5, %v4563_v36, %v10101_v26  ;;  %v3940_v11 = vmul.f32 %v8659_v23, %v3907_v20  ;;  %v6012_v39 = vld [vmem:[%s8722_s30 + $0xe0] sm:$0x1] }
 0x46c   : >> { %v4086_v10 = vmul.f32 %v9028_v56, %v8663_v52  ;;  %v4151_v21 = vmul.f32 %v5962_v17, %v8667_v6  ;;  %v6028_v59 = vld [vmem:[%s8722_s30 + $0xe0] sm:$0x3]  ;;  %v4712_v24 = vsel %vm1426_vm6, %v4710_v30, %v10103_v38  ;;  %v3851_v3 = vrot.slane %v3792_v54, 1  ;;  %v3760_v54 = vld [vmem:[%s8722_s30 + $0x88] sm:$0x1] }
 0x46d   : >> { %v4821_v27 = vmax.f32 %v4805_v63, 0.0  ;;  %v4395_v45 = vadd.f32 %v4355_v25, %v4248_v16  ;;  %v3999_v46 = vrot.slane %v3940_v11, 2  ;;  %v4298_v20 = vmul.f32 %v5978_v5, %v8671_v60  ;;  %v3908_v30 = vld [vmem:[%s8722_s30 + $0x88] sm:$0x3] }
 0x46e   : >> { %v4209_v36 = vrot.slane %v4151_v21, 1  ;;  %v4443_v26 = vmul.f32 %v9255_v57, %v10195_v31  ;;  %v10218_v47 = vrot.slane %v9214_v9, 1  ;;  %v4508_v25 = vmul.f32 %v6012_v39, %v10196_v51 }
 0x46f   : >> { %4840 = vst [vmem:[%s8945_s4 + $0x40] sm:$0xff] %v4821_v27  ;;  %v4458_v17 = vadd.f32 %v4442_v53, %v4395_v45  ;;  %v4655_v16 = vmul.f32 %v6028_v59, %v10214_v7  ;;  %v10219_v5 = vrot.slane %v9221_v8, 2  ;;  %v10220_v27 = vrot.slane %v9237_v22, 1  ;;  %v5963_v59 = vld [vmem:[%s8722_s30 + $0xb8] sm:$0x1] }
 0x470   : >> { %v3852_v63 = vsel %vm1353_vm5, %v10218_v47, %v3851_v3  ;;  %v4356_v9 = vrot.slane %v4298_v20, 2  ;;  %v4566_v47 = vrot.slane %v4508_v25, 1  ;;  %v3728_v39 = vmul.f32 %v8874_v42, %v8696_v15 }
 0x471   : >> { %v3891_v11 = vadd.f32 %v3852_v63, %v3727_v48  ;;  %v4000_v21 = vsel %vm1426_vm6, %v10219_v5, %v3999_v46  ;;  %v4210_v53 = vsel %vm1353_vm5, %v10220_v27, %v4209_v36  ;;  %v4605_v45 = vadd.f32 %v4565_v18, %v4458_v17  ;;  %v5979_v46 = vld [vmem:[%s8722_s30 + $0xb8] sm:$0x3]  ;;  %v6013_v36 = vld [vmem:[%s8722_s30 + $0xe8] sm:$0x1] }
 0x472   : >> { %v4713_v3 = vrot.slane %v4655_v16, 2  ;;  %v10221_v7 = vrot.slane %v9248_v29, 2  ;;  %v3793_v8 = vmul.f32 %v8700_v2, %v3760_v54  ;;  %v3941_v22 = vmul.f32 %v8704_v1, %v3908_v30 }
 0x473   : >> { %v4039_v38 = vadd.f32 %v4000_v21, %v3891_v11  ;;  %v4752_v20 = vadd.f32 %v4712_v24, %v4605_v45  ;;  %v10222_v18 = vrot.slane %v9267_v37, 1  ;;  %v10223_v42 = vrot.slane %v9277_v44, 2  ;;  %v6029_v11 = vld [vmem:[%s8722_s30 + $0xe8] sm:$0x3] }
 0x474   : >> { %v4357_v48 = vsel %vm1426_vm6, %v10221_v7, %v4356_v9  ;;  %v4087_v29 = vmul.f32 %v9104_v40, %v8708_v12  ;;  %v3853_v25 = vrot.slane %v3793_v8, 1  ;;  %v4001_v16 = vrot.slane %v3941_v22, 2  ;;  %v3761_v8 = vld [vmem:[%s8722_s30 + $0x90] sm:$0xfe] }
 0x475   : >> { %v4567_v17 = vsel %vm1353_vm5, %v10222_v18, %v4566_v47  ;;  %v4714_v63 = vsel %vm1426_vm6, %v10223_v42, %v4713_v3  ;;  %v4102_v7 = vadd.f32 %v4086_v10, %v4039_v38  ;;  %v4152_v54 = vmul.f32 %v5963_v59, %v8712_v49 }
 0x476   : >> { %v4779_v30 = vmul.f32 %v8739_v41, %v4752_v20  ;;  %v4299_v24 = vmul.f32 %v5979_v46, %v8716_v50  ;;  %v4444_v37 = vmul.f32 %v9332_v0, %v8720_v34  ;;  %v4509_v44 = vmul.f32 %v6013_v36, %v8731_v35  ;;  %v3909_v36 = vld [vmem:[%s8722_s30 + $0x90] sm:$0xfc] }
 0x477   : >> { %v4249_v5 = vadd.f32 %v4210_v53, %v4102_v7  ;;  %v10224_v21 = vrot.slane %v9290_v28, 1  ;;  %v10225_v10 = vrot.slane %v9296_v32, 2  ;;  %v4211_v9 = vrot.slane %v4152_v54, 1 }
 0x478   : >> { %v4806_v45 = vadd.f32 %v8743_v43, %v4779_v30  ;;  %v4358_v3 = vrot.slane %v4299_v24, 2  ;;  %v4568_v59 = vrot.slane %v4509_v44, 1  ;;  %v10226_v53 = vrot.slane %v9314_v61, 1 }
 0x479   : >> { %v3854_v38 = vsel %vm1353_vm5, %v10224_v21, %v3853_v25  ;;  %v4002_v27 = vsel %vm1426_vm6, %v10225_v10, %v4001_v16  ;;  %v4396_v22 = vadd.f32 %v4357_v48, %v4249_v5  ;;  %v4656_v46 = vmul.f32 %v6029_v11, %v8735_v62 }
 0x47a   : >> { %v3892_v47 = vadd.f32 %v3854_v38, %v3728_v39  ;;  %v4212_v28 = vsel %vm1353_vm5, %v10226_v53, %v4211_v9  ;;  %v3729_v32 = vmul.f32 %v9023_v13, %v8651_v33  ;;  %v4822_v20 = vmax.f32 %v4806_v45, 0.0  ;;  %v5964_v13 = vld [vmem:[%s8722_s30 + $0xc0] sm:$0xfe] }
 0x47b   : >> { %v10227_v39 = vrot.slane %v9325_v14, 2  ;;  %v10228_v7 = vrot.slane %v9343_v19, 1  ;;  %v4459_v61 = vadd.f32 %v4443_v26, %v4396_v22  ;;  %v4715_v25 = vrot.slane %v4656_v46, 2  ;;  %v5980_v26 = vld [vmem:[%s8722_s30 + $0xc0] sm:$0xfc] }
 0x47c   : >> { %v4040_v18 = vadd.f32 %v4002_v27, %v3892_v47  ;;  %v3794_v16 = vmul.f32 %v8655_v55, %v3761_v8  ;;  %v9442_v54 = vmul.f32 %v9028_v56, %v8655_v55  ;;  %4841 = vst [vmem:[%s8945_s4 + $0x48] sm:$0xff] %v4822_v20  ;;  %v3942_v24 = vmul.f32 %v8659_v23, %v3909_v36  ;;  %v5998_v47 = vld [vmem:[%s8722_s30 + $0xf0] sm:$0xff] }
 0x47d   : >> { %v4359_v42 = vsel %vm1426_vm6, %v10227_v39, %v4358_v3  ;;  %v4569_v48 = vsel %vm1353_vm5, %v10228_v7, %v4568_v59  ;;  %v9449_v14 = vmul.f32 %v9028_v56, %v8659_v23  ;;  %v4088_v19 = vmul.f32 %v9251_v4, %v8663_v52  ;;  %v6014_v3 = vld [vmem:[%s8722_s30 + $0xf0] sm:$0xfe] }
 0x47e   : >> { %v4103_v30 = vadd.f32 %v4087_v29, %v4040_v18  ;;  %v4606_v44 = vadd.f32 %v4567_v17, %v4459_v61  ;;  %v10229_v11 = vrot.slane %v9350_v58, 2  ;;  %v3855_v21 = vrot.slane %v3794_v16, 1  ;;  %v6030_v39 = vld [vmem:[%s8722_s30 + $0xf0] sm:$0xfc] }
 0x47f   : >> { %v3856_v29 = vrot.slane %v9442_v54, 1  ;;  %v4003_v10 = vrot.slane %v3942_v24, 2  ;;  %v4004_v27 = vrot.slane %v9449_v14, 2  ;;  %v4153_v9 = vmul.f32 %v5964_v13, %v8667_v6 }
 0x480   : >> { %v4716_v5 = vsel %vm1426_vm6, %v10229_v11, %v4715_v25  ;;  %v4250_v38 = vadd.f32 %v4212_v28, %v4103_v30  ;;  %v4753_v45 = vadd.f32 %v4714_v63, %v4606_v44  ;;  %v9465_v58 = vmul.f32 %v9255_v57, %v8667_v6  ;;  %v9474_v63 = vld [vmem:[%s8722_s30 + $0x100] sm:$0xff]  ;;  %v10231_v25 = vld [vmem:[#allocation31_spill] sm:$0xff] }
 0x481   : >> { %v3857_v4 = vsel %vm1353_vm5, %v3855_v21, %v3856_v29  ;;  %v4300_v17 = vmul.f32 %v5980_v26, %v8671_v60  ;;  %v4005_v22 = vsel %vm1426_vm6, %v4003_v10, %v4004_v27  ;;  %v4213_v53 = vrot.slane %v4153_v9, 1  ;;  %v10230_v28 = vld [vmem:[#allocation30_spill] sm:$0xff]  ;;  %v10232_v11 = vld [vmem:[#allocation29_spill] sm:$0xff] }
 0x482   : >> { %v4397_v59 = vadd.f32 %v4359_v42, %v4250_v38  ;;  %v3893_v8 = vadd.f32 %v3857_v4, %v3729_v32  ;;  %v4780_v46 = vmul.f32 %v10230_v28, %v4753_v45  ;;  %v10112_v36 = vrot.slane %v9465_v58, 1  ;;  %v3762_v38 = vld [vmem:[%s8722_s30 + $0x98] sm:$0xfe] }
 0x483   : >> { %v9480_v20 = vmul.f32 %v9255_v57, %v8671_v60  ;;  %v4360_v18 = vrot.slane %v4300_v17, 2  ;;  %v4445_v7 = vmul.f32 %v5998_v47, %v10195_v31  ;;  %v4510_v61 = vmul.f32 %v6014_v3, %v10196_v51  ;;  %v3910_v17 = vld [vmem:[%s8722_s30 + $0x98] sm:$0xfc]  ;;  %v10233_v3 = vld [vmem:[#allocation32_spill] sm:$0xff] }
 0x484   : >> { %v4460_v42 = vadd.f32 %v4444_v37, %v4397_v59  ;;  %v4041_v32 = vadd.f32 %v4005_v22, %v3893_v8  ;;  %v4807_v16 = vadd.f32 %v10231_v25, %v4780_v46  ;;  %v4215_v13 = vsel %vm1353_vm5, %v4213_v53, %v10112_v36 }
 0x485   : >> { %v10110_v30 = vrot.slane %v9480_v20, 2  ;;  %v9492_v24 = vmul.f32 %v9474_v63, %v10196_v51  ;;  %v4570_v44 = vrot.slane %v4510_v61, 1  ;;  %v4657_v21 = vmul.f32 %v6030_v39, %v10232_v11  ;;  %v5981_v61 = vld [vmem:[%s8722_s30 + $0xc8] sm:$0xfc] }
 0x486   : >> { %v4607_v37 = vadd.f32 %v4569_v48, %v4460_v42  ;;  %v4104_v26 = vadd.f32 %v4088_v19, %v4041_v32  ;;  %v4823_v10 = vmax.f32 %v4807_v16, 0.0  ;;  %v9502_v4 = vmul.f32 %v9474_v63, %v10232_v11  ;;  %v5965_v32 = vld [vmem:[%s8722_s30 + $0xc8] sm:$0xfe] }
 0x487   : >> { %v4362_v9 = vsel %vm1426_vm6, %v4360_v18, %v10110_v30  ;;  %v10106_v45 = vrot.slane %v9492_v24, 1  ;;  %v4717_v47 = vrot.slane %v4657_v21, 2  ;;  %v3730_v59 = vmul.f32 %v10233_v3, %v8696_v15  ;;  %v6015_v3 = vld [vmem:[%s8722_s30 + $0xf8] sm:$0xfe] }
 0x488   : >> { %v4754_v48 = vadd.f32 %v4716_v5, %v4607_v37  ;;  %v4251_v19 = vadd.f32 %v4215_v13, %v4104_v26  ;;  %4842 = vst [vmem:[%s8945_s4 + $0x50] sm:$0xff] %v4823_v10  ;;  %v10105_v22 = vrot.slane %v9502_v4, 2  ;;  %v3795_v53 = vmul.f32 %v8700_v2, %v3762_v38  ;;  %v10234_v26 = vld [vmem:[#allocation33_spill] sm:$0xff] }
 0x489   : >> { %v4572_v8 = vsel %vm1353_vm5, %v4570_v44, %v10106_v45  ;;  %v9515_v46 = vmul.f32 %v9104_v40, %v8700_v2  ;;  %v3943_v39 = vmul.f32 %v8704_v1, %v3910_v17  ;;  %v9521_v42 = vmul.f32 %v9104_v40, %v8704_v1 }
 0x48a   : >> { %v4781_v5 = vmul.f32 %v8739_v41, %v4754_v48  ;;  %v4398_v18 = vadd.f32 %v4362_v9, %v4251_v19  ;;  %v4719_v16 = vsel %vm1426_vm6, %v4717_v47, %v10105_v22  ;;  %v3858_v13 = vrot.slane %v3795_v53, 1 }
 0x48b   : >> { %v10109_v37 = vrot.slane %v9515_v46, 1  ;;  %v4089_v44 = vmul.f32 %v10234_v26, %v8708_v12  ;;  %v4006_v10 = vrot.slane %v3943_v39, 2  ;;  %v10108_v9 = vrot.slane %v9521_v42, 2  ;;  %v9547_v39 = vld [vmem:[%s8722_s30 + $0x108] sm:$0xff] }
 0x48c   : >> { %v4808_v21 = vadd.f32 %v8743_v43, %v4781_v5  ;;  %v4461_v38 = vadd.f32 %v4445_v7, %v4398_v18  ;;  %v4154_v48 = vmul.f32 %v5965_v32, %v8712_v49  ;;  %v9539_v19 = vmul.f32 %v9332_v0, %v8712_v49 }
 0x48d   : >> { %v3860_v17 = vsel %vm1353_vm5, %v3858_v13, %v10109_v37  ;;  %v4301_v47 = vmul.f32 %v5981_v61, %v8716_v50  ;;  %v4008_v18 = vsel %vm1426_vm6, %v4006_v10, %v10108_v9  ;;  %v6031_v13 = vld [vmem:[%s8722_s30 + $0xf8] sm:$0xfc]  ;;  %v9553_v22 = vmul.f32 %v9332_v0, %v8716_v50  ;;  %v5982_v37 = vld [vmem:[%s8722_s30 + $0xe0] sm:$0x3] }
 0x48e   : >> { %v4824_v53 = vmax.f32 %v4808_v21, 0.0  ;;  %v4608_v7 = vadd.f32 %v4572_v8, %v4461_v38  ;;  %v3894_v5 = vadd.f32 %v3860_v17, %v3730_v59  ;;  %v4216_v32 = vrot.slane %v4154_v48, 1  ;;  %v5999_v21 = vld [vmem:[%s8722_s30 + $0xf8] sm:$0xff] }
 0x48f   : >> { %v10107_v26 = vrot.slane %v9539_v19, 1  ;;  %v4363_v61 = vrot.slane %v4301_v47, 2  ;;  %v4511_v38 = vmul.f32 %v6015_v3, %v8731_v35  ;;  %v10111_v17 = vrot.slane %v9553_v22, 2  ;;  %v3763_v47 = vld [vmem:[%s8722_s30 + $0xb0] sm:$0x1] }
 0x490   : >> { %4843 = vst [vmem:[%s8945_s4 + $0x58] sm:$0xff] %v4824_v53  ;;  %v4755_v59 = vadd.f32 %v4719_v16, %v4608_v7  ;;  %v4042_v8 = vadd.f32 %v4008_v18, %v3894_v5  ;;  %v9564_v48 = vmul.f32 %v9547_v39, %v8731_v35  ;;  %v4658_v45 = vmul.f32 %v6031_v13, %v8735_v62  ;;  %v3911_v7 = vld [vmem:[%s8722_s30 + $0xb0] sm:$0x3]  ;;  %v5966_v5 = vld [vmem:[%s8722_s30 + $0xe0] sm:$0x1] }
 0x491   : >> { %v4218_v10 = vsel %vm1353_vm5, %v4216_v32, %v10107_v26  ;;  %v9571_v3 = vmul.f32 %v9547_v39, %v8735_v62  ;;  %v4365_v18 = vsel %vm1426_vm6, %v4363_v61, %v10111_v17  ;;  %v4446_v32 = vmul.f32 %v5999_v21, %v8720_v34 }
 0x492   : >> { %v4782_v16 = vmul.f32 %v10230_v28, %v4755_v59  ;;  %v4105_v53 = vadd.f32 %v4089_v44, %v4042_v8  ;;  %v4573_v26 = vrot.slane %v4511_v38, 1  ;;  %v4574_v9 = vrot.slane %v9564_v48, 1 }
 0x493   : >> { %v4720_v59 = vrot.slane %v4658_v45, 2  ;;  %v3798_v8 = vmul.f32 %v8655_v55, %v3763_v47  ;;  %v4721_v30 = vrot.slane %v9571_v3, 2  ;;  %v3731_v61 = vmul.f32 %v9028_v56, %v8651_v33  ;;  %v6016_v47 = vld [vmem:[%s8722_s30 + $0x110] sm:$0x1]  ;;  %v3912_v56 = vld [vmem:[%s8722_s30 + $0xb8] sm:$0x3] }
 0x494   : >> { %v4809_v13 = vadd.f32 %v10231_v25, %v4782_v16  ;;  %v4252_v44 = vadd.f32 %v4218_v10, %v4105_v53  ;;  %v3946_v21 = vmul.f32 %v8659_v23, %v3911_v7  ;;  %v4157_v38 = vmul.f32 %v5966_v5, %v8667_v6  ;;  %v3764_v6 = vld [vmem:[%s8722_s30 + $0xb8] sm:$0x1]  ;;  %v5967_v5 = vld [vmem:[%s8722_s30 + $0xe8] sm:$0x1] }
 0x495   : >> { %v3861_v16 = vrot.slane %v3798_v8, 1  ;;  %v4575_v55 = vsel %vm1353_vm5, %v4573_v26, %v4574_v9  ;;  %v4304_v10 = vmul.f32 %v5982_v37, %v8671_v60  ;;  %v4722_v7 = vsel %vm1426_vm6, %v4720_v59, %v4721_v30  ;;  %v6032_v37 = vld [vmem:[%s8722_s30 + $0x110] sm:$0x3] }
 0x496   : >> { %v4825_v17 = vmax.f32 %v4809_v13, 0.0  ;;  %v4399_v36 = vadd.f32 %v4365_v18, %v4252_v44  ;;  %v4009_v45 = vrot.slane %v3946_v21, 2  ;;  %v4219_v23 = vrot.slane %v4157_v38, 1  ;;  %v5983_v44 = vld [vmem:[%s8722_s30 + $0xe8] sm:$0x3] }
 0x497   : >> { %v3862_v33 = vsel %vm1353_vm5, %v3856_v29, %v3861_v16  ;;  %v4514_v29 = vmul.f32 %v6016_v47, %v10196_v51  ;;  %v3799_v13 = vmul.f32 %v8700_v2, %v3764_v6  ;;  %v3947_v14 = vmul.f32 %v8704_v1, %v3912_v56  ;;  %v6017_v16 = vld [vmem:[%s8722_s30 + $0x118] sm:$0x1] }
 0x498   : >> { %4844 = vst [vmem:[%s8945_s4 + $0x60] sm:$0xff] %v4825_v17  ;;  %v4462_v53 = vadd.f32 %v4446_v32, %v4399_v36  ;;  %v3895_v26 = vadd.f32 %v3862_v33, %v3731_v61  ;;  %v4010_v60 = vsel %vm1426_vm6, %v4004_v27, %v4009_v45  ;;  %v4090_v36 = vmul.f32 %v9255_v57, %v8663_v52 }
 0x499   : >> { %v4366_v17 = vrot.slane %v4304_v10, 2  ;;  %v4447_v32 = vmul.f32 %v9474_v63, %v10195_v31  ;;  %v10235_v59 = vrot.slane %v9465_v58, 1  ;;  %v4661_v57 = vmul.f32 %v6032_v37, %v10232_v11 }
 0x49a   : >> { %v4609_v54 = vadd.f32 %v4575_v55, %v4462_v53  ;;  %v4043_v18 = vadd.f32 %v4010_v60, %v3895_v26  ;;  %v3732_v51 = vmul.f32 %v9104_v40, %v8696_v15  ;;  %v3863_v61 = vrot.slane %v3799_v13, 1 }
 0x49b   : >> { %v4220_v52 = vsel %vm1353_vm5, %v10235_v59, %v4219_v23  ;;  %v4011_v31 = vrot.slane %v3947_v14, 2  ;;  %v4158_v63 = vmul.f32 %v5967_v5, %v8712_v49  ;;  %v10236_v1 = vrot.slane %v9480_v20, 2 }
 0x49c   : >> { %v4756_v27 = vadd.f32 %v4722_v7, %v4609_v54  ;;  %v4106_v8 = vadd.f32 %v4090_v36, %v4043_v18  ;;  %v4576_v58 = vrot.slane %v4514_v29, 1  ;;  %v4305_v38 = vmul.f32 %v5983_v44, %v8716_v50  ;;  %v6033_v50 = vld [vmem:[%s8722_s30 + $0x118] sm:$0x3] }
 0x49d   : >> { %v4367_v21 = vsel %vm1426_vm6, %v10236_v1, %v4366_v17  ;;  %v10237_v55 = vrot.slane %v9515_v46, 1  ;;  %v10238_v40 = vrot.slane %v9521_v42, 2  ;;  %v4221_v49 = vrot.slane %v4158_v63, 1 }
 0x49e   : >> { %v4783_v2 = vmul.f32 %v8739_v41, %v4756_v27  ;;  %v4253_v11 = vadd.f32 %v4220_v52, %v4106_v8  ;;  %v4723_v20 = vrot.slane %v4661_v57, 2  ;;  %v4091_v53 = vmul.f32 %v9332_v0, %v8708_v12 }
 0x49f   : >> { %v3864_v15 = vsel %vm1353_vm5, %v10237_v55, %v3863_v61  ;;  %v4012_v45 = vsel %vm1426_vm6, %v10238_v40, %v4011_v31  ;;  %v4368_v23 = vrot.slane %v4305_v38, 2  ;;  %v4515_v46 = vmul.f32 %v6017_v16, %v8731_v35 }
 0x4a0   : >> { %v4810_v10 = vadd.f32 %v8743_v43, %v4783_v2  ;;  %v3896_v47 = vadd.f32 %v3864_v15, %v3732_v51  ;;  %v4400_v33 = vadd.f32 %v4367_v21, %v4253_v11  ;;  %v10239_v56 = vrot.slane %v9492_v24, 1 }
 0x4a1   : >> { %v10240_v60 = vrot.slane %v9539_v19, 1  ;;  %v4662_v37 = vmul.f32 %v6033_v50, %v8735_v62  ;;  %v10241_v12 = vrot.slane %v9502_v4, 2  ;;  %v10242_v17 = vrot.slane %v9553_v22, 2 }
 0x4a2   : >> { %v4826_v6 = vmax.f32 %v4810_v10, 0.0  ;;  %v4577_v42 = vsel %vm1353_vm5, %v10239_v56, %v4576_v58  ;;  %v4044_v7 = vadd.f32 %v4012_v45, %v3896_v47  ;;  %v4463_v26 = vadd.f32 %v4447_v32, %v4400_v33 }
 0x4a3   : >> { %v4222_v36 = vsel %vm1353_vm5, %v10240_v60, %v4221_v49  ;;  %v4724_v0 = vsel %vm1426_vm6, %v10241_v12, %v4723_v20  ;;  %v4369_v24 = vsel %vm1426_vm6, %v10242_v17, %v4368_v23  ;;  %v4578_v29 = vrot.slane %v4515_v46, 1 }
 0x4a4   : >> { %4845 = vst [vmem:[%s8945_s4 + $0x68] sm:$0xff] %v4826_v6  ;;  %v4107_v54 = vadd.f32 %v4091_v53, %v4044_v7  ;;  %v4610_v35 = vadd.f32 %v4577_v42, %v4463_v26  ;;  %v4448_v19 = vmul.f32 %v9547_v39, %v8720_v34  ;;  %v4725_v62 = vrot.slane %v4662_v37, 2 }
 0x4a5   : >> { %v4579_v13 = vsel %vm1353_vm5, %v4574_v9, %v4578_v29 }
 0x4a6   : >> { %v4254_v5 = vadd.f32 %v4222_v36, %v4107_v54  ;;  %v4757_v18 = vadd.f32 %v4724_v0, %v4610_v35  ;;  %v4726_v44 = vsel %vm1426_vm6, %v4721_v30, %v4725_v62  ;;  %v9678_v30 = vld [vmem:[%s10016_s21] sm:$0x3] (%p3682_p2) }
 0x4a8   : >> { %v4401_v32 = vadd.f32 %v4369_v24, %v4254_v5  ;;  %v4784_v4 = vmul.f32 %v10230_v28, %v4757_v18 }
 0x4aa   : >> { %v4464_v14 = vadd.f32 %v4448_v19, %v4401_v32  ;;  %v4811_v22 = vadd.f32 %v10231_v25, %v4784_v4  ;;  %v9673_v25 = vld [vmem:[%s10015_s20] sm:$0x3] (%p3682_p2) }
 0x4ac   : >> { %v4611_v27 = vadd.f32 %v4579_v13, %v4464_v14  ;;  %v4827_v59 = vmax.f32 %v4811_v22, 0.0 }
 0x4ae   : >> { %v4758_v34 = vadd.f32 %v4726_v44, %v4611_v27  ;;  %4846 = vst [vmem:[%s8945_s4 + $0x70] sm:$0xff] %v4827_v59 }
 0x4b0   : >> { %v4785_v39 = vmul.f32 %v8739_v41, %v4758_v34  ;;  %v9680_v41 = vmov (%p3682_p2), 0.0  }
 0x4b2   : >> { %v4812_v52 = vadd.f32 %v8743_v43, %v4785_v39  ;;  %3684 = sbr.rel (!%p3682_p2) target bundleno = 1022 (0x3fe), region = 356 }
 0x4b4   : >> { %v4828_v28 = vmax.f32 %v4812_v52, 0.0 }
 0x4b6   : >> { %4847 = vst [vmem:[%s8945_s4 + $0x78] sm:$0xff] %v4828_v28 }
 0x4b7 LB: >> { %v6331_v43 = vld [vmem:[%s10014_s19 + $0x74] ss:$8 sps:$4 sm:$0xff]   ;;  %v6333_v9 = vld [vmem:[%s10014_s19 + $0x70] ss:$8 sps:$4 sm:$0xff]   ;;  %v6334_v48 = vld [vmem:[%s10014_s19 + $0x64] ss:$8 sps:$4 sm:$0xff]   ;;  %s6503_s0 = sphi %s9682_s0, %s4855_s0   ;;  %v6499_v41 = vphi %v9680_v41, %v10245_v41  }
 0x4b8   : >> { %5077 = vmatprep.subr.bf16.mxu0 %v6331_v43  ;;  %v6336_v3 = vld [vmem:[%s10014_s19 + $0x60] ss:$8 sps:$4 sm:$0xff]   ;;  %v6337_v57 = vld [vmem:[%s10014_s19 + $0x54] ss:$8 sps:$4 sm:$0xff]   ;;  %v6339_v51 = vld [vmem:[%s10014_s19 + $0x50] ss:$8 sps:$4 sm:$0xff]  }
 0x4b9   : >> { %5078 = vmatpush1.bf16.msra.mxu0 %v6333_v9  ;;  %v6340_v8 = vld [vmem:[%s10014_s19 + $0x44] ss:$8 sps:$4 sm:$0xff]   ;;  %v6342_v61 = vld [vmem:[%s10014_s19 + $0x40] ss:$8 sps:$4 sm:$0xff]   ;;  %v6343_v31 = vld [vmem:[%s10014_s19 + $0x34] ss:$8 sps:$4 sm:$0xff]  }
 0x4ba   : >> { %5079 = vmatprep.subr.bf16.mxu0 %v6334_v48  ;;  %v6345_v63 = vld [vmem:[%s10014_s19 + $0x30] ss:$8 sps:$4 sm:$0xff]   ;;  %s6090_s7 = sshll.u32 %s6503_s0, 7  ;;  %v6346_v2 = vld [vmem:[%s10014_s19 + $0x24] ss:$8 sps:$4 sm:$0xff]   ;;  %s4855_s0 = sadd.s32 1, %s6503_s0  }
 0x4bb   : >> { %v6348_v1 = vld [vmem:[%s10014_s19 + $0x20] ss:$8 sps:$4 sm:$0xff]   ;;  %v6349_v21 = vld [vmem:[%s10014_s19 + $0x14] ss:$8 sps:$4 sm:$0xff]   ;;  %s9730_s28 = scalar_lea.vmem [#allocation4], %s6090_s7  ;;  %p4852_p3 = scmp.ge.s32.totalorder %s4855_s0, 4  }
 0x4bc   : >> { %v6351_v11 = vld [vmem:[%s10014_s19 + $0x10] ss:$8 sps:$4 sm:$0xff]   ;;  %v6352_v55 = vld [vmem:[%s10014_s19 + $0x4] ss:$8 sps:$4 sm:$0xff]   ;;  %v6354_v15 = vld [vmem:[%s10014_s19] ss:$8 sps:$4 sm:$0xff]  }
 0x4bd   : >> { %5080 = vmatpush1.bf16.msra.mxu0 %v6336_v3  ;;  %v4862_v58 = vld [vmem:[%s9730_s28 + $0x8] sm:$0xff]  ;;  %v4864_v38 = vld [vmem:[%s9730_s28 + $0x18] sm:$0xff]  ;;  %v5250_v49 = vld [vmem:[%s10017_s22 + $0xf0] sm:$0xff]  ;;  %s6071_s24 = sshll.u32 (%p4852_p3), %s6655_s6, 4  ;;  %s5388_s27 = sshll.u32 (%p4852_p3), %s7070_s25, 4  ;;  %s5389_s27 = int_to_ptr.vmem [resolvable:$true] %s5388_s27 }
 0x4be   : >> { %5081 = vmatprep.subr.bf16.mxu0 %v6337_v57  ;;  %v4878_v16 = vpack.c.bf16 %v4864_v38, %v4862_v58  ;;  %v5251_v40 = vld [vmem:[%s10017_s22 + $0xf8] sm:$0xff]  ;;  %v5234_v10 = vld [vmem:[%s10017_s22 + $0x70] sm:$0xff]  ;;  %v5249_v47 = vld [vmem:[%s10017_s22 + $0xe8] sm:$0xff]  ;;  %s10246_s7 = sld [smem:[#allocation45_spill]] (%p4852_p3)  ;;  %s10247_s0 = sand.u32 (%p4852_p3), 1, %s6463_s26  }
 0x4bf   : >> { %6099 = vmatprep.subr.mxu1 %v5251_v40  ;;  %v5235_v45 = vld [vmem:[%s10017_s22 + $0x78] sm:$0xff]  ;;  %v5233_v53 = vld [vmem:[%s10017_s22 + $0x68] sm:$0xff]  ;;  %v5248_v50 = vld [vmem:[%s10017_s22 + $0xe0] sm:$0xff]  ;;  %s5376_s8 = scalar_lea.sflag (%p4852_p3), [#allocation6], %s10247_s0  ;;  %s6379_s1 = scalar_lea.vmem (%p4852_p3), %s5389_s27, 16 }
 0x4c0   : >> { %5109 = vmatprep.mubr.bf16.mxu0 %v4878_v16  ;;  %v6355_v20 = vld [vmem:[%s10014_s19 + $0xf4] ss:$8 sps:$4 sm:$0xff]   ;;  %6100 = vmatpush3.msra.mxu1 %v5235_v45  ;;  %v6357_v33 = vld [vmem:[%s10014_s19 + $0xf0] ss:$8 sps:$4 sm:$0xff]   ;;  %v5232_v23 = vld [vmem:[%s10017_s22 + $0x60] sm:$0xff]  ;;  %p6380_p4 = scmp.ne.s32.totalorder (%p4852_p3), %s5389_s27, %s6379_s1 }
 0x4c1   : >> { %5082 = vmatpush1.bf16.msra.mxu0 %v6339_v51  ;;  %6101 = vmatprep.subr.mxu1 %v5250_v49  ;;  %v6358_v46 = vld [vmem:[%s10014_s19 + $0xe4] ss:$8 sps:$4 sm:$0xff]   ;;  %v5247_v6 = vld [vmem:[%s10017_s22 + $0xd8] sm:$0xff]  ;;  %v5246_v42 = vld [vmem:[%s10017_s22 + $0xd0] sm:$0xff] }
 0x4c2   : >> { %5083 = vmatprep.subr.bf16.mxu0 %v6340_v8  ;;  %6102 = vmatpush3.msra.mxu1 %v5234_v10  ;;  %v5231_v56 = vld [vmem:[%s10017_s22 + $0x58] sm:$0xff]  ;;  %v6360_v7 = vld [vmem:[%s10014_s19 + $0xe0] ss:$8 sps:$4 sm:$0xff]   ;;  %v5230_v26 = vld [vmem:[%s10017_s22 + $0x50] sm:$0xff]  ;;  %p6381_p7 = pnand (%p4852_p3), %p6380_p4, %p6672_p5 }
 0x4c3   : >> { %6103 = vmatprep.subr.mxu1 %v5249_v47  ;;  %v6361_v60 = vld [vmem:[%s10014_s19 + $0xd4] ss:$8 sps:$4 sm:$0xff]   ;;  %v5245_v36 = vld [vmem:[%s10017_s22 + $0xc8] sm:$0xff]  ;;  %v5244_v12 = vld [vmem:[%s10017_s22 + $0xc0] sm:$0xff] }
 0x4c4   : >> { %6104 = vmatpush3.msra.mxu1 %v5233_v53  ;;  %v5229_v37 = vld [vmem:[%s10017_s22 + $0x48] sm:$0xff]  ;;  %v6363_v0 = vld [vmem:[%s10014_s19 + $0xd0] ss:$8 sps:$4 sm:$0xff]   ;;  %v5228_v54 = vld [vmem:[%s10017_s22 + $0x40] sm:$0xff]  ;;  %s5386_s4 = scalar_lea.hbm (%p4852_p3), %s10246_s7, %s6071_s24  ;;  %p6382_p8 = pneg (%p4852_p3), %p6381_p7 }
 0x4c5   : >> { %5084 = vmatpush1.bf16.msra.mxu0 %v6342_v61  ;;  %6105 = vmatprep.subr.mxu1 %v5248_v50  ;;  %v6364_v35 = vld [vmem:[%s10014_s19 + $0xc4] ss:$8 sps:$4 sm:$0xff]   ;;  %v5243_v17 = vld [vmem:[%s10017_s22 + $0xb8] sm:$0xff]  ;;  %v5242_v29 = vld [vmem:[%s10017_s22 + $0xb0] sm:$0xff] }
 0x4c6   : >> { %5085 = vmatprep.subr.bf16.mxu0 %v6343_v31  ;;  %6106 = vmatpush3.msra.mxu1 %v5232_v23  ;;  %v5227_v24 = vld [vmem:[%s10017_s22 + $0x38] sm:$0xff]  ;;  %v6366_v5 = vld [vmem:[%s10014_s19 + $0xc0] ss:$8 sps:$4 sm:$0xff]   ;;  %v5226_v19 = vld [vmem:[%s10017_s22 + $0x30] sm:$0xff] }
 0x4c7   : >> { %6107 = vmatprep.subr.mxu1 %v5247_v6  ;;  %v6367_v18 = vld [vmem:[%s10014_s19 + $0xb4] ss:$8 sps:$4 sm:$0xff]   ;;  %v5241_v62 = vld [vmem:[%s10017_s22 + $0xa8] sm:$0xff]  ;;  %v6369_v4 = vld [vmem:[%s10014_s19 + $0xb0] ss:$8 sps:$4 sm:$0xff]  }
 0x4c8   : >> { %6108 = vmatpush3.msra.mxu1 %v5231_v56  ;;  %v5225_v32 = vld [vmem:[%s10017_s22 + $0x28] sm:$0xff]  ;;  %v6373_v22 = vld [vmem:[%s10014_s19 + $0x94] ss:$8 sps:$4 sm:$0xff]   ;;  %v6375_v44 = vld [vmem:[%s10014_s19 + $0x90] ss:$8 sps:$4 sm:$0xff]  }
 0x4c9   : >> { %5086 = vmatpush1.bf16.msra.mxu0 %v6345_v63  ;;  %6109 = vmatprep.subr.mxu1 %v5246_v42  ;;  %v6370_v13 = vld [vmem:[%s10014_s19 + $0xa4] ss:$8 sps:$4 sm:$0xff]   ;;  %v6372_v14 = vld [vmem:[%s10014_s19 + $0xa0] ss:$8 sps:$4 sm:$0xff]   ;;  %v4863_v39 = vld [vmem:[%s9730_s28 + $0x10] sm:$0xff] }
 0x4ca   : >> { %5087 = vmatprep.subr.bf16.mxu0 %v6346_v2  ;;  %6110 = vmatpush3.msra.mxu1 %v5230_v26  ;;  %v6376_v27 = vld [vmem:[%s10014_s19 + $0x84] ss:$8 sps:$4 sm:$0xff]   ;;  %v6378_v59 = vld [vmem:[%s10014_s19 + $0x80] ss:$8 sps:$4 sm:$0xff]   ;;  %v4868_v28 = vld [vmem:[%s9730_s28 + $0x38] sm:$0xff] }
 0x4cb   : >> { %6111 = vmatprep.subr.mxu1 %v5245_v36  ;;  %v4861_v34 = vld [vmem:[%s9730_s28] sm:$0xff]  ;;  %v4866_v52 = vld [vmem:[%s9730_s28 + $0x28] sm:$0xff]  ;;  %v4867_v3 = vld [vmem:[%s9730_s28 + $0x30] sm:$0xff] }
 0x4cc   : >> { %6112 = vmatpush3.msra.mxu1 %v5229_v37  ;;  %v4877_v43 = vpack.c.bf16 %v4863_v39, %v4861_v34  ;;  %v4880_v9 = vpack.c.bf16 %v4868_v28, %v4866_v52  ;;  %v4865_v48 = vld [vmem:[%s9730_s28 + $0x20] sm:$0xff]  ;;  %v4870_v57 = vld [vmem:[%s9730_s28 + $0x48] sm:$0xff]  ;;  %v4872_v51 = vld [vmem:[%s9730_s28 + $0x58] sm:$0xff] }
 0x4cd   : >> { %5088 = vmatpush1.bf16.msra.mxu0 %v6348_v1  ;;  %6113 = vmatprep.subr.mxu1 %v5244_v12  ;;  %v4879_v8 = vpack.c.bf16 %v4867_v3, %v4865_v48  ;;  %v4882_v61 = vpack.c.bf16 %v4872_v51, %v4870_v57  ;;  %v4869_v31 = vld [vmem:[%s9730_s28 + $0x40] sm:$0xff]  ;;  %v4871_v63 = vld [vmem:[%s9730_s28 + $0x50] sm:$0xff]  ;;  %v4874_v2 = vld [vmem:[%s9730_s28 + $0x68] sm:$0xff] }
 0x4ce   : >> { %5089 = vmatprep.subr.bf16.mxu0 %v6349_v21  ;;  %6114 = vmatpush3.msra.mxu1 %v5228_v54  ;;  %v4876_v1 = vld [vmem:[%s9730_s28 + $0x78] sm:$0xff]  ;;  %v4881_v21 = vpack.c.bf16 %v4871_v63, %v4869_v31  ;;  %v4873_v38 = vld [vmem:[%s9730_s28 + $0x60] sm:$0xff]  ;;  %v4875_v16 = vld [vmem:[%s9730_s28 + $0x70] sm:$0xff]  ;;  %s6508_s28 = smov (%p4852_p3), [#allocation5]  }
 0x4cf   : >> { %6115 = vmatprep.subr.mxu1 %v5243_v17  ;;  %v4884_v58 = vpack.c.bf16 %v4876_v1, %v4874_v2  ;;  %v5239_v40 = vld [vmem:[%s10017_s22 + $0x98] sm:$0xff]  ;;  %v5238_v49 = vld [vmem:[%s10017_s22 + $0x90] sm:$0xff]  ;;  %v5221_v47 = vld [vmem:[%s10017_s22 + $0x8] sm:$0xff]  ;;  %s6383_s5 = sshll.u32 (%p4852_p3), %s6508_s28, 4  ;;  %s6384_s5 = int_to_ptr.vmem [resolvable:$false] %s6383_s5 }
 0x4d0   : >> { %6116 = vmatpush3.msra.mxu1 %v5227_v24  ;;  %v5223_v45 = vld [vmem:[%s10017_s22 + $0x18] sm:$0xff]  ;;  %v5222_v10 = vld [vmem:[%s10017_s22 + $0x10] sm:$0xff]  ;;  %v5236_v53 = vld [vmem:[%s10017_s22 + $0x80] sm:$0xff]  ;;  %s6385_s29 = scalar_lea.vmem (%p4852_p3), %s6384_s5, 32  ;;  %p6386_p9 = scmp.lt.s32.totalorder (%p4852_p3), %s5389_s27, %s6384_s5 }
 0x4d1   : >> { %5090 = vmatpush1.bf16.msra.mxu0 %v6351_v11  ;;  %6117 = vmatprep.subr.mxu1 %v5242_v29  ;;  %v4883_v11 = vpack.c.bf16 %v4875_v16, %v4873_v38  ;;  %v5220_v50 = vld [vmem:[%s10017_s22] sm:$0xff]  ;;  %p6387_p10 = scmp.lt.s32.totalorder (%p4852_p3), %s6385_s29, %s6379_s1 }
 0x4d2   : >> { %5091 = vmatprep.subr.bf16.mxu0 %v6352_v55  ;;  %6118 = vmatpush3.msra.mxu1 %v5226_v19  ;;  %v5240_v55 = vld [vmem:[%s10017_s22 + $0xa0] sm:$0xff] }
 0x4d3   : >> { %6119 = vmatprep.subr.mxu1 %v5241_v62  ;;  %p6388_p11 = por (%p4852_p3), %p6387_p10, %p6386_p9 }
 0x4d4   : >> { %6120 = vmatpush3.msra.mxu1 %v5225_v32 }
 0x4d5   : >> { %5092 = vmatpush1.bf16.msra.mxu0 %v6354_v15  ;;  %6121 = vmatprep.subr.mxu1 %v5240_v55  ;;  %v5224_v15 = vld [vmem:[%s10017_s22 + $0x20] sm:$0xff]  ;;  %p6389_p12 = pnand (%p4852_p3), %p6388_p11, %p6382_p8 }
 0x4d6   : >> { %5093 = vmatprep.subr.bf16.mxu0 %v6355_v20  ;;  %6122 = vmatpush3.msra.mxu1 %v5224_v15  ;;  %v5237_v20 = vld [vmem:[%s10017_s22 + $0x88] sm:$0xff] }
 0x4d7   : >> { %6123 = vmatprep.subr.mxu1 %v5239_v40 }
 0x4d8   : >> { %6124 = vmatpush3.msra.mxu1 %v5223_v45 }
 0x4d9   : >> { %5094 = vmatpush2.bf16.msra.mxu0 %v6357_v33  ;;  %6125 = vmatprep.subr.mxu1 %v5238_v49  ;;  %v10243_v33 = vld [vmem:[#allocation14_spill] sm:$0xff] }
 0x4da   : >> { %5095 = vmatprep.subr.bf16.mxu0 %v6358_v46  ;;  %6126 = vmatpush3.msra.mxu1 %v5222_v10  ;;  %v9903_v23 = vrot.slane %v9673_v25, %v10243_v33  ;;  %v10244_v46 = vld [vmem:[#allocation15_spill] sm:$0xff]  ;;  %v9911_v42 = vrot.slane %v9678_v30, %v10243_v33 }
 0x4db   : >> { %6127 = vmatprep.subr.mxu1 %v5237_v20  ;;  %v9907_v6 = vrot.slane %v9673_v25, %v10244_v46  ;;  %v9916_v26 = vrot.slane %v9678_v30, %v10244_v46 }
 0x4dc   : >> { %6128 = vmatpush3.msra.mxu1 %v5221_v47 }
 0x4dd   : >> { %5096 = vmatpush2.bf16.msra.mxu0 %v6360_v7  ;;  %6129 = vmatprep.subr.mxu1 %v5236_v53 }
 0x4de   : >> { %5097 = vmatprep.subr.bf16.mxu0 %v6361_v60  ;;  %6130 = vmatpush3.msra.mxu1 %v5220_v50 }
 0x4e1   : >> { %5098 = vmatpush2.bf16.msra.mxu0 %v6363_v0 }
 0x4e2   : >> { %5099 = vmatprep.subr.bf16.mxu0 %v6364_v35 }
 0x4e5   : >> { %5100 = vmatpush2.bf16.msra.mxu0 %v6366_v5 }
 0x4e6   : >> { %5101 = vmatprep.subr.bf16.mxu0 %v6367_v18 }
 0x4e9   : >> { %5102 = vmatpush2.bf16.msra.mxu0 %v6369_v4 }
 0x4ea   : >> { %5103 = vmatprep.subr.bf16.mxu0 %v6370_v13 }
 0x4ed   : >> { %5104 = vmatpush2.bf16.msra.mxu0 %v6372_v14 }
 0x4ee   : >> { %5105 = vmatprep.subr.bf16.mxu0 %v6373_v22 }
 0x4f1   : >> { %5106 = vmatpush2.bf16.msra.mxu0 %v6375_v44 }
 0x4f2   : >> { %5107 = vmatprep.subr.bf16.mxu0 %v6376_v27 }
 0x4f5   : >> { %5108 = vmatpush2.bf16.msra.mxu0 %v6378_v59 }
 0x4f8   : >> { %5110 = vmatmul.mubr.bf16.vlgmr.msra.gmra.mxu0 %v4877_v43 }
 0x4f9   : >> { %5119 = vmatprep.mubr.bf16.mxu0 %v4880_v9 }
 0x500   : >> { %5120 = vmatmul.mubr.bf16.gmra.mxu0 %v4879_v8 }
 0x501   : >> { %5129 = vmatprep.mubr.bf16.mxu0 %v4882_v61 }
 0x508   : >> { %5130 = vmatmul.mubr.bf16.gmra.mxu0 %v4881_v21 }
 0x509   : >> { %5139 = vmatprep.mubr.bf16.mxu0 %v4884_v58 }
 0x510   : >> { %5140 = vmatmul.mubr.bf16.gmra.mxu0 %v4883_v11 }
 0x5b8   : >> { %v5111_v56 = vpop.f32.mrf.mxu0 }
 0x5b9   : >> { %v5161_v7 = vmul.f32 %v9903_v23, %v5111_v56 }
 0x5ba   : >> { %v5113_v60 = vpop.f32.mrf.mxu0 }
 0x5bb   : >> { %v5162_v36 = vmul.f32 %v9907_v6, %v5113_v60  ;;  %v5188_v37 = vadd.f32 %v9911_v42, %v5161_v7 }
 0x5bc   : >> { %v5115_v12 = vpop.f32.mrf.mxu0 }
 0x5bd   : >> { %v5163_v0 = vmul.f32 %v9903_v23, %v5115_v12  ;;  %v5189_v54 = vadd.f32 %v9916_v26, %v5162_v36  ;;  %v5204_v29 = vmax.f32 %v5188_v37, 0.0 }
 0x5be   : >> { %v5117_v35 = vpop.f32.mrf.mxu0 }
 0x5bf   : >> { %v5164_v17 = vmul.f32 %v9907_v6, %v5117_v35  ;;  %v5205_v24 = vmax.f32 %v5189_v54, 0.0  ;;  %v5190_v5 = vadd.f32 %v9911_v42, %v5163_v0 }
 0x5c0   : >> { %v5121_v19 = vpop.f32.mrf.mxu0 }
 0x5c1   : >> { %v5191_v18 = vadd.f32 %v9916_v26, %v5164_v17  ;;  %v5165_v62 = vmul.f32 %v9903_v23, %v5121_v19  ;;  %5316 = vmatprep.mubr.f32.mxu1 %v5205_v24  ;;  %v5206_v14 = vmax.f32 %v5190_v5, 0.0 }
 0x5c2   : >> { %v5123_v32 = vpop.f32.mrf.mxu0  ;;  %5317 = vmatmul.mubr.f32.vlgmr.msra.gmra.mxu1 %v5204_v29 }
 0x5c3   : >> { %v5207_v4 = vmax.f32 %v5191_v18, 0.0  ;;  %v5166_v13 = vmul.f32 %v9907_v6, %v5123_v32  ;;  %v5192_v22 = vadd.f32 %v9911_v42, %v5165_v62 }
 0x5c4   : >> { %v5125_v44 = vpop.f32.mrf.mxu0 }
 0x5c5   : >> { %v5193_v27 = vadd.f32 %v9916_v26, %v5166_v13  ;;  %v5167_v59 = vmul.f32 %v9903_v23, %v5125_v44  ;;  %5321 = vmatprep.mubr.f32.mxu1 %v5207_v4  ;;  %v5208_v28 = vmax.f32 %v5192_v22, 0.0 }
 0x5c6   : >> { %v5127_v34 = vpop.f32.mrf.mxu0  ;;  %5322 = vmatmul.mubr.f32.gmra.mxu1 %v5206_v14 }
 0x5c7   : >> { %v5209_v39 = vmax.f32 %v5193_v27, 0.0  ;;  %v5168_v52 = vmul.f32 %v9907_v6, %v5127_v34  ;;  %v5194_v43 = vadd.f32 %v9911_v42, %v5167_v59 }
 0x5c8   : >> { %v5131_v9 = vpop.f32.mrf.mxu0 }
 0x5c9   : >> { %v5195_v48 = vadd.f32 %v9916_v26, %v5168_v52  ;;  %v5169_v3 = vmul.f32 %v9903_v23, %v5131_v9  ;;  %5326 = vmatprep.mubr.f32.mxu1 %v5209_v39  ;;  %v5210_v61 = vmax.f32 %v5194_v43, 0.0 }
 0x5ca   : >> { %v5133_v57 = vpop.f32.mrf.mxu0  ;;  %5327 = vmatmul.mubr.f32.gmra.mxu1 %v5208_v28 }
 0x5cb   : >> { %v5211_v51 = vmax.f32 %v5195_v48, 0.0  ;;  %v5170_v8 = vmul.f32 %v9907_v6, %v5133_v57  ;;  %v5196_v31 = vadd.f32 %v9911_v42, %v5169_v3 }
 0x5cc   : >> { %v5135_v63 = vpop.f32.mrf.mxu0 }
 0x5cd   : >> { %v5197_v2 = vadd.f32 %v9916_v26, %v5170_v8  ;;  %v5171_v1 = vmul.f32 %v9903_v23, %v5135_v63  ;;  %5331 = vmatprep.mubr.f32.mxu1 %v5211_v51  ;;  %v5212_v16 = vmax.f32 %v5196_v31, 0.0 }
 0x5ce   : >> { %v5137_v21 = vpop.f32.mrf.mxu0  ;;  %5332 = vmatmul.mubr.f32.gmra.mxu1 %v5210_v61 }
 0x5cf   : >> { %v5213_v58 = vmax.f32 %v5197_v2, 0.0  ;;  %v5172_v38 = vmul.f32 %v9907_v6, %v5137_v21  ;;  %v5198_v11 = vadd.f32 %v9911_v42, %v5171_v1 }
 0x5d0   : >> { %v5141_v55 = vpop.f32.mrf.mxu0 }
 0x5d1   : >> { %v5199_v15 = vadd.f32 %v9916_v26, %v5172_v38  ;;  %v5173_v40 = vmul.f32 %v9903_v23, %v5141_v55  ;;  %5336 = vmatprep.mubr.f32.mxu1 %v5213_v58  ;;  %v5214_v20 = vmax.f32 %v5198_v11, 0.0  ;;  %v5372_v38 = vld [vmem:[%s10018_s23] sm:$0x1] (%p4852_p3) }
 0x5d2   : >> { %v5143_v45 = vpop.f32.mrf.mxu0  ;;  %5337 = vmatmul.mubr.f32.gmra.mxu1 %v5212_v16 }
 0x5d3   : >> { %v5215_v49 = vmax.f32 %v5199_v15, 0.0  ;;  %v5174_v10 = vmul.f32 %v9907_v6, %v5143_v45  ;;  %v5200_v47 = vadd.f32 %v9911_v42, %v5173_v40 }
 0x5d4   : >> { %v5145_v53 = vpop.f32.mrf.mxu0 }
 0x5d5   : >> { %v5201_v50 = vadd.f32 %v9916_v26, %v5174_v10  ;;  %v5175_v33 = vmul.f32 %v9903_v23, %v5145_v53  ;;  %5341 = vmatprep.mubr.f32.mxu1 %v5215_v49  ;;  %v5216_v60 = vmax.f32 %v5200_v47, 0.0 }
 0x5d6   : >> { %v5147_v46 = vpop.f32.mrf.mxu0  ;;  %5342 = vmatmul.mubr.f32.gmra.mxu1 %v5214_v20 }
 0x5d7   : >> { %v5217_v56 = vmax.f32 %v5201_v50, 0.0  ;;  %v5176_v7 = vmul.f32 %v9907_v6, %v5147_v46  ;;  %v5202_v36 = vadd.f32 %v9911_v42, %v5175_v33 }
 0x5d9   : >> { %v5203_v37 = vadd.f32 %v9916_v26, %v5176_v7  ;;  %5346 = vmatprep.mubr.f32.mxu1 %v5217_v56  ;;  %v5218_v0 = vmax.f32 %v5202_v36, 0.0 }
 0x5da   : >> { %5347 = vmatmul.mubr.f32.gmra.mxu1 %v5216_v60 }
 0x5db   : >> { %v5219_v12 = vmax.f32 %v5203_v37, 0.0 }
 0x5dd   : >> { %5351 = vmatprep.mubr.f32.mxu1 %v5219_v12 }
 0x5de   : >> { %5352 = vmatmul.mubr.f32.gmra.mxu1 %v5218_v0 }
 0x682   : >> { %v6131_v54 = vpop.f32.mrf.mxu1 }
 0x684   : >> { %v6132_v35 = vpop.f32.mrf.mxu1 }
 0x685   : >> { %v6133_v42 = vadd.f32 %v6132_v35, %v6131_v54 }
 0x686   : >> { %v6134_v23 = vpop.f32.mrf.mxu1 }
 0x688   : >> { %v6135_v17 = vpop.f32.mrf.mxu1 }
 0x689   : >> { %v6136_v18 = vadd.f32 %v6135_v17, %v6134_v23 }
 0x68a   : >> { %v6137_v24 = vpop.f32.mrf.mxu1 }
 0x68b   : >> { %v5357_v4 = vadd.f32 %v6136_v18, %v6133_v42 }
 0x68c   : >> { %v6138_v29 = vpop.f32.mrf.mxu1 }
 0x68d   : >> { %v6139_v32 = vadd.f32 %v6138_v29, %v6137_v24 }
 0x68e   : >> { %v6140_v5 = vpop.f32.mrf.mxu1 }
 0x68f   : >> { %v5358_v22 = vadd.f32 %v6139_v32, %v5357_v4 }
 0x690   : >> { %v6141_v19 = vpop.f32.mrf.mxu1 }
 0x691   : >> { %v6142_v13 = vadd.f32 %v6141_v19, %v6140_v5 }
 0x692   : >> { %v6143_v6 = vpop.f32.mrf.mxu1 }
 0x693   : >> { %v5359_v59 = vadd.f32 %v6142_v13, %v5358_v22 }
 0x694   : >> { %v6144_v62 = vpop.f32.mrf.mxu1 }
 0x695   : >> { %v6145_v44 = vadd.f32 %v6144_v62, %v6143_v6 }
 0x696   : >> { %v6146_v26 = vpop.f32.mrf.mxu1 }
 0x697   : >> { %v5360_v52 = vadd.f32 %v6145_v44, %v5359_v59 }
 0x698   : >> { %v6147_v14 = vpop.f32.mrf.mxu1 }
 0x699   : >> { %v6148_v34 = vadd.f32 %v6147_v14, %v6146_v26 }
 0x69a   : >> { %v6149_v27 = vpop.f32.mrf.mxu1 }
 0x69b   : >> { %v5361_v9 = vadd.f32 %v6148_v34, %v5360_v52 }
 0x69c   : >> { %v6150_v39 = vpop.f32.mrf.mxu1 }
 0x69d   : >> { %v6151_v28 = vadd.f32 %v6150_v39, %v6149_v27 }
 0x69e   : >> { %v6152_v43 = vpop.f32.mrf.mxu1 }
 0x69f   : >> { %v5362_v3 = vadd.f32 %v6151_v28, %v5361_v9 }
 0x6a0   : >> { %v6153_v48 = vpop.f32.mrf.mxu1 }
 0x6a1   : >> { %v6154_v57 = vadd.f32 %v6153_v48, %v6152_v43 }
 0x6a3   : >> { %v5363_v51 = vadd.f32 %v6154_v57, %v5362_v3 }
 0x6a5   : >> { %v5364_v8 = vrot.slane %v5363_v51, 4 }
 0x6a7   : >> { %v5365_v61 = vadd.f32 %v5364_v8, %v5363_v51 }
 0x6a9   : >> { %v5366_v31 = vrot.slane %v5365_v61, 2 }
 0x6ab   : >> { %v5367_v63 = vadd.f32 %v5366_v31, %v5365_v61 }
 0x6ad   : >> { %v5368_v2 = vrot.slane %v5367_v63, 1 }
 0x6af   : >> { %v5369_v1 = vadd.f32 %v5368_v2, %v5367_v63  ;;  %4854 = sbr.rel (!%p4852_p3) target bundleno = 1207 (0x4b7), region = 367 }
 0x6b1   : >> { %v5370_v21 = vadd.f32 %v6499_v41, %v5369_v1  }
 0x6b3   : >> { %v10245_v41 = vmov %v5370_v21  ;;  %v5371_v58 = vmul.f32 (%p4852_p3), 0.00390625, %v5370_v21 }
 0x6b5   : > { %v5373_v41 = vadd.f32 %v5372_v38, %v5371_v58 }
 0x6b7   : > { %5374 = vst [vmem:[%s7070_s25] sm:$0x1] %v5373_v41 }
 0x6b8   : > { %6392 = shalt.err (!%p6389_p12)
}
 0x6b9   : > { %s6393_s6 = scalar_lea.hbm %s5386_s4, 16  ;;  %s6397_s30 = scalar_lea.hbm %s10246_s7, 32 }
 0x6ba   : > { %p6394_p13 = scmp.ne.s32.totalorder %s5386_s4, %s6393_s6  ;;  %p6398_p2 = scmp.lt.s32.totalorder %s5386_s4, %s10246_s7 }
 0x6bb   : > { %p6399_p3 = scmp.lt.s32.totalorder %s6397_s30, %s6393_s6 }
 0x6bc   : > { %p6395_p0 = pnand %p6394_p13, %p6672_p5 }
 0x6bd   : > { %p6400_p4 = por %p6399_p3, %p6398_p2 }
 0x6be   : > { %p6396_p1 = pneg %p6395_p0 }
 0x6c0   : > { %p6401_p7 = pnand %p6400_p4, %p6396_p1 }
 0x6c2   : > { %6404 = shalt.err (!%p6401_p7)
}
 0x6c3   : > { %6195 = dma.vmem_to_hbm [thread:$0]  (%p6672_p5), %s5389_s27, 16, %s5386_s4, %s5376_s8  }
 0x6c4 PF: > { %s10248_s1 = sld [smem:[#allocation10_spill]] }
 0x6c5   : > { %s10249_s28 = sld [smem:[#allocation8_spill]] }
 0x6ca   : > { %p6201_p8 = scmp.ge.s32.totalorder %s10248_s1, 2 }
 0x6cb   : > { %s5400_s29 = sand.u32 1, %s10249_s28  }
 0x6cc   : > { %p6198_p9 = pnand %p6201_p8, %p6676_p6  ;;  %s5401_s25 = scalar_lea.sflag [#allocation6], %s5400_s29 }
 0x6ce   : > { %p6199_p10 = pneg %p6198_p9 }
 0x6d0   : > { %6454 = dma.done.wait (%p6199_p10), %s5401_s25, 16  }
 0x6d1   : > { %6456 = vsyncadd (%p6199_p10), %s5401_s25, 4294967280  ;;  %s10251_s28 = sld [smem:[#allocation11_spill]]  ;;  %s10254_s5 = smov %s6463_s26 }
 0x6d2   : > { %s10252_s6 = sld [smem:[#allocation9_spill]] }
 0x6d3   : > { %s10253_s27 = sld [smem:[#allocation12_spill]] }
 0x6d7   : > { %p34_p11 = scmp.ge.s32.totalorder %s10251_s28, 4  }
 0x6d8   : > { %s10255_s26 = smov %s10252_s6 }
 0x6d9   :  { %36 = sbr.rel (!%p34_p11) target bundleno = 14 (0xe), region = 378 }
 0x6de   :  { %5405 = vsyncpa [#allocation6], 1 }
 0x6df   :  { %5407 = vsyncpa [#allocation6 + $0x1], 1 }

</bundles_post_ra>
